<compile_context>
chip_gen: v7x
topology: tpu7x:2x2x1
jax: 0.10.0
libtpu: 0.0.40
codegen_flags: <defaults>
</compile_context>

<pallas_src>
import jax
import jax.numpy as jnp
from jax.experimental import pallas as pl
from jax.experimental.pallas import tpu as pltpu


# ----------------------------- tunables / thresholds -----------------------------

TILE = 1024          # pairs per grid step, VMEM-resident path (multiple of 1024 -> (8,128) out blocks)
_SUB = TILE // 128   # sublane rows per output block (= 8)

TILE_G = 128         # pairs per grid step, HBM row-gather fallback
_ISSUE_UNROLL = 8    # static unroll of the DMA-issue loop (back-to-back descriptors)

# Resident-path thresholds: keep 2x double-buffered tables + index blocks + spill
# headroom comfortably under v7x's 64 MiB VMEM; also bound the (TILE, n_rows)
# one-hot intermediates.
_RESIDENT_TABLE_BYTES = 12 * 2**20
_RESIDENT_MAX_ROWS = 2048


# ----------------------------- VMEM-resident kernel ------------------------------

def _als_resident_kernel(ui_ref, pi_ref, u_ref, p_ref, out_ref):
    """One grid step: TILE (user, product) dot products, tables resident in VMEM."""
    n_u, k = u_ref.shape
    n_p = p_ref.shape[0]
    tile = ui_ref.shape[0]

    ui = ui_ref[...]                     # (TILE, 1) int32
    pi = pi_ref[...]                     # (TILE, 1) int32

    # One-hot row selection built from the indices; the actual gather then runs on
    # the otherwise-idle MXU (exact: each row of the one-hot has a single 1.0).
    oh_u = (jax.lax.broadcasted_iota(jnp.int32, (tile, n_u), 1) == ui).astype(jnp.float32)
    oh_p = (jax.lax.broadcasted_iota(jnp.int32, (tile, n_p), 1) == pi).astype(jnp.float32)
    gu = jnp.dot(oh_u, u_ref[...].astype(jnp.float32),
                 preferred_element_type=jnp.float32)          # (TILE, k)
    gp = jnp.dot(oh_p, p_ref[...].astype(jnp.float32),
                 preferred_element_type=jnp.float32)          # (TILE, k)

    # Per-pair dot products: VPU multiply + lane reduction, emitted as a lane-dense
    # (8, 128) full-vreg store (leading-dims-only reshape keeps the lane dim intact).
    prod = gu * gp                                            # (TILE, k)
    out_ref[...] = jnp.sum(prod.reshape(tile // 128, 128, k), axis=-1)   # (8, 128)


def _resident_impl(U, P, user_idx, product_idx):
    n_u, k = U.shape
    n_p, k2 = P.shape
    assert k == k2, (k, k2)
    B = user_idx.shape[0]

    # Clamp: TPU gathers are not bounds-checked; OOB indices are remapped, not raised.
    ui = jnp.clip(user_idx.astype(jnp.int32), 0, n_u - 1)
    pi = jnp.clip(product_idx.astype(jnp.int32), 0, n_p - 1)

    b_pad = ((B + TILE - 1) // TILE) * TILE
    pad = b_pad - B
    if pad:
        ui = jnp.pad(ui, (0, pad))
        pi = jnp.pad(pi, (0, pad))
    ui = ui.reshape(b_pad, 1)
    pi = pi.reshape(b_pad, 1)
    num_tiles = b_pad // TILE

    table_bytes = U.size * U.dtype.itemsize + P.size * P.dtype.itemsize
    # 2x for the pipeline's double buffers, padded (TILE,1)->(TILE,128) index blocks,
    # plus headroom for spilled one-hot / matmul intermediates; capped v7x-safe.
    vmem_limit = int(min(56 * 2**20,
                         2 * table_bytes + 4 * TILE * 128 * 4 + 16 * 2**20))

    cost = pl.CostEstimate(
        flops=2 * b_pad * k * (n_u + n_p + 1),
        transcendentals=0,
        bytes_accessed=int(table_bytes + 2 * b_pad * 4 + b_pad * 4))

    out = pl.pallas_call(
        _als_resident_kernel,
        out_shape=jax.ShapeDtypeStruct((num_tiles * _SUB, 128), jnp.float32),
        grid_spec=pltpu.PrefetchScalarGridSpec(
            num_scalar_prefetch=0,
            grid=(num_tiles,),
            in_specs=[
                pl.BlockSpec((TILE, 1), lambda t: (t, 0)),    # user indices
                pl.BlockSpec((TILE, 1), lambda t: (t, 0)),    # product indices
                pl.BlockSpec((n_u, k), lambda t: (0, 0)),     # U resident (fetched once)
                pl.BlockSpec((n_p, k), lambda t: (0, 0)),     # P resident (fetched once)
            ],
            out_specs=pl.BlockSpec((_SUB, 128), lambda t: (t, 0)),
        ),
        compiler_params=pltpu.CompilerParams(
            dimension_semantics=("parallel",),   # independent tiles -> megacore on v7x
            vmem_limit_bytes=vmem_limit),
        cost_estimate=cost,
    )(ui, pi, U, P)
    return out.reshape(-1)[:B]


# ----------------------------- HBM row-gather fallback ---------------------------

def _als_gather_kernel(uidx_ref, pidx_ref,      # SMEM scalar prefetch: (B_pad,) int32 each
                       u_hbm, p_hbm,            # pl.ANY (HBM) refs: (n_U, k), (n_P, k)
                       out_ref,                 # VMEM (TILE_G,) f32 output block
                       u_buf, p_buf,            # VMEM (2, TILE_G, k) double buffers
                       sems):                   # DMA sems (2, 2): [table, slot]
    t = pl.program_id(0)
    nt = pl.num_programs(0)
    slot = t % 2

    def issue_tile(tile, slot_):
        base = tile * TILE_G
        # Partially-unrolled issue: back-to-back DMA descriptors keep the
        # vector-misc slot busy (one descriptor per bundle).
        @pl.loop(0, TILE_G // _ISSUE_UNROLL)
        def _issue(c):
            row0 = pl.multiple_of(c * _ISSUE_UNROLL, _ISSUE_UNROLL)
            for j in range(_ISSUE_UNROLL):
                r = row0 + j
                pltpu.make_async_copy(
                    u_hbm.at[uidx_ref[base + r]], u_buf.at[slot_, r],
                    sems.at[0, slot_]).start()
                pltpu.make_async_copy(
                    p_hbm.at[pidx_ref[base + r]], p_buf.at[slot_, r],
                    sems.at[1, slot_]).start()

    # Prologue: prime this tile's slot.
    @pl.when(t == 0)
    def _():
        issue_tile(t, slot)

    # Cross-step double buffering: gather tile t+1 into the other slot before
    # waiting on / computing tile t (indices are already in SMEM).
    @pl.when(t + 1 < nt)
    def _():
        issue_tile(t + 1, 1 - slot)

    # Aggregate wait: every row copy of a table signalled the same semaphore, so a
    # single wait sized to the whole (TILE_G, k) slot buffer retires them all
    # (src==dst==buffer: only the semaphore + byte count matter for a local wait).
    pltpu.make_async_copy(u_buf.at[slot], u_buf.at[slot], sems.at[0, slot]).wait()
    pltpu.make_async_copy(p_buf.at[slot], p_buf.at[slot], sems.at[1, slot]).wait()

    # Per-pair dot products: VPU multiply + XLU lane reduction.
    prod = u_buf[slot].astype(jnp.float32) * p_buf[slot].astype(jnp.float32)
    out_ref[...] = jnp.sum(prod, axis=-1)


def _gather_impl(U, P, user_idx, product_idx):
    n_u, k = U.shape
    n_p, k2 = P.shape
    assert k == k2, (k, k2)
    B = user_idx.shape[0]

    ui = jnp.clip(user_idx.astype(jnp.int32), 0, n_u - 1)
    pi = jnp.clip(product_idx.astype(jnp.int32), 0, n_p - 1)

    b_pad = ((B + TILE_G - 1) // TILE_G) * TILE_G
    pad = b_pad - B
    if pad:
        ui = jnp.pad(ui, (0, pad))
        pi = jnp.pad(pi, (0, pad))
    num_tiles = b_pad // TILE_G

    cost = pl.CostEstimate(
        flops=2 * b_pad * k,
        transcendentals=0,
        bytes_accessed=int(2 * b_pad * k * U.dtype.itemsize + 2 * b_pad * 4 + b_pad * 4))

    out = pl.pallas_call(
        _als_gather_kernel,
        out_shape=jax.ShapeDtypeStruct((b_pad,), jnp.float32),
        grid_spec=pltpu.PrefetchScalarGridSpec(
            num_scalar_prefetch=2,
            grid=(num_tiles,),
            in_specs=[
                pl.BlockSpec(memory_space=pl.ANY),    # U stays in HBM
                pl.BlockSpec(memory_space=pl.ANY),    # P stays in HBM
            ],
            out_specs=pl.BlockSpec((TILE_G,), lambda t, u_i, p_i: (t,)),
            scratch_shapes=[
                pltpu.VMEM((2, TILE_G, k), U.dtype),
                pltpu.VMEM((2, TILE_G, k), P.dtype),
                pltpu.SemaphoreType.DMA((2, 2)),
            ],
        ),
        compiler_params=pltpu.CompilerParams(
            # Cross-step double buffering hands tile t+1's gather from step t to
            # step t+1, so this grid axis must run sequentially on one core.
            dimension_semantics=("arbitrary",)),
        cost_estimate=cost,
    )(ui, pi, U, P)
    return out[:B]


# ----------------------------- public wrappers ------------------------------------

def _forward_batched(U, P, user_idx, product_idx):
    """Shape-static dispatch between the VMEM-resident and HBM-gather Pallas kernels."""
    table_bytes = U.size * U.dtype.itemsize + P.size * P.dtype.itemsize
    if (table_bytes <= _RESIDENT_TABLE_BYTES
            and max(U.shape[0], P.shape[0]) <= _RESIDENT_MAX_ROWS):
        return _resident_impl(U, P, user_idx, product_idx)
    return _gather_impl(U, P, user_idx, product_idx)


recommender_forward_batched = jax.jit(_forward_batched)
# Exposed for testing / very large tables.
recommender_forward_batched_hbm_gather = jax.jit(_gather_impl)


@jax.jit
def recommender_forward(U, P, i_user, i_product):
    """Scalar forward, matching torch `U[i_user] @ P[i_product]`.

    Per the perf review: a single pair is served by a plain dynamic-slice + dot
    (much cheaper than a one-tile Pallas dispatch); the Pallas kernels above cover
    the batched hot path (get_loss / batched forward).
    """
    iu = jnp.clip(jnp.asarray(i_user, jnp.int32), 0, U.shape[0] - 1)
    ip = jnp.clip(jnp.asarray(i_product, jnp.int32), 0, P.shape[0] - 1)
    u = jax.lax.dynamic_index_in_dim(U, iu, axis=0, keepdims=False)
    p = jax.lax.dynamic_index_in_dim(P, ip, axis=0, keepdims=False)
    return jnp.dot(u, p)


@jax.jit
def recommender_get_loss(U, P, users, products, ratings):
    """MSE over (u, m, r) triples, matching Recommender.get_loss (batched)."""
    preds = _forward_batched(U, P, users, products)
    return jnp.mean((preds - ratings.astype(jnp.float32)) ** 2)


# ----------------------------- demo / self-test ------------------------------------

if __name__ == "__main__":
    n_U, n_P, k = 64, 96, 128
    key = jax.random.PRNGKey(0)
    ku, kp, ki, kj, kr = jax.random.split(key, 5)
    # torch.rand -> uniform [0, 1)  (same distribution; values differ from torch)
    U = jax.random.uniform(ku, (n_U, k), dtype=jnp.float32)
    P = jax.random.uniform(kp, (n_P, k), dtype=jnp.float32)

    B = 300  # deliberately not a multiple of any tile size to exercise padding
    users = jax.random.randint(ki, (B,), 0, n_U, dtype=jnp.int32)
    products = jax.random.randint(kj, (B,), 0, n_P, dtype=jnp.int32)
    ref = jnp.einsum("bk,bk->b", U[users], P[products])

    # --- batched forward, VMEM-resident (one-hot MXU gather) path: the default here ---
    preds = jax.block_until_ready(recommender_forward_batched(U, P, users, products))
    assert preds.shape == (B,), preds.shape
    assert jnp.allclose(preds, ref, rtol=1e-5, atol=1e-4), float(
        jnp.max(jnp.abs(preds - ref)))

    # --- batched forward, HBM row-gather fallback (forced) to validate the large-table path ---
    preds_g = jax.block_until_ready(
        recommender_forward_batched_hbm_gather(U, P, users, products))
    assert preds_g.shape == (B,), preds_g.shape
    assert jnp.allclose(preds_g, ref, rtol=1e-5, atol=1e-4), float(
        jnp.max(jnp.abs(preds_g - ref)))

    # --- scalar forward, matching Recommender.forward(i_user, i_product) ---
    out = jax.block_until_ready(recommender_forward(U, P, 3, 7))
    assert jnp.allclose(out, jnp.dot(U[3], P[7]), rtol=1e-5, atol=1e-4), out

    # --- MSE loss over (u, m, r) triples, matching Recommender.get_loss ---
    ratings = jax.random.uniform(kr, (B,), dtype=jnp.float32) * 5.0
    loss = jax.block_until_ready(recommender_get_loss(U, P, users, products, ratings))
    ref_loss = jnp.mean((ref - ratings) ** 2)
    assert jnp.allclose(loss, ref_loss, rtol=1e-5, atol=1e-4), (loss, ref_loss)

    print("KERNEL_OK")
</pallas_src>

<mosaic_0001>
module attributes {stable_mosaic.version = 11 : i64} {
  func.func @_als_resident_kernel(%arg0: i32, %arg1: memref<1024x1xi32, #tpu.memory_space<vmem>>, %arg2: memref<1024x1xi32, #tpu.memory_space<vmem>>, %arg3: memref<64x128xf32, #tpu.memory_space<vmem>>, %arg4: memref<96x128xf32, #tpu.memory_space<vmem>>, %arg5: memref<8x128xf32, #tpu.memory_space<vmem>>) attributes {dimension_semantics = [#tpu.dimension_semantics<parallel>], iteration_bounds = array<i64: 1>, scalar_prefetch = 0 : i64, scratch_operands = 0 : i64, tpu.core_type = #tpu.core_type<tc>, window_params = [{transform_indices = @transform_0, window_bounds = array<i64: 1024, 1>}, {transform_indices = @transform_1, window_bounds = array<i64: 1024, 1>}, {pipeline_mode = #tpu.pipeline_mode<synchronous>, transform_indices = @transform_2, window_bounds = array<i64: 64, 128>}, {pipeline_mode = #tpu.pipeline_mode<synchronous>, transform_indices = @transform_3, window_bounds = array<i64: 96, 128>}, {transform_indices = @transform_4, window_bounds = array<i64: 8, 128>}]} {
    %c0 = arith.constant 0 : index
    %c0_0 = arith.constant 0 : index
    %0 = vector.load %arg1[%c0, %c0_0] : memref<1024x1xi32, #tpu.memory_space<vmem>>, vector<1024x1xi32>
    %c0_1 = arith.constant 0 : index
    %c0_2 = arith.constant 0 : index
    %1 = vector.load %arg2[%c0_1, %c0_2] : memref<1024x1xi32, #tpu.memory_space<vmem>>, vector<1024x1xi32>
    %2 = tpu.iota {dimensions = array<i32: 1>} : vector<1024x64xi32>
    %3 = vector.broadcast %0 : vector<1024x1xi32> to vector<1024x64xi32>
    %4 = arith.cmpi eq, %2, %3 : vector<1024x64xi32>
    %5 = arith.extui %4 : vector<1024x64xi1> to vector<1024x64xi32>
    %6 = arith.sitofp %5 : vector<1024x64xi32> to vector<1024x64xf32>
    %7 = tpu.iota {dimensions = array<i32: 1>} : vector<1024x96xi32>
    %8 = vector.broadcast %1 : vector<1024x1xi32> to vector<1024x96xi32>
    %9 = arith.cmpi eq, %7, %8 : vector<1024x96xi32>
    %10 = arith.extui %9 : vector<1024x96xi1> to vector<1024x96xi32>
    %11 = arith.sitofp %10 : vector<1024x96xi32> to vector<1024x96xf32>
    %c0_3 = arith.constant 0 : index
    %c0_4 = arith.constant 0 : index
    %12 = vector.load %arg3[%c0_3, %c0_4] : memref<64x128xf32, #tpu.memory_space<vmem>>, vector<64x128xf32>
    %cst = arith.constant dense<0.000000e+00> : vector<1024x128xf32>
    %13 = tpu.matmul %6, %12, %cst {dimension_numbers = #tpu.dot_dimension_numbers<[1], [0], [0], [1], [0, 0, 1, 1], [], []>} : vector<1024x64xf32>, vector<64x128xf32>, vector<1024x128xf32> -> vector<1024x128xf32>
    %c0_5 = arith.constant 0 : index
    %c0_6 = arith.constant 0 : index
    %14 = vector.load %arg4[%c0_5, %c0_6] : memref<96x128xf32, #tpu.memory_space<vmem>>, vector<96x128xf32>
    %cst_7 = arith.constant dense<0.000000e+00> : vector<1024x128xf32>
    %15 = tpu.matmul %11, %14, %cst_7 {dimension_numbers = #tpu.dot_dimension_numbers<[1], [0], [0], [1], [0, 0, 1, 1], [], []>} : vector<1024x96xf32>, vector<96x128xf32>, vector<1024x128xf32> -> vector<1024x128xf32>
    %16 = arith.mulf %13, %15 : vector<1024x128xf32>
    %17 = vector.shape_cast %16 : vector<1024x128xf32> to vector<8x128x128xf32>
    %cst_8 = arith.constant dense<0.000000e+00> : vector<8x128xf32>
    %18 = vector.multi_reduction <add>, %17, %cst_8 [2] : vector<8x128x128xf32> to vector<8x128xf32>
    %c0_9 = arith.constant 0 : index
    %c0_10 = arith.constant 0 : index
    %19 = vector.load %arg5[%c0_9, %c0_10] : memref<8x128xf32, #tpu.memory_space<vmem>>, vector<8x128xf32>
    tpu.vector_store %arg5[%c0_9, %c0_10], %18 {strides = array<i32>} : memref<8x128xf32, #tpu.memory_space<vmem>>, vector<8x128xf32>,
    return
  }
  func.func @transform_0(%arg0: i32) -> (i32, i32) {
    %c0_i32 = arith.constant 0 : i32
    %c0_i32_0 = arith.constant 0 : i32
    return %arg0, %c0_i32 : i32, i32
  }
  func.func @transform_1(%arg0: i32) -> (i32, i32) {
    %c0_i32 = arith.constant 0 : i32
    %c0_i32_0 = arith.constant 0 : i32
    return %arg0, %c0_i32 : i32, i32
  }
  func.func @transform_2(%arg0: i32) -> (i32, i32) {
    %c0_i32 = arith.constant 0 : i32
    %c0_i32_0 = arith.constant 0 : i32
    %c0_i32_1 = arith.constant 0 : i32
    return %c0_i32, %c0_i32_0 : i32, i32
  }
  func.func @transform_3(%arg0: i32) -> (i32, i32) {
    %c0_i32 = arith.constant 0 : i32
    %c0_i32_0 = arith.constant 0 : i32
    %c0_i32_1 = arith.constant 0 : i32
    return %c0_i32, %c0_i32_0 : i32, i32
  }
  func.func @transform_4(%arg0: i32) -> (i32, i32) {
    %c0_i32 = arith.constant 0 : i32
    %c0_i32_0 = arith.constant 0 : i32
    return %arg0, %c0_i32 : i32, i32
  }
}

</mosaic_0001>

<bundles_post_ra>
// kernel: _forward_batched.1
= control target key start
LH: loop header
LB: loop body
LE: loop exit
PB: predicated region body
PF: predicated region fallthrough
CT: control target
= control target key end

     0   :  { %v6473_v0 = vmov 0   ;;  %vm1819_vm0 = vcmask 523264   ;;  %s9069_s0 = inlined_call_operand.vmem [shape: s32[1024,1], index: 0, kind: input, shape index: {}]   ;;  %s9070_s2 = inlined_call_operand.vmem [shape: f32[64,128], index: 2, kind: input, shape index: {}]   ;;  %s9071_s3 = inlined_call_operand.vmem [shape: f32[96,128], index: 3, kind: input, shape index: {}]   ;;  %s9072_s1 = inlined_call_operand.vmem [shape: s32[1024,1], index: 1, kind: input, shape index: {}]   ;;  %s9073_s4 = inlined_call_operand.vmem [shape: f32[8,128], index: 4, kind: output, shape index: {}]  }
   0x1   :  { %6472 = vset.pattern.permute.xlu1 %v6473_v0  ;;  %6471 = vset.pattern.permute.xlu0 %v6473_v0  ;;  %v19_v1 = vld [vmem:[%s9069_s0 + $0x10] sm:$0xff]  ;;  %v17_v2 = vld [vmem:[%s9069_s0] sm:$0xff]  ;;  %v20_v3 = vld [vmem:[%s9069_s0 + $0x18] sm:$0xff] }
   0x2   :  { %282 = vperm.xlu1 %6472, %v19_v1   ;;  %276 = vperm.xlu0 %6471, %v17_v2   ;;  %v18_v4 = vld [vmem:[%s9069_s0 + $0x8] sm:$0xff]  ;;  %v21_v6 = vld [vmem:[%s9069_s0 + $0x20] sm:$0xff]  ;;  %v24_v7 = vld [vmem:[%s9069_s0 + $0x38] sm:$0xff] }
   0x3   :  { %v22_v5 = vld [vmem:[%s9069_s0 + $0x28] sm:$0xff]  ;;  %v23_v8 = vld [vmem:[%s9069_s0 + $0x30] sm:$0xff]  ;;  %v25_v10 = vld [vmem:[%s9069_s0 + $0x40] sm:$0xff] }
   0x4   :  { %v26_v9 = vld [vmem:[%s9069_s0 + $0x48] sm:$0xff]  ;;  %v28_v11 = vld [vmem:[%s9069_s0 + $0x58] sm:$0xff]  ;;  %v27_v12 = vld [vmem:[%s9069_s0 + $0x50] sm:$0xff] }
   0x5   :  { %v1811_v13 = vld [vmem:[%s9070_s2] sm:$0xff]  ;;  %v1812_v14 = vld [vmem:[%s9070_s2 + $0x8] sm:$0xff]  ;;  %v1813_v16 = vld [vmem:[%s9070_s2 + $0x10] sm:$0xff] }
   0x6   :  { %285 = vperm.xlu1 %6472, %v20_v3   ;;  %279 = vperm.xlu0 %6471, %v18_v4   ;;  %v6417_v15 = vpack.c.bf16 %v1812_v14, %v1811_v13  ;;  %v1814_v17 = vld [vmem:[%s9070_s2 + $0x18] sm:$0xff]  ;;  %v30_v18 = vld [vmem:[%s9069_s0 + $0x68] sm:$0xff]  ;;  %v29_v19 = vld [vmem:[%s9069_s0 + $0x60] sm:$0xff]  ;;  %v9074_v14 = vlaneseq }
   0x7   :  { %v6421_v20 = vpack.c.bf16 %v1814_v17, %v1813_v16  ;;  %v1815_v21 = vld [vmem:[%s9070_s2 + $0x20] sm:$0xff]  ;;  %v1816_v22 = vld [vmem:[%s9070_s2 + $0x28] sm:$0xff]  ;;  %v32_v23 = vld [vmem:[%s9069_s0 + $0x78] sm:$0xff] }
   0x8   :  { %6418 = vmatprep.subr.bf16.mxu0 %v6417_v15  ;;  %v31_v24 = vld [vmem:[%s9069_s0 + $0x70] sm:$0xff]  ;;  %v6425_v25 = vpack.c.bf16 %v1816_v22, %v1815_v21  ;;  %v1818_v27 = vld [vmem:[%s9070_s2 + $0x38] sm:$0xff]  ;;  %v34_v28 = vld [vmem:[%s9069_s0 + $0x88] sm:$0xff]  ;;  %v6723_v17 = vand.u32 127, %v9074_v14  ;;  %v9075_v22 = vmov 0.0  }
   0x9   :  { %6420 = vmatpush3.bf16.msra.mxu0 %v6417_v15  ;;  %v1817_v26 = vld [vmem:[%s9070_s2 + $0x30] sm:$0xff]  ;;  %v33_v29 = vld [vmem:[%s9069_s0 + $0x80] sm:$0xff]  ;;  %v36_v31 = vld [vmem:[%s9069_s0 + $0x98] sm:$0xff] }
   0xa   :  { %291 = vperm.xlu1 %6472, %v22_v5   ;;  %288 = vperm.xlu0 %6471, %v21_v6   ;;  %v6429_v30 = vpack.c.bf16 %v1818_v27, %v1817_v26  ;;  %v35_v32 = vld [vmem:[%s9069_s0 + $0x90] sm:$0xff]  ;;  %v38_v33 = vld [vmem:[%s9069_s0 + $0xa8] sm:$0xff]  ;;  %v37_v34 = vld [vmem:[%s9069_s0 + $0xa0] sm:$0xff] }
   0xb   :  { %6422 = vmatprep.subr.bf16.mxu0 %v6421_v20  ;;  %v40_v35 = vld [vmem:[%s9069_s0 + $0xb8] sm:$0xff]  ;;  %v39_v36 = vld [vmem:[%s9069_s0 + $0xb0] sm:$0xff]  ;;  %v42_v37 = vld [vmem:[%s9069_s0 + $0xc8] sm:$0xff] }
   0xc   :  { %v41_v38 = vld [vmem:[%s9069_s0 + $0xc0] sm:$0xff]  ;;  %v44_v39 = vld [vmem:[%s9069_s0 + $0xd8] sm:$0xff]  ;;  %v43_v40 = vld [vmem:[%s9069_s0 + $0xd0] sm:$0xff] }
   0xd   :  { %6424 = vmatpush3.bf16.msra.mxu0 %v6421_v20  ;;  %v46_v41 = vld [vmem:[%s9069_s0 + $0xe8] sm:$0xff]  ;;  %v45_v42 = vld [vmem:[%s9069_s0 + $0xe0] sm:$0xff]  ;;  %v48_v43 = vld [vmem:[%s9069_s0 + $0xf8] sm:$0xff] }
   0xe   :  { %297 = vperm.xlu1 %6472, %v24_v7   ;;  %294 = vperm.xlu0 %6471, %v23_v8   ;;  %v47_v44 = vld [vmem:[%s9069_s0 + $0xf0] sm:$0xff]  ;;  %v50_v45 = vld [vmem:[%s9069_s0 + $0x108] sm:$0xff]  ;;  %v49_v46 = vld [vmem:[%s9069_s0 + $0x100] sm:$0xff] }
   0xf   :  { %6426 = vmatprep.subr.bf16.mxu0 %v6425_v25  ;;  %v52_v47 = vld [vmem:[%s9069_s0 + $0x118] sm:$0xff]  ;;  %v51_v48 = vld [vmem:[%s9069_s0 + $0x110] sm:$0xff]  ;;  %v54_v49 = vld [vmem:[%s9069_s0 + $0x128] sm:$0xff] }
  0x10   :  { %v53_v50 = vld [vmem:[%s9069_s0 + $0x120] sm:$0xff]  ;;  %v56_v51 = vld [vmem:[%s9069_s0 + $0x138] sm:$0xff]  ;;  %v55_v52 = vld [vmem:[%s9069_s0 + $0x130] sm:$0xff] }
  0x11   :  { %6428 = vmatpush3.bf16.msra.mxu0 %v6425_v25  ;;  %v58_v53 = vld [vmem:[%s9069_s0 + $0x148] sm:$0xff]  ;;  %v57_v54 = vld [vmem:[%s9069_s0 + $0x140] sm:$0xff]  ;;  %v60_v55 = vld [vmem:[%s9069_s0 + $0x158] sm:$0xff] }
  0x12   :  { %303 = vperm.xlu1 %6472, %v26_v9   ;;  %300 = vperm.xlu0 %6471, %v25_v10   ;;  %v59_v56 = vld [vmem:[%s9069_s0 + $0x150] sm:$0xff]  ;;  %v62_v57 = vld [vmem:[%s9069_s0 + $0x168] sm:$0xff]  ;;  %v61_v58 = vld [vmem:[%s9069_s0 + $0x160] sm:$0xff] }
  0x13   :  { %6430 = vmatprep.subr.bf16.mxu0 %v6429_v30  ;;  %v64_v59 = vld [vmem:[%s9069_s0 + $0x178] sm:$0xff]  ;;  %v63_v60 = vld [vmem:[%s9069_s0 + $0x170] sm:$0xff]  ;;  %v66_v61 = vld [vmem:[%s9069_s0 + $0x188] sm:$0xff] }
  0x14   :  { %v65_v62 = vld [vmem:[%s9069_s0 + $0x180] sm:$0xff]  ;;  %v68_v63 = vld [vmem:[%s9069_s0 + $0x198] sm:$0xff]  ;;  %v67_v0 = vld [vmem:[%s9069_s0 + $0x190] sm:$0xff] }
  0x15   :  { %6432 = vmatpush3.bf16.msra.mxu0 %v6429_v30  ;;  %v70_v1 = vld [vmem:[%s9069_s0 + $0x1a8] sm:$0xff]  ;;  %v69_v2 = vld [vmem:[%s9069_s0 + $0x1a0] sm:$0xff]  ;;  %v72_v3 = vld [vmem:[%s9069_s0 + $0x1b8] sm:$0xff] }
  0x16   :  { %309 = vperm.xlu1 %6472, %v28_v11   ;;  %306 = vperm.xlu0 %6471, %v27_v12   ;;  %v71_v4 = vld [vmem:[%s9069_s0 + $0x1b0] sm:$0xff]  ;;  %v74_v5 = vld [vmem:[%s9069_s0 + $0x1c8] sm:$0xff]  ;;  %v73_v6 = vld [vmem:[%s9069_s0 + $0x1c0] sm:$0xff] }
  0x17   :  { %v76_v7 = vld [vmem:[%s9069_s0 + $0x1d8] sm:$0xff]  ;;  %v75_v8 = vld [vmem:[%s9069_s0 + $0x1d0] sm:$0xff]  ;;  %v2909_v9 = vld [vmem:[%s9071_s3] sm:$0xff] }
  0x18   :  { %v2910_v10 = vld [vmem:[%s9071_s3 + $0x8] sm:$0xff]  ;;  %v77_v13 = vld [vmem:[%s9069_s0 + $0x1e0] sm:$0xff]  ;;  %v80_v15 = vld [vmem:[%s9069_s0 + $0x1f8] sm:$0xff] }
  0x19   :  { %v6433_v11 = vpack.c.bf16 %v2910_v10, %v2909_v9  ;;  %v78_v12 = vld [vmem:[%s9069_s0 + $0x1e8] sm:$0xff]  ;;  %v79_v16 = vld [vmem:[%s9069_s0 + $0x1f0] sm:$0xff]  ;;  %v85_v30 = vld [vmem:[%s9069_s0 + $0x220] sm:$0xff] }
  0x1a   :  { %315 = vperm.xlu1 %6472, %v30_v18   ;;  %312 = vperm.xlu0 %6471, %v29_v19   ;;  %v82_v18 = vld [vmem:[%s9069_s0 + $0x208] sm:$0xff]  ;;  %v81_v19 = vld [vmem:[%s9069_s0 + $0x200] sm:$0xff]  ;;  %v83_v25 = vld [vmem:[%s9069_s0 + $0x210] sm:$0xff] }
  0x1b   :  { %6434 = vmatprep.subr.bf16.mxu0 %v6433_v11  ;;  %6457 = vmatprep.subr.bf16.mxu1 %v6433_v11 }
  0x1c   :  { %6463 = vmatpush3.bf16.msra.mxu1 %v6433_v11 }
  0x1e   :  { %321 = vperm.xlu1 %6472, %v32_v23   ;;  %318 = vperm.xlu0 %6471, %v31_v24   ;;  %v84_v24 = vld [vmem:[%s9069_s0 + $0x218] sm:$0xff] }
  0x22   :  { %327 = vperm.xlu1 %6472, %v34_v28   ;;  %324 = vperm.xlu0 %6471, %v33_v29   ;;  %v86_v29 = vld [vmem:[%s9069_s0 + $0x228] sm:$0xff] }
  0x26   :  { %333 = vperm.xlu1 %6472, %v36_v31   ;;  %330 = vperm.xlu0 %6471, %v35_v32  }
  0x2a   :  { %339 = vperm.xlu1 %6472, %v38_v33   ;;  %336 = vperm.xlu0 %6471, %v37_v34  }
  0x2e   :  { %345 = vperm.xlu1 %6472, %v40_v35   ;;  %342 = vperm.xlu0 %6471, %v39_v36   ;;  %v88_v36 = vld [vmem:[%s9069_s0 + $0x238] sm:$0xff] }
  0x32   :  { %351 = vperm.xlu1 %6472, %v42_v37   ;;  %348 = vperm.xlu0 %6471, %v41_v38   ;;  %v87_v37 = vld [vmem:[%s9069_s0 + $0x230] sm:$0xff] }
  0x36   :  { %357 = vperm.xlu1 %6472, %v44_v39   ;;  %354 = vperm.xlu0 %6471, %v43_v40  }
  0x3a   :  { %363 = vperm.xlu1 %6472, %v46_v41   ;;  %360 = vperm.xlu0 %6471, %v45_v42   ;;  %v90_v42 = vld [vmem:[%s9069_s0 + $0x248] sm:$0xff] }
  0x3e   :  { %369 = vperm.xlu1 %6472, %v48_v43   ;;  %366 = vperm.xlu0 %6471, %v47_v44   ;;  %v89_v43 = vld [vmem:[%s9069_s0 + $0x240] sm:$0xff] }
  0x42   :  { %375 = vperm.xlu1 %6472, %v50_v45   ;;  %372 = vperm.xlu0 %6471, %v49_v46  }
  0x46   :  { %381 = vperm.xlu1 %6472, %v52_v47   ;;  %378 = vperm.xlu0 %6471, %v51_v48   ;;  %v92_v48 = vld [vmem:[%s9069_s0 + $0x258] sm:$0xff] }
  0x4a   :  { %387 = vperm.xlu1 %6472, %v54_v49   ;;  %384 = vperm.xlu0 %6471, %v53_v50   ;;  %v91_v49 = vld [vmem:[%s9069_s0 + $0x250] sm:$0xff] }
  0x4e   :  { %393 = vperm.xlu1 %6472, %v56_v51   ;;  %390 = vperm.xlu0 %6471, %v55_v52  }
  0x52   :  { %399 = vperm.xlu1 %6472, %v58_v53   ;;  %396 = vperm.xlu0 %6471, %v57_v54   ;;  %v94_v54 = vld [vmem:[%s9069_s0 + $0x268] sm:$0xff] }
  0x56   :  { %405 = vperm.xlu1 %6472, %v60_v55   ;;  %402 = vperm.xlu0 %6471, %v59_v56   ;;  %v93_v55 = vld [vmem:[%s9069_s0 + $0x260] sm:$0xff] }
  0x5a   :  { %411 = vperm.xlu1 %6472, %v62_v57   ;;  %408 = vperm.xlu0 %6471, %v61_v58  }
  0x5e   :  { %417 = vperm.xlu1 %6472, %v64_v59   ;;  %414 = vperm.xlu0 %6471, %v63_v60   ;;  %v96_v60 = vld [vmem:[%s9069_s0 + $0x278] sm:$0xff] }
  0x62   :  { %423 = vperm.xlu1 %6472, %v66_v61   ;;  %420 = vperm.xlu0 %6471, %v65_v62   ;;  %v95_v61 = vld [vmem:[%s9069_s0 + $0x270] sm:$0xff] }
  0x66   :  { %429 = vperm.xlu1 %6472, %v68_v63   ;;  %426 = vperm.xlu0 %6471, %v67_v0   ;;  %v98_v0 = vld [vmem:[%s9069_s0 + $0x288] sm:$0xff] }
  0x6a   :  { %435 = vperm.xlu1 %6472, %v70_v1   ;;  %432 = vperm.xlu0 %6471, %v69_v2  }
  0x6e   :  { %441 = vperm.xlu1 %6472, %v72_v3   ;;  %438 = vperm.xlu0 %6471, %v71_v4   ;;  %v97_v3 = vld [vmem:[%s9069_s0 + $0x280] sm:$0xff]  ;;  %v2911_v4 = vld [vmem:[%s9071_s3 + $0x10] sm:$0xff] }
  0x72   :  { %447 = vperm.xlu1 %6472, %v74_v5   ;;  %444 = vperm.xlu0 %6471, %v73_v6   ;;  %v2912_v5 = vld [vmem:[%s9071_s3 + $0x18] sm:$0xff] }
  0x73   :  { %v6437_v6 = vpack.c.bf16 %v2912_v5, %v2911_v4  ;;  %v118_v4 = vld [vmem:[%s9069_s0 + $0x328] sm:$0xff]  ;;  %v117_v5 = vld [vmem:[%s9069_s0 + $0x320] sm:$0xff] }
  0x75   :  { %6458 = vmatprep.subr.bf16.mxu1 %v6437_v6 }
  0x76   :  { %453 = vperm.xlu1 %6472, %v76_v7   ;;  %450 = vperm.xlu0 %6471, %v75_v8  }
  0x77   :  { %6464 = vmatpush3.bf16.msra.mxu1 %v6437_v6 }
  0x7a   :  { %459 = vperm.xlu1 %6472, %v78_v12   ;;  %456 = vperm.xlu0 %6471, %v77_v13   ;;  %v99_v12 = vld [vmem:[%s9069_s0 + $0x290] sm:$0xff] }
  0x7e   :  { %465 = vperm.xlu1 %6472, %v80_v15   ;;  %462 = vperm.xlu0 %6471, %v79_v16  }
  0x81   :  { %v283_v20 = vpop.permute.xlu1 %282  ;;  %v277_v21 = vpop.permute.xlu0 %276 }
  0x82   :  { %471 = vperm.xlu1 %6472, %v82_v18   ;;  %468 = vperm.xlu0 %6471, %v81_v19   ;;  %vm659_vm1 = vcmp.eq.s32.totalorder %v6723_v17, %v277_v21  ;;  %vm661_vm2 = vcmp.eq.s32.totalorder %v6723_v17, %v283_v20  ;;  %v102_v19 = vld [vmem:[%s9069_s0 + $0x2a8] sm:$0xff]  ;;  %v101_v20 = vld [vmem:[%s9069_s0 + $0x2a0] sm:$0xff] }
  0x83   :  { %v5205_v23 = vsel %vm659_vm1, 1.0, %v9075_v22  ;;  %v5207_v31 = vsel %vm661_vm2, 1.0, %v9075_v22 }
  0x84   :  { %6009 = vmatprep.mubr.msk.f32.mxu0 %vm1819_vm0, %v5205_v23 }
  0x85   :  { %v286_v26 = vpop.permute.xlu1 %285  ;;  %v280_v27 = vpop.permute.xlu0 %279 }
  0x86   :  { %vm660_vm3 = vcmp.eq.s32.totalorder %v6723_v17, %v280_v27  ;;  %477 = vperm.xlu1 %6472, %v84_v24   ;;  %474 = vperm.xlu0 %6471, %v83_v25   ;;  %vm662_vm4 = vcmp.eq.s32.totalorder %v6723_v17, %v286_v26  ;;  %v104_v26 = vld [vmem:[%s9069_s0 + $0x2b8] sm:$0xff]  ;;  %v103_v27 = vld [vmem:[%s9069_s0 + $0x2b0] sm:$0xff] }
  0x87   :  { %v5206_v28 = vsel %vm660_vm3, 1.0, %v9075_v22  ;;  %v5208_v34 = vsel %vm662_vm4, 1.0, %v9075_v22 }
  0x88   :  { %6010 = vmatmul.mubr.msk.f32.vlgmr.msra.gmra.mrb[0].mxu0 %vm1819_vm0, %v5206_v28 }
  0x89   :  { %v292_v32 = vpop.permute.xlu1 %291  ;;  %6012 = vmatprep.mubr.msk.f32.mxu0 %vm1819_vm0, %v5207_v31  ;;  %v289_v33 = vpop.permute.xlu0 %288  ;;  %6436 = vmatpush3.bf16.msra.mxu0 %v6433_v11  ;;  %v100_v11 = vld [vmem:[%s9069_s0 + $0x298] sm:$0xff] }
  0x8a   :  { %vm663_vm5 = vcmp.eq.s32.totalorder %v6723_v17, %v289_v33  ;;  %483 = vperm.xlu1 %6472, %v86_v29   ;;  %480 = vperm.xlu0 %6471, %v85_v30   ;;  %vm664_vm6 = vcmp.eq.s32.totalorder %v6723_v17, %v292_v32  ;;  %v106_v32 = vld [vmem:[%s9069_s0 + $0x2c8] sm:$0xff]  ;;  %v105_v33 = vld [vmem:[%s9069_s0 + $0x2c0] sm:$0xff] }
  0x8b   :  { %v5209_v35 = vsel %vm663_vm5, 1.0, %v9075_v22  ;;  %v5210_v40 = vsel %vm664_vm6, 1.0, %v9075_v22  ;;  %6438 = vmatprep.subr.bf16.mxu0 %v6437_v6 }
  0x8c   :  { %6013 = vmatmul.mubr.msk.f32.gmra.mrb[2].mxu0 %vm1819_vm0, %v5208_v34 }
  0x8d   :  { %v298_v38 = vpop.permute.xlu1 %297  ;;  %6015 = vmatprep.mubr.msk.f32.mxu0 %vm1819_vm0, %v5209_v35  ;;  %v295_v39 = vpop.permute.xlu0 %294  ;;  %6440 = vmatpush3.bf16.msra.mxu0 %v6437_v6 }
  0x8e   :  { %vm665_vm7 = vcmp.eq.s32.totalorder %v6723_v17, %v295_v39  ;;  %489 = vperm.xlu1 %6472, %v88_v36   ;;  %486 = vperm.xlu0 %6471, %v87_v37   ;;  %vm666_vm8 = vcmp.eq.s32.totalorder %v6723_v17, %v298_v38  ;;  %v108_v38 = vld [vmem:[%s9069_s0 + $0x2d8] sm:$0xff]  ;;  %v107_v39 = vld [vmem:[%s9069_s0 + $0x2d0] sm:$0xff] }
  0x8f   :  { %v5211_v41 = vsel %vm665_vm7, 1.0, %v9075_v22  ;;  %v5212_v46 = vsel %vm666_vm8, 1.0, %v9075_v22 }
  0x90   :  { %6016 = vmatmul.mubr.msk.f32.gmra.mrb[4].mxu0 %vm1819_vm0, %v5210_v40 }
  0x91   :  { %v304_v44 = vpop.permute.xlu1 %303  ;;  %6018 = vmatprep.mubr.msk.f32.mxu0 %vm1819_vm0, %v5211_v41  ;;  %v301_v45 = vpop.permute.xlu0 %300 }
  0x92   :  { %vm667_vm9 = vcmp.eq.s32.totalorder %v6723_v17, %v301_v45  ;;  %495 = vperm.xlu1 %6472, %v90_v42   ;;  %492 = vperm.xlu0 %6471, %v89_v43   ;;  %vm668_vm10 = vcmp.eq.s32.totalorder %v6723_v17, %v304_v44  ;;  %v110_v44 = vld [vmem:[%s9069_s0 + $0x2e8] sm:$0xff]  ;;  %v109_v45 = vld [vmem:[%s9069_s0 + $0x2e0] sm:$0xff] }
  0x93   :  { %v5213_v47 = vsel %vm667_vm9, 1.0, %v9075_v22  ;;  %v5214_v52 = vsel %vm668_vm10, 1.0, %v9075_v22 }
  0x94   :  { %6019 = vmatmul.mubr.msk.f32.gmra.mrb[6].mxu0 %vm1819_vm0, %v5212_v46 }
  0x95   :  { %v310_v50 = vpop.permute.xlu1 %309  ;;  %6021 = vmatprep.mubr.msk.f32.mxu0 %vm1819_vm0, %v5213_v47  ;;  %v307_v51 = vpop.permute.xlu0 %306 }
  0x96   :  { %vm669_vm11 = vcmp.eq.s32.totalorder %v6723_v17, %v307_v51  ;;  %501 = vperm.xlu1 %6472, %v92_v48   ;;  %498 = vperm.xlu0 %6471, %v91_v49   ;;  %vm670_vm12 = vcmp.eq.s32.totalorder %v6723_v17, %v310_v50  ;;  %v112_v50 = vld [vmem:[%s9069_s0 + $0x2f8] sm:$0xff]  ;;  %v111_v51 = vld [vmem:[%s9069_s0 + $0x2f0] sm:$0xff] }
  0x97   :  { %v5215_v53 = vsel %vm669_vm11, 1.0, %v9075_v22  ;;  %v5216_v58 = vsel %vm670_vm12, 1.0, %v9075_v22 }
  0x98   :  { %6022 = vmatmul.mubr.msk.f32.gmra.mrb[8].mxu0 %vm1819_vm0, %v5214_v52 }
  0x99   :  { %v316_v56 = vpop.permute.xlu1 %315  ;;  %6024 = vmatprep.mubr.msk.f32.mxu0 %vm1819_vm0, %v5215_v53  ;;  %v313_v57 = vpop.permute.xlu0 %312 }
  0x9a   :  { %vm671_vm13 = vcmp.eq.s32.totalorder %v6723_v17, %v313_v57  ;;  %507 = vperm.xlu1 %6472, %v94_v54   ;;  %504 = vperm.xlu0 %6471, %v93_v55   ;;  %vm672_vm14 = vcmp.eq.s32.totalorder %v6723_v17, %v316_v56  ;;  %v114_v56 = vld [vmem:[%s9069_s0 + $0x308] sm:$0xff]  ;;  %v113_v57 = vld [vmem:[%s9069_s0 + $0x300] sm:$0xff] }
  0x9b   :  { %v5217_v59 = vsel %vm671_vm13, 1.0, %v9075_v22  ;;  %v5218_v1 = vsel %vm672_vm14, 1.0, %v9075_v22 }
  0x9c   :  { %6025 = vmatmul.mubr.msk.f32.gmra.mrb[10].mxu0 %vm1819_vm0, %v5216_v58 }
  0x9d   :  { %v322_v62 = vpop.permute.xlu1 %321  ;;  %6027 = vmatprep.mubr.msk.f32.mxu0 %vm1819_vm0, %v5217_v59  ;;  %v319_v63 = vpop.permute.xlu0 %318 }
  0x9e   :  { %vm673_vm15 = vcmp.eq.s32.totalorder %v6723_v17, %v319_v63  ;;  %513 = vperm.xlu1 %6472, %v96_v60   ;;  %510 = vperm.xlu0 %6471, %v95_v61   ;;  %vm674_vm1 = vcmp.eq.s32.totalorder %v6723_v17, %v322_v62  ;;  %v116_v62 = vld [vmem:[%s9069_s0 + $0x318] sm:$0xff]  ;;  %v115_v63 = vld [vmem:[%s9069_s0 + $0x310] sm:$0xff] }
  0x9f   :  { %v5219_v2 = vsel %vm673_vm15, 1.0, %v9075_v22  ;;  %v5220_v9 = vsel %vm674_vm1, 1.0, %v9075_v22 }
  0xa0   :  { %6028 = vmatmul.mubr.msk.f32.gmra.mrb[12].mxu0 %vm1819_vm0, %v5218_v1 }
  0xa1   :  { %v328_v7 = vpop.permute.xlu1 %327  ;;  %6030 = vmatprep.mubr.msk.f32.mxu0 %vm1819_vm0, %v5219_v2  ;;  %v325_v8 = vpop.permute.xlu0 %324 }
  0xa2   :  { %vm675_vm2 = vcmp.eq.s32.totalorder %v6723_v17, %v325_v8  ;;  %519 = vperm.xlu1 %6472, %v98_v0   ;;  %516 = vperm.xlu0 %6471, %v97_v3   ;;  %vm676_vm3 = vcmp.eq.s32.totalorder %v6723_v17, %v328_v7  ;;  %v120_v8 = vld [vmem:[%s9069_s0 + $0x338] sm:$0xff] }
  0xa3   :  { %v5221_v10 = vsel %vm675_vm2, 1.0, %v9075_v22  ;;  %v5222_v16 = vsel %vm676_vm3, 1.0, %v9075_v22 }
  0xa4   :  { %6031 = vmatmul.mubr.msk.f32.gmra.mrb[14].mxu0 %vm1819_vm0, %v5220_v9 }
  0xa5   :  { %v334_v13 = vpop.permute.xlu1 %333  ;;  %6033 = vmatprep.mubr.msk.f32.mxu0 %vm1819_vm0, %v5221_v10  ;;  %v331_v15 = vpop.permute.xlu0 %330 }
  0xa6   :  { %vm677_vm4 = vcmp.eq.s32.totalorder %v6723_v17, %v331_v15  ;;  %525 = vperm.xlu1 %6472, %v100_v11   ;;  %522 = vperm.xlu0 %6471, %v99_v12   ;;  %vm678_vm5 = vcmp.eq.s32.totalorder %v6723_v17, %v334_v13  ;;  %v119_v11 = vld [vmem:[%s9069_s0 + $0x330] sm:$0xff]  ;;  %v2913_v12 = vld [vmem:[%s9071_s3 + $0x20] sm:$0xff]  ;;  %v2914_v13 = vld [vmem:[%s9071_s3 + $0x28] sm:$0xff] }
  0xa7   :  { %v5223_v18 = vsel %vm677_vm4, 1.0, %v9075_v22  ;;  %v5224_v24 = vsel %vm678_vm5, 1.0, %v9075_v22  ;;  %v6441_v15 = vpack.c.bf16 %v2914_v13, %v2913_v12  ;;  %v140_v12 = vld [vmem:[%s9069_s0 + $0x3d8] sm:$0xff]  ;;  %v139_v13 = vld [vmem:[%s9069_s0 + $0x3d0] sm:$0xff] }
  0xa8   :  { %6034 = vmatmul.mubr.msk.f32.gmra.mrb[16].mxu0 %vm1819_vm0, %v5222_v16 }
  0xa9   :  { %v340_v21 = vpop.permute.xlu1 %339  ;;  %6036 = vmatprep.mubr.msk.f32.mxu0 %vm1819_vm0, %v5223_v18  ;;  %v337_v23 = vpop.permute.xlu0 %336  ;;  %6442 = vmatprep.subr.bf16.mxu0 %v6441_v15 }
  0xaa   :  { %vm679_vm6 = vcmp.eq.s32.totalorder %v6723_v17, %v337_v23  ;;  %531 = vperm.xlu1 %6472, %v102_v19   ;;  %528 = vperm.xlu0 %6471, %v101_v20   ;;  %vm680_vm7 = vcmp.eq.s32.totalorder %v6723_v17, %v340_v21  ;;  %v122_v21 = vld [vmem:[%s9069_s0 + $0x348] sm:$0xff]  ;;  %v121_v23 = vld [vmem:[%s9069_s0 + $0x340] sm:$0xff] }
  0xab   :  { %v5225_v25 = vsel %vm679_vm6, 1.0, %v9075_v22  ;;  %v5226_v30 = vsel %vm680_vm7, 1.0, %v9075_v22  ;;  %6459 = vmatprep.subr.bf16.mxu1 %v6441_v15  ;;  %6444 = vmatpush3.bf16.msra.mxu0 %v6441_v15 }
  0xac   :  { %6037 = vmatmul.mubr.msk.f32.gmra.mrb[18].mxu0 %vm1819_vm0, %v5224_v24  ;;  %6465 = vmatpush3.bf16.msra.mxu1 %v6441_v15  ;;  %v2915_v15 = vld [vmem:[%s9071_s3 + $0x30] sm:$0xff] }
  0xad   :  { %v346_v28 = vpop.permute.xlu1 %345  ;;  %6039 = vmatprep.mubr.msk.f32.mxu0 %vm1819_vm0, %v5225_v25  ;;  %v343_v29 = vpop.permute.xlu0 %342 }
  0xae   :  { %vm681_vm8 = vcmp.eq.s32.totalorder %v6723_v17, %v343_v29  ;;  %537 = vperm.xlu1 %6472, %v104_v26   ;;  %534 = vperm.xlu0 %6471, %v103_v27   ;;  %vm682_vm9 = vcmp.eq.s32.totalorder %v6723_v17, %v346_v28  ;;  %v124_v28 = vld [vmem:[%s9069_s0 + $0x358] sm:$0xff]  ;;  %v123_v29 = vld [vmem:[%s9069_s0 + $0x350] sm:$0xff] }
  0xaf   :  { %v5227_v31 = vsel %vm681_vm8, 1.0, %v9075_v22  ;;  %v5228_v36 = vsel %vm682_vm9, 1.0, %v9075_v22 }
  0xb0   :  { %6040 = vmatmul.mubr.msk.f32.gmra.mrb[20].mxu0 %vm1819_vm0, %v5226_v30 }
  0xb1   :  { %v352_v34 = vpop.permute.xlu1 %351  ;;  %6042 = vmatprep.mubr.msk.f32.mxu0 %vm1819_vm0, %v5227_v31  ;;  %v349_v35 = vpop.permute.xlu0 %348 }
  0xb2   :  { %vm683_vm10 = vcmp.eq.s32.totalorder %v6723_v17, %v349_v35  ;;  %543 = vperm.xlu1 %6472, %v106_v32   ;;  %540 = vperm.xlu0 %6471, %v105_v33   ;;  %vm684_vm11 = vcmp.eq.s32.totalorder %v6723_v17, %v352_v34  ;;  %v126_v34 = vld [vmem:[%s9069_s0 + $0x368] sm:$0xff]  ;;  %v125_v35 = vld [vmem:[%s9069_s0 + $0x360] sm:$0xff] }
  0xb3   :  { %v5229_v37 = vsel %vm683_vm10, 1.0, %v9075_v22  ;;  %v5230_v42 = vsel %vm684_vm11, 1.0, %v9075_v22 }
  0xb4   :  { %6043 = vmatmul.mubr.msk.f32.gmra.mrb[22].mxu0 %vm1819_vm0, %v5228_v36 }
  0xb5   :  { %v358_v40 = vpop.permute.xlu1 %357  ;;  %6045 = vmatprep.mubr.msk.f32.mxu0 %vm1819_vm0, %v5229_v37  ;;  %v355_v41 = vpop.permute.xlu0 %354 }
  0xb6   :  { %vm685_vm12 = vcmp.eq.s32.totalorder %v6723_v17, %v355_v41  ;;  %549 = vperm.xlu1 %6472, %v108_v38   ;;  %546 = vperm.xlu0 %6471, %v107_v39   ;;  %vm686_vm13 = vcmp.eq.s32.totalorder %v6723_v17, %v358_v40  ;;  %v128_v40 = vld [vmem:[%s9069_s0 + $0x378] sm:$0xff]  ;;  %v127_v41 = vld [vmem:[%s9069_s0 + $0x370] sm:$0xff] }
  0xb7   :  { %v5231_v43 = vsel %vm685_vm12, 1.0, %v9075_v22  ;;  %v5232_v48 = vsel %vm686_vm13, 1.0, %v9075_v22 }
  0xb8   :  { %6046 = vmatmul.mubr.msk.f32.gmra.mrb[24].mxu0 %vm1819_vm0, %v5230_v42 }
  0xb9   :  { %v364_v46 = vpop.permute.xlu1 %363  ;;  %6048 = vmatprep.mubr.msk.f32.mxu0 %vm1819_vm0, %v5231_v43  ;;  %v361_v47 = vpop.permute.xlu0 %360 }
  0xba   :  { %vm687_vm14 = vcmp.eq.s32.totalorder %v6723_v17, %v361_v47  ;;  %555 = vperm.xlu1 %6472, %v110_v44   ;;  %552 = vperm.xlu0 %6471, %v109_v45   ;;  %vm688_vm15 = vcmp.eq.s32.totalorder %v6723_v17, %v364_v46  ;;  %v130_v46 = vld [vmem:[%s9069_s0 + $0x388] sm:$0xff]  ;;  %v129_v47 = vld [vmem:[%s9069_s0 + $0x380] sm:$0xff] }
  0xbb   :  { %v5233_v49 = vsel %vm687_vm14, 1.0, %v9075_v22  ;;  %v5234_v54 = vsel %vm688_vm15, 1.0, %v9075_v22 }
  0xbc   :  { %6049 = vmatmul.mubr.msk.f32.gmra.mrb[26].mxu0 %vm1819_vm0, %v5232_v48 }
  0xbd   :  { %v370_v52 = vpop.permute.xlu1 %369  ;;  %6051 = vmatprep.mubr.msk.f32.mxu0 %vm1819_vm0, %v5233_v49  ;;  %v367_v53 = vpop.permute.xlu0 %366 }
  0xbe   :  { %vm689_vm1 = vcmp.eq.s32.totalorder %v6723_v17, %v367_v53  ;;  %561 = vperm.xlu1 %6472, %v112_v50   ;;  %558 = vperm.xlu0 %6471, %v111_v51   ;;  %vm690_vm2 = vcmp.eq.s32.totalorder %v6723_v17, %v370_v52  ;;  %v132_v52 = vld [vmem:[%s9069_s0 + $0x398] sm:$0xff]  ;;  %v131_v53 = vld [vmem:[%s9069_s0 + $0x390] sm:$0xff] }
  0xbf   :  { %v5235_v55 = vsel %vm689_vm1, 1.0, %v9075_v22  ;;  %v5236_v60 = vsel %vm690_vm2, 1.0, %v9075_v22 }
  0xc0   :  { %6052 = vmatmul.mubr.msk.f32.gmra.mrb[28].mxu0 %vm1819_vm0, %v5234_v54 }
  0xc1   :  { %v376_v58 = vpop.permute.xlu1 %375  ;;  %6054 = vmatprep.mubr.msk.f32.mxu0 %vm1819_vm0, %v5235_v55  ;;  %v373_v59 = vpop.permute.xlu0 %372 }
  0xc2   :  { %vm691_vm3 = vcmp.eq.s32.totalorder %v6723_v17, %v373_v59  ;;  %567 = vperm.xlu1 %6472, %v114_v56   ;;  %564 = vperm.xlu0 %6471, %v113_v57   ;;  %vm692_vm4 = vcmp.eq.s32.totalorder %v6723_v17, %v376_v58  ;;  %v134_v58 = vld [vmem:[%s9069_s0 + $0x3a8] sm:$0xff]  ;;  %v133_v59 = vld [vmem:[%s9069_s0 + $0x3a0] sm:$0xff] }
  0xc3   :  { %v5237_v61 = vsel %vm691_vm3, 1.0, %v9075_v22  ;;  %v5238_v2 = vsel %vm692_vm4, 1.0, %v9075_v22 }
  0xc4   :  { %6055 = vmatmul.mubr.msk.f32.gmra.mrb[30].mxu0 %vm1819_vm0, %v5236_v60 }
  0xc5   :  { %v382_v0 = vpop.permute.xlu1 %381  ;;  %6057 = vmatprep.mubr.msk.f32.mxu0 %vm1819_vm0, %v5237_v61  ;;  %v379_v1 = vpop.permute.xlu0 %378 }
  0xc6   :  { %vm693_vm5 = vcmp.eq.s32.totalorder %v6723_v17, %v379_v1  ;;  %573 = vperm.xlu1 %6472, %v116_v62   ;;  %570 = vperm.xlu0 %6471, %v115_v63   ;;  %vm694_vm6 = vcmp.eq.s32.totalorder %v6723_v17, %v382_v0  ;;  %v136_v0 = vld [vmem:[%s9069_s0 + $0x3b8] sm:$0xff]  ;;  %v135_v1 = vld [vmem:[%s9069_s0 + $0x3b0] sm:$0xff] }
  0xc7   :  { %v5239_v3 = vsel %vm693_vm5, 1.0, %v9075_v22  ;;  %v5240_v9 = vsel %vm694_vm6, 1.0, %v9075_v22 }
  0xc8   :  { %6058 = vmatmul.mubr.msk.f32.gmra.mrb[32].mxu0 %vm1819_vm0, %v5238_v2 }
  0xc9   :  { %v388_v6 = vpop.permute.xlu1 %387  ;;  %6060 = vmatprep.mubr.msk.f32.mxu0 %vm1819_vm0, %v5239_v3  ;;  %v385_v7 = vpop.permute.xlu0 %384 }
  0xca   :  { %vm695_vm7 = vcmp.eq.s32.totalorder %v6723_v17, %v385_v7  ;;  %579 = vperm.xlu1 %6472, %v118_v4   ;;  %576 = vperm.xlu0 %6471, %v117_v5   ;;  %vm696_vm8 = vcmp.eq.s32.totalorder %v6723_v17, %v388_v6  ;;  %v138_v6 = vld [vmem:[%s9069_s0 + $0x3c8] sm:$0xff]  ;;  %v137_v7 = vld [vmem:[%s9069_s0 + $0x3c0] sm:$0xff] }
  0xcb   :  { %v5241_v10 = vsel %vm695_vm7, 1.0, %v9075_v22  ;;  %v5242_v19 = vsel %vm696_vm8, 1.0, %v9075_v22 }
  0xcc   :  { %6061 = vmatmul.mubr.msk.f32.gmra.mrb[34].mxu0 %vm1819_vm0, %v5240_v9 }
  0xcd   :  { %v394_v16 = vpop.permute.xlu1 %393  ;;  %6063 = vmatprep.mubr.msk.f32.mxu0 %vm1819_vm0, %v5241_v10  ;;  %v391_v18 = vpop.permute.xlu0 %390 }
  0xce   :  { %vm697_vm9 = vcmp.eq.s32.totalorder %v6723_v17, %v391_v18  ;;  %585 = vperm.xlu1 %6472, %v120_v8   ;;  %582 = vperm.xlu0 %6471, %v119_v11   ;;  %vm698_vm10 = vcmp.eq.s32.totalorder %v6723_v17, %v394_v16  ;;  %v2916_v16 = vld [vmem:[%s9071_s3 + $0x38] sm:$0xff] }
  0xcf   :  { %v5243_v20 = vsel %vm697_vm9, 1.0, %v9075_v22  ;;  %v5244_v26 = vsel %vm698_vm10, 1.0, %v9075_v22 }
  0xd0   :  { %6064 = vmatmul.mubr.msk.f32.gmra.mrb[36].mxu0 %vm1819_vm0, %v5242_v19 }
  0xd1   :  { %v400_v24 = vpop.permute.xlu1 %399  ;;  %6066 = vmatprep.mubr.msk.f32.mxu0 %vm1819_vm0, %v5243_v20  ;;  %v397_v25 = vpop.permute.xlu0 %396  ;;  %v6445_v20 = vpack.c.bf16 %v2916_v16, %v2915_v15  ;;  %v158_v15 = vld [vmem:[%s9072_s1 + $0x68] sm:$0xff]  ;;  %v157_v16 = vld [vmem:[%s9072_s1 + $0x60] sm:$0xff] }
  0xd2   :  { %vm699_vm11 = vcmp.eq.s32.totalorder %v6723_v17, %v397_v25  ;;  %591 = vperm.xlu1 %6472, %v122_v21   ;;  %588 = vperm.xlu0 %6471, %v121_v23   ;;  %vm700_vm12 = vcmp.eq.s32.totalorder %v6723_v17, %v400_v24  ;;  %v142_v24 = vld [vmem:[%s9069_s0 + $0x3e8] sm:$0xff]  ;;  %v141_v25 = vld [vmem:[%s9069_s0 + $0x3e0] sm:$0xff] }
  0xd3   :  { %v5245_v27 = vsel %vm699_vm11, 1.0, %v9075_v22  ;;  %v5246_v32 = vsel %vm700_vm12, 1.0, %v9075_v22  ;;  %6446 = vmatprep.subr.bf16.mxu0 %v6445_v20  ;;  %6460 = vmatprep.subr.bf16.mxu1 %v6445_v20 }
  0xd4   :  { %6067 = vmatmul.mubr.msk.f32.gmra.mrb[38].mxu0 %vm1819_vm0, %v5244_v26  ;;  %6466 = vmatpush3.bf16.msra.mxu1 %v6445_v20 }
  0xd5   :  { %v406_v30 = vpop.permute.xlu1 %405  ;;  %6069 = vmatprep.mubr.msk.f32.mxu0 %vm1819_vm0, %v5245_v27  ;;  %v403_v31 = vpop.permute.xlu0 %402  ;;  %6448 = vmatpush3.bf16.msra.mxu0 %v6445_v20 }
  0xd6   :  { %vm701_vm13 = vcmp.eq.s32.totalorder %v6723_v17, %v403_v31  ;;  %597 = vperm.xlu1 %6472, %v124_v28   ;;  %594 = vperm.xlu0 %6471, %v123_v29   ;;  %vm702_vm14 = vcmp.eq.s32.totalorder %v6723_v17, %v406_v30  ;;  %v144_v30 = vld [vmem:[%s9069_s0 + $0x3f8] sm:$0xff]  ;;  %v143_v31 = vld [vmem:[%s9069_s0 + $0x3f0] sm:$0xff] }
  0xd7   :  { %v5247_v33 = vsel %vm701_vm13, 1.0, %v9075_v22  ;;  %v5248_v38 = vsel %vm702_vm14, 1.0, %v9075_v22 }
  0xd8   :  { %6070 = vmatmul.mubr.msk.f32.gmra.mrb[40].mxu0 %vm1819_vm0, %v5246_v32 }
  0xd9   :  { %v412_v36 = vpop.permute.xlu1 %411  ;;  %6072 = vmatprep.mubr.msk.f32.mxu0 %vm1819_vm0, %v5247_v33  ;;  %v409_v37 = vpop.permute.xlu0 %408 }
  0xda   :  { %vm703_vm15 = vcmp.eq.s32.totalorder %v6723_v17, %v409_v37  ;;  %603 = vperm.xlu1 %6472, %v126_v34   ;;  %600 = vperm.xlu0 %6471, %v125_v35   ;;  %vm704_vm1 = vcmp.eq.s32.totalorder %v6723_v17, %v412_v36  ;;  %v2917_v34 = vld [vmem:[%s9071_s3 + $0x40] sm:$0xff]  ;;  %v2918_v35 = vld [vmem:[%s9071_s3 + $0x48] sm:$0xff] }
  0xdb   :  { %v5249_v39 = vsel %vm703_vm15, 1.0, %v9075_v22  ;;  %v5250_v44 = vsel %vm704_vm1, 1.0, %v9075_v22 }
  0xdc   :  { %6073 = vmatmul.mubr.msk.f32.gmra.mrb[42].mxu0 %vm1819_vm0, %v5248_v38  ;;  %v146_v38 = vld [vmem:[%s9072_s1 + $0x8] sm:$0xff] }
  0xdd   :  { %v418_v42 = vpop.permute.xlu1 %417  ;;  %6075 = vmatprep.mubr.msk.f32.mxu0 %vm1819_vm0, %v5249_v39  ;;  %v415_v43 = vpop.permute.xlu0 %414  ;;  %v145_v39 = vld [vmem:[%s9072_s1] sm:$0xff] }
  0xde   :  { %vm705_vm2 = vcmp.eq.s32.totalorder %v6723_v17, %v415_v43  ;;  %609 = vperm.xlu1 %6472, %v128_v40   ;;  %606 = vperm.xlu0 %6471, %v127_v41   ;;  %vm706_vm3 = vcmp.eq.s32.totalorder %v6723_v17, %v418_v42  ;;  %v6449_v40 = vpack.c.bf16 %v2918_v35, %v2917_v34  ;;  %v2919_v43 = vld [vmem:[%s9071_s3 + $0x50] sm:$0xff]  ;;  %v164_v35 = vld [vmem:[%s9072_s1 + $0x98] sm:$0xff] }
  0xdf   :  { %v5251_v45 = vsel %vm705_vm2, 1.0, %v9075_v22  ;;  %v5252_v50 = vsel %vm706_vm3, 1.0, %v9075_v22 }
  0xe0   :  { %6076 = vmatmul.mubr.msk.f32.gmra.mrb[44].mxu0 %vm1819_vm0, %v5250_v44  ;;  %6450 = vmatprep.subr.bf16.mxu0 %v6449_v40  ;;  %v2920_v44 = vld [vmem:[%s9071_s3 + $0x58] sm:$0xff] }
  0xe1   :  { %v424_v48 = vpop.permute.xlu1 %423  ;;  %6078 = vmatprep.mubr.msk.f32.mxu0 %vm1819_vm0, %v5251_v45  ;;  %v421_v49 = vpop.permute.xlu0 %420  ;;  %6461 = vmatprep.subr.bf16.mxu1 %v6449_v40 }
  0xe2   :  { %vm707_vm4 = vcmp.eq.s32.totalorder %v6723_v17, %v421_v49  ;;  %615 = vperm.xlu1 %6472, %v130_v46   ;;  %612 = vperm.xlu0 %6471, %v129_v47   ;;  %vm708_vm5 = vcmp.eq.s32.totalorder %v6723_v17, %v424_v48  ;;  %v148_v47 = vld [vmem:[%s9072_s1 + $0x18] sm:$0xff]  ;;  %v147_v48 = vld [vmem:[%s9072_s1 + $0x10] sm:$0xff]  ;;  %v6453_v49 = vpack.c.bf16 %v2920_v44, %v2919_v43 }
  0xe3   :  { %v5253_v51 = vsel %vm707_vm4, 1.0, %v9075_v22  ;;  %v5254_v56 = vsel %vm708_vm5, 1.0, %v9075_v22  ;;  %6452 = vmatpush3.bf16.msra.mxu0 %v6449_v40  ;;  %6467 = vmatpush3.bf16.msra.mxu1 %v6449_v40 }
  0xe4   :  { %6079 = vmatmul.mubr.msk.f32.gmra.mrb[46].mxu0 %vm1819_vm0, %v5252_v50  ;;  %6454 = vmatprep.subr.bf16.mxu0 %v6453_v49 }
  0xe5   :  { %v430_v54 = vpop.permute.xlu1 %429  ;;  %6081 = vmatprep.mubr.msk.f32.mxu0 %vm1819_vm0, %v5253_v51  ;;  %v427_v55 = vpop.permute.xlu0 %426  ;;  %6462 = vmatprep.subr.bf16.mxu1 %v6453_v49 }
  0xe6   :  { %vm709_vm6 = vcmp.eq.s32.totalorder %v6723_v17, %v427_v55  ;;  %621 = vperm.xlu1 %6472, %v132_v52   ;;  %618 = vperm.xlu0 %6471, %v131_v53   ;;  %vm710_vm7 = vcmp.eq.s32.totalorder %v6723_v17, %v430_v54  ;;  %v150_v54 = vld [vmem:[%s9072_s1 + $0x28] sm:$0xff]  ;;  %v149_v55 = vld [vmem:[%s9072_s1 + $0x20] sm:$0xff] }
  0xe7   :  { %v5255_v57 = vsel %vm709_vm6, 1.0, %v9075_v22  ;;  %v5256_v62 = vsel %vm710_vm7, 1.0, %v9075_v22  ;;  %6456 = vmatpush3.bf16.msra.mxu0 %v6453_v49  ;;  %6468 = vmatpush3.bf16.msra.mxu1 %v6453_v49 }
  0xe8   :  { %6082 = vmatmul.mubr.msk.f32.gmra.mrb[48].mxu0 %vm1819_vm0, %v5254_v56 }
  0xe9   :  { %v436_v60 = vpop.permute.xlu1 %435  ;;  %6084 = vmatprep.mubr.msk.f32.mxu0 %vm1819_vm0, %v5255_v57  ;;  %v433_v61 = vpop.permute.xlu0 %432 }
  0xea   :  { %vm711_vm8 = vcmp.eq.s32.totalorder %v6723_v17, %v433_v61  ;;  %627 = vperm.xlu1 %6472, %v134_v58   ;;  %624 = vperm.xlu0 %6471, %v133_v59   ;;  %vm712_vm9 = vcmp.eq.s32.totalorder %v6723_v17, %v436_v60  ;;  %v152_v60 = vld [vmem:[%s9072_s1 + $0x38] sm:$0xff]  ;;  %v151_v61 = vld [vmem:[%s9072_s1 + $0x30] sm:$0xff] }
  0xeb   :  { %v5257_v63 = vsel %vm711_vm8, 1.0, %v9075_v22  ;;  %v5258_v4 = vsel %vm712_vm9, 1.0, %v9075_v22 }
  0xec   :  { %6085 = vmatmul.mubr.msk.f32.gmra.mrb[50].mxu0 %vm1819_vm0, %v5256_v62 }
  0xed   :  { %v442_v2 = vpop.permute.xlu1 %441  ;;  %6087 = vmatprep.mubr.msk.f32.mxu0 %vm1819_vm0, %v5257_v63  ;;  %v439_v3 = vpop.permute.xlu0 %438 }
  0xee   :  { %vm713_vm10 = vcmp.eq.s32.totalorder %v6723_v17, %v439_v3  ;;  %633 = vperm.xlu1 %6472, %v136_v0   ;;  %630 = vperm.xlu0 %6471, %v135_v1   ;;  %vm714_vm11 = vcmp.eq.s32.totalorder %v6723_v17, %v442_v2  ;;  %v154_v2 = vld [vmem:[%s9072_s1 + $0x48] sm:$0xff]  ;;  %v153_v3 = vld [vmem:[%s9072_s1 + $0x40] sm:$0xff] }
  0xef   :  { %v5259_v5 = vsel %vm713_vm10, 1.0, %v9075_v22  ;;  %v5260_v10 = vsel %vm714_vm11, 1.0, %v9075_v22 }
  0xf0   :  { %6088 = vmatmul.mubr.msk.f32.gmra.mrb[52].mxu0 %vm1819_vm0, %v5258_v4 }
  0xf1   :  { %v448_v8 = vpop.permute.xlu1 %447  ;;  %6090 = vmatprep.mubr.msk.f32.mxu0 %vm1819_vm0, %v5259_v5  ;;  %v445_v9 = vpop.permute.xlu0 %444 }
  0xf2   :  { %vm715_vm12 = vcmp.eq.s32.totalorder %v6723_v17, %v445_v9  ;;  %639 = vperm.xlu1 %6472, %v138_v6   ;;  %636 = vperm.xlu0 %6471, %v137_v7   ;;  %vm716_vm13 = vcmp.eq.s32.totalorder %v6723_v17, %v448_v8  ;;  %v156_v8 = vld [vmem:[%s9072_s1 + $0x58] sm:$0xff]  ;;  %v155_v9 = vld [vmem:[%s9072_s1 + $0x50] sm:$0xff] }
  0xf3   :  { %v5261_v11 = vsel %vm715_vm12, 1.0, %v9075_v22  ;;  %v5262_v21 = vsel %vm716_vm13, 1.0, %v9075_v22 }
  0xf4   :  { %6091 = vmatmul.mubr.msk.f32.gmra.mrb[54].mxu0 %vm1819_vm0, %v5260_v10 }
  0xf5   :  { %v454_v18 = vpop.permute.xlu1 %453  ;;  %6093 = vmatprep.mubr.msk.f32.mxu0 %vm1819_vm0, %v5261_v11  ;;  %v451_v19 = vpop.permute.xlu0 %450 }
  0xf6   :  { %vm717_vm14 = vcmp.eq.s32.totalorder %v6723_v17, %v451_v19  ;;  %645 = vperm.xlu1 %6472, %v140_v12   ;;  %642 = vperm.xlu0 %6471, %v139_v13   ;;  %vm718_vm15 = vcmp.eq.s32.totalorder %v6723_v17, %v454_v18 }
  0xf7   :  { %v5263_v23 = vsel %vm717_vm14, 1.0, %v9075_v22  ;;  %v5264_v28 = vsel %vm718_vm15, 1.0, %v9075_v22 }
  0xf8   :  { %6094 = vmatmul.mubr.msk.f32.gmra.mrb[56].mxu0 %vm1819_vm0, %v5262_v21 }
  0xf9   :  { %v460_v26 = vpop.permute.xlu1 %459  ;;  %6096 = vmatprep.mubr.msk.f32.mxu0 %vm1819_vm0, %v5263_v23  ;;  %v457_v27 = vpop.permute.xlu0 %456  ;;  %v160_v23 = vld [vmem:[%s9072_s1 + $0x78] sm:$0xff] }
  0xfa   :  { %vm719_vm1 = vcmp.eq.s32.totalorder %v6723_v17, %v457_v27  ;;  %651 = vperm.xlu1 %6472, %v142_v24   ;;  %648 = vperm.xlu0 %6471, %v141_v25   ;;  %vm720_vm2 = vcmp.eq.s32.totalorder %v6723_v17, %v460_v26  ;;  %v159_v24 = vld [vmem:[%s9072_s1 + $0x70] sm:$0xff] }
  0xfb   :  { %v5265_v29 = vsel %vm719_vm1, 1.0, %v9075_v22  ;;  %v5266_v36 = vsel %vm720_vm2, 1.0, %v9075_v22 }
  0xfc   :  { %6097 = vmatmul.mubr.msk.f32.gmra.mrb[58].mxu0 %vm1819_vm0, %v5264_v28 }
  0xfd   :  { %v466_v32 = vpop.permute.xlu1 %465  ;;  %6099 = vmatprep.mubr.msk.f32.mxu0 %vm1819_vm0, %v5265_v29  ;;  %v463_v33 = vpop.permute.xlu0 %462  ;;  %v162_v29 = vld [vmem:[%s9072_s1 + $0x88] sm:$0xff] }
  0xfe   :  { %vm721_vm3 = vcmp.eq.s32.totalorder %v6723_v17, %v463_v33  ;;  %657 = vperm.xlu1 %6472, %v144_v30   ;;  %654 = vperm.xlu0 %6471, %v143_v31   ;;  %vm722_vm4 = vcmp.eq.s32.totalorder %v6723_v17, %v466_v32  ;;  %v161_v30 = vld [vmem:[%s9072_s1 + $0x80] sm:$0xff] }
  0xff   :  { %v5267_v37 = vsel %vm721_vm3, 1.0, %v9075_v22  ;;  %v5268_v45 = vsel %vm722_vm4, 1.0, %v9075_v22 }
 0x100   :  { %6100 = vmatmul.mubr.msk.f32.gmra.mrb[60].mxu0 %vm1819_vm0, %v5266_v36  ;;  %v163_v36 = vld [vmem:[%s9072_s1 + $0x90] sm:$0xff] }
 0x101   :  { %v472_v41 = vpop.permute.xlu1 %471  ;;  %6102 = vmatprep.mubr.msk.f32.mxu0 %vm1819_vm0, %v5267_v37  ;;  %v469_v42 = vpop.permute.xlu0 %468 }
 0x102   :  { %vm723_vm5 = vcmp.eq.s32.totalorder %v6723_v17, %v469_v42  ;;  %1047 = vperm.xlu1 %6472, %v146_v38   ;;  %1044 = vperm.xlu0 %6471, %v145_v39   ;;  %vm724_vm6 = vcmp.eq.s32.totalorder %v6723_v17, %v472_v41  ;;  %v166_v41 = vld [vmem:[%s9072_s1 + $0xa8] sm:$0xff]  ;;  %v165_v42 = vld [vmem:[%s9072_s1 + $0xa0] sm:$0xff] }
 0x103   :  { %v5269_v46 = vsel %vm723_vm5, 1.0, %v9075_v22  ;;  %v5270_v52 = vsel %vm724_vm6, 1.0, %v9075_v22 }
 0x104   :  { %6103 = vmatmul.mubr.msk.f32.gmra.mrb[62].mxu0 %vm1819_vm0, %v5268_v45 }
 0x105   :  { %v478_v50 = vpop.permute.xlu1 %477  ;;  %6105 = vmatprep.mubr.msk.f32.mxu0 %vm1819_vm0, %v5269_v46  ;;  %v475_v51 = vpop.permute.xlu0 %474 }
 0x106   :  { %vm725_vm7 = vcmp.eq.s32.totalorder %v6723_v17, %v475_v51  ;;  %1053 = vperm.xlu1 %6472, %v148_v47   ;;  %1050 = vperm.xlu0 %6471, %v147_v48   ;;  %vm726_vm8 = vcmp.eq.s32.totalorder %v6723_v17, %v478_v50  ;;  %v168_v47 = vld [vmem:[%s9072_s1 + $0xb8] sm:$0xff]  ;;  %v167_v48 = vld [vmem:[%s9072_s1 + $0xb0] sm:$0xff] }
 0x107   :  { %v5271_v53 = vsel %vm725_vm7, 1.0, %v9075_v22  ;;  %v5272_v58 = vsel %vm726_vm8, 1.0, %v9075_v22 }
 0x108   :  { %6106 = vmatmul.mubr.msk.f32.gmra.mrb[64].mxu0 %vm1819_vm0, %v5270_v52 }
 0x109   :  { %v484_v56 = vpop.permute.xlu1 %483  ;;  %6108 = vmatprep.mubr.msk.f32.mxu0 %vm1819_vm0, %v5271_v53  ;;  %v481_v57 = vpop.permute.xlu0 %480  ;;  %v170_v53 = vld [vmem:[%s9072_s1 + $0xc8] sm:$0xff] }
 0x10a   :  { %vm727_vm9 = vcmp.eq.s32.totalorder %v6723_v17, %v481_v57  ;;  %1059 = vperm.xlu1 %6472, %v150_v54   ;;  %1056 = vperm.xlu0 %6471, %v149_v55   ;;  %vm728_vm10 = vcmp.eq.s32.totalorder %v6723_v17, %v484_v56  ;;  %v169_v54 = vld [vmem:[%s9072_s1 + $0xc0] sm:$0xff] }
 0x10b   :  { %v5273_v59 = vsel %vm727_vm9, 1.0, %v9075_v22  ;;  %v5274_v0 = vsel %vm728_vm10, 1.0, %v9075_v22 }
 0x10c   :  { %6109 = vmatmul.mubr.msk.f32.gmra.mrb[66].mxu0 %vm1819_vm0, %v5272_v58 }
 0x10d   :  { %v490_v62 = vpop.permute.xlu1 %489  ;;  %6111 = vmatprep.mubr.msk.f32.mxu0 %vm1819_vm0, %v5273_v59  ;;  %v487_v63 = vpop.permute.xlu0 %486  ;;  %v172_v59 = vld [vmem:[%s9072_s1 + $0xd8] sm:$0xff] }
 0x10e   :  { %vm729_vm11 = vcmp.eq.s32.totalorder %v6723_v17, %v487_v63  ;;  %1065 = vperm.xlu1 %6472, %v152_v60   ;;  %1062 = vperm.xlu0 %6471, %v151_v61   ;;  %vm730_vm12 = vcmp.eq.s32.totalorder %v6723_v17, %v490_v62  ;;  %v171_v60 = vld [vmem:[%s9072_s1 + $0xd0] sm:$0xff] }
 0x10f   :  { %v5275_v1 = vsel %vm729_vm11, 1.0, %v9075_v22  ;;  %v5276_v6 = vsel %vm730_vm12, 1.0, %v9075_v22 }
 0x110   :  { %6112 = vmatmul.mubr.msk.f32.gmra.mrb[68].mxu0 %vm1819_vm0, %v5274_v0 }
 0x111   :  { %v496_v4 = vpop.permute.xlu1 %495  ;;  %6114 = vmatprep.mubr.msk.f32.mxu0 %vm1819_vm0, %v5275_v1  ;;  %v493_v5 = vpop.permute.xlu0 %492  ;;  %v174_v1 = vld [vmem:[%s9072_s1 + $0xe8] sm:$0xff] }
 0x112   :  { %vm731_vm13 = vcmp.eq.s32.totalorder %v6723_v17, %v493_v5  ;;  %1071 = vperm.xlu1 %6472, %v154_v2   ;;  %1068 = vperm.xlu0 %6471, %v153_v3   ;;  %vm732_vm14 = vcmp.eq.s32.totalorder %v6723_v17, %v496_v4  ;;  %v173_v2 = vld [vmem:[%s9072_s1 + $0xe0] sm:$0xff] }
 0x113   :  { %v5277_v7 = vsel %vm731_vm13, 1.0, %v9075_v22  ;;  %v5278_v12 = vsel %vm732_vm14, 1.0, %v9075_v22 }
 0x114   :  { %6115 = vmatmul.mubr.msk.f32.gmra.mrb[70].mxu0 %vm1819_vm0, %v5276_v6 }
 0x115   :  { %v502_v10 = vpop.permute.xlu1 %501  ;;  %6117 = vmatprep.mubr.msk.f32.mxu0 %vm1819_vm0, %v5277_v7  ;;  %v499_v11 = vpop.permute.xlu0 %498  ;;  %v176_v7 = vld [vmem:[%s9072_s1 + $0xf8] sm:$0xff] }
 0x116   :  { %vm733_vm15 = vcmp.eq.s32.totalorder %v6723_v17, %v499_v11  ;;  %1077 = vperm.xlu1 %6472, %v156_v8   ;;  %1074 = vperm.xlu0 %6471, %v155_v9   ;;  %vm734_vm1 = vcmp.eq.s32.totalorder %v6723_v17, %v502_v10  ;;  %v175_v8 = vld [vmem:[%s9072_s1 + $0xf0] sm:$0xff] }
 0x117   :  { %v5279_v13 = vsel %vm733_vm15, 1.0, %v9075_v22  ;;  %v5280_v20 = vsel %vm734_vm1, 1.0, %v9075_v22 }
 0x118   :  { %6118 = vmatmul.mubr.msk.f32.gmra.mrb[72].mxu0 %vm1819_vm0, %v5278_v12 }
 0x119   :  { %v508_v18 = vpop.permute.xlu1 %507  ;;  %6120 = vmatprep.mubr.msk.f32.mxu0 %vm1819_vm0, %v5279_v13  ;;  %v505_v19 = vpop.permute.xlu0 %504  ;;  %v178_v13 = vld [vmem:[%s9072_s1 + $0x108] sm:$0xff] }
 0x11a   :  { %vm735_vm2 = vcmp.eq.s32.totalorder %v6723_v17, %v505_v19  ;;  %1083 = vperm.xlu1 %6472, %v158_v15   ;;  %1080 = vperm.xlu0 %6471, %v157_v16   ;;  %vm736_vm3 = vcmp.eq.s32.totalorder %v6723_v17, %v508_v18  ;;  %v177_v15 = vld [vmem:[%s9072_s1 + $0x100] sm:$0xff] }
 0x11b   :  { %v5281_v21 = vsel %vm735_vm2, 1.0, %v9075_v22  ;;  %v5282_v27 = vsel %vm736_vm3, 1.0, %v9075_v22 }
 0x11c   :  { %6121 = vmatmul.mubr.msk.f32.gmra.mrb[74].mxu0 %vm1819_vm0, %v5280_v20 }
 0x11d   :  { %v514_v25 = vpop.permute.xlu1 %513  ;;  %6123 = vmatprep.mubr.msk.f32.mxu0 %vm1819_vm0, %v5281_v21  ;;  %v511_v26 = vpop.permute.xlu0 %510  ;;  %v180_v21 = vld [vmem:[%s9072_s1 + $0x118] sm:$0xff] }
 0x11e   :  { %vm737_vm4 = vcmp.eq.s32.totalorder %v6723_v17, %v511_v26  ;;  %1089 = vperm.xlu1 %6472, %v160_v23   ;;  %1086 = vperm.xlu0 %6471, %v159_v24   ;;  %vm738_vm5 = vcmp.eq.s32.totalorder %v6723_v17, %v514_v25  ;;  %v179_v23 = vld [vmem:[%s9072_s1 + $0x110] sm:$0xff] }
 0x11f   :  { %v5283_v28 = vsel %vm737_vm4, 1.0, %v9075_v22  ;;  %v5284_v33 = vsel %vm738_vm5, 1.0, %v9075_v22 }
 0x120   :  { %6124 = vmatmul.mubr.msk.f32.gmra.mrb[76].mxu0 %vm1819_vm0, %v5282_v27 }
 0x121   :  { %v520_v31 = vpop.permute.xlu1 %519  ;;  %6126 = vmatprep.mubr.msk.f32.mxu0 %vm1819_vm0, %v5283_v28  ;;  %v517_v32 = vpop.permute.xlu0 %516  ;;  %v182_v28 = vld [vmem:[%s9072_s1 + $0x128] sm:$0xff] }
 0x122   :  { %vm739_vm6 = vcmp.eq.s32.totalorder %v6723_v17, %v517_v32  ;;  %1095 = vperm.xlu1 %6472, %v162_v29   ;;  %1092 = vperm.xlu0 %6471, %v161_v30   ;;  %vm740_vm7 = vcmp.eq.s32.totalorder %v6723_v17, %v520_v31  ;;  %v181_v29 = vld [vmem:[%s9072_s1 + $0x120] sm:$0xff] }
 0x123   :  { %v5285_v34 = vsel %vm739_vm6, 1.0, %v9075_v22  ;;  %v5286_v39 = vsel %vm740_vm7, 1.0, %v9075_v22 }
 0x124   :  { %6127 = vmatmul.mubr.msk.f32.gmra.mrb[78].mxu0 %vm1819_vm0, %v5284_v33 }
 0x125   :  { %v526_v37 = vpop.permute.xlu1 %525  ;;  %6129 = vmatprep.mubr.msk.f32.mxu0 %vm1819_vm0, %v5285_v34  ;;  %v523_v38 = vpop.permute.xlu0 %522  ;;  %v184_v34 = vld [vmem:[%s9072_s1 + $0x138] sm:$0xff] }
 0x126   :  { %vm741_vm8 = vcmp.eq.s32.totalorder %v6723_v17, %v523_v38  ;;  %1101 = vperm.xlu1 %6472, %v164_v35   ;;  %1098 = vperm.xlu0 %6471, %v163_v36   ;;  %vm742_vm9 = vcmp.eq.s32.totalorder %v6723_v17, %v526_v37  ;;  %v183_v35 = vld [vmem:[%s9072_s1 + $0x130] sm:$0xff] }
 0x127   :  { %v5287_v40 = vsel %vm741_vm8, 1.0, %v9075_v22  ;;  %v5288_v45 = vsel %vm742_vm9, 1.0, %v9075_v22 }
 0x128   :  { %6130 = vmatmul.mubr.msk.f32.gmra.mrb[80].mxu0 %vm1819_vm0, %v5286_v39 }
 0x129   :  { %v532_v43 = vpop.permute.xlu1 %531  ;;  %6132 = vmatprep.mubr.msk.f32.mxu0 %vm1819_vm0, %v5287_v40  ;;  %v529_v44 = vpop.permute.xlu0 %528  ;;  %v186_v40 = vld [vmem:[%s9072_s1 + $0x148] sm:$0xff] }
 0x12a   :  { %vm743_vm10 = vcmp.eq.s32.totalorder %v6723_v17, %v529_v44  ;;  %1107 = vperm.xlu1 %6472, %v166_v41   ;;  %1104 = vperm.xlu0 %6471, %v165_v42   ;;  %vm744_vm11 = vcmp.eq.s32.totalorder %v6723_v17, %v532_v43  ;;  %v185_v41 = vld [vmem:[%s9072_s1 + $0x140] sm:$0xff] }
 0x12b   :  { %v5289_v46 = vsel %vm743_vm10, 1.0, %v9075_v22  ;;  %v5290_v51 = vsel %vm744_vm11, 1.0, %v9075_v22 }
 0x12c   :  { %6133 = vmatmul.mubr.msk.f32.gmra.mrb[82].mxu0 %vm1819_vm0, %v5288_v45 }
 0x12d   :  { %v538_v49 = vpop.permute.xlu1 %537  ;;  %6135 = vmatprep.mubr.msk.f32.mxu0 %vm1819_vm0, %v5289_v46  ;;  %v535_v50 = vpop.permute.xlu0 %534  ;;  %v188_v46 = vld [vmem:[%s9072_s1 + $0x158] sm:$0xff] }
 0x12e   :  { %vm745_vm12 = vcmp.eq.s32.totalorder %v6723_v17, %v535_v50  ;;  %1113 = vperm.xlu1 %6472, %v168_v47   ;;  %1110 = vperm.xlu0 %6471, %v167_v48   ;;  %vm746_vm13 = vcmp.eq.s32.totalorder %v6723_v17, %v538_v49  ;;  %v187_v47 = vld [vmem:[%s9072_s1 + $0x150] sm:$0xff] }
 0x12f   :  { %v5291_v52 = vsel %vm745_vm12, 1.0, %v9075_v22  ;;  %v5292_v57 = vsel %vm746_vm13, 1.0, %v9075_v22 }
 0x130   :  { %6136 = vmatmul.mubr.msk.f32.gmra.mrb[84].mxu0 %vm1819_vm0, %v5290_v51 }
 0x131   :  { %v544_v55 = vpop.permute.xlu1 %543  ;;  %6138 = vmatprep.mubr.msk.f32.mxu0 %vm1819_vm0, %v5291_v52  ;;  %v541_v56 = vpop.permute.xlu0 %540  ;;  %v190_v52 = vld [vmem:[%s9072_s1 + $0x168] sm:$0xff] }
 0x132   :  { %vm747_vm14 = vcmp.eq.s32.totalorder %v6723_v17, %v541_v56  ;;  %1119 = vperm.xlu1 %6472, %v170_v53   ;;  %1116 = vperm.xlu0 %6471, %v169_v54   ;;  %vm748_vm15 = vcmp.eq.s32.totalorder %v6723_v17, %v544_v55  ;;  %v189_v53 = vld [vmem:[%s9072_s1 + $0x160] sm:$0xff] }
 0x133   :  { %v5293_v58 = vsel %vm747_vm14, 1.0, %v9075_v22  ;;  %v5294_v63 = vsel %vm748_vm15, 1.0, %v9075_v22 }
 0x134   :  { %6139 = vmatmul.mubr.msk.f32.gmra.mrb[86].mxu0 %vm1819_vm0, %v5292_v57 }
 0x135   :  { %v550_v61 = vpop.permute.xlu1 %549  ;;  %6141 = vmatprep.mubr.msk.f32.mxu0 %vm1819_vm0, %v5293_v58  ;;  %v547_v62 = vpop.permute.xlu0 %546 }
 0x136   :  { %vm749_vm1 = vcmp.eq.s32.totalorder %v6723_v17, %v547_v62  ;;  %1125 = vperm.xlu1 %6472, %v172_v59   ;;  %1122 = vperm.xlu0 %6471, %v171_v60   ;;  %vm750_vm2 = vcmp.eq.s32.totalorder %v6723_v17, %v550_v61  ;;  %v192_v59 = vld [vmem:[%s9072_s1 + $0x178] sm:$0xff]  ;;  %v191_v60 = vld [vmem:[%s9072_s1 + $0x170] sm:$0xff] }
 0x137   :  { %v5295_v0 = vsel %vm749_vm1, 1.0, %v9075_v22  ;;  %v5296_v5 = vsel %vm750_vm2, 1.0, %v9075_v22 }
 0x138   :  { %6142 = vmatmul.mubr.msk.f32.gmra.mrb[88].mxu0 %vm1819_vm0, %v5294_v63 }
 0x139   :  { %v556_v3 = vpop.permute.xlu1 %555  ;;  %6144 = vmatprep.mubr.msk.f32.mxu0 %vm1819_vm0, %v5295_v0  ;;  %v553_v4 = vpop.permute.xlu0 %552 }
 0x13a   :  { %vm751_vm3 = vcmp.eq.s32.totalorder %v6723_v17, %v553_v4  ;;  %1131 = vperm.xlu1 %6472, %v174_v1   ;;  %1128 = vperm.xlu0 %6471, %v173_v2   ;;  %vm752_vm4 = vcmp.eq.s32.totalorder %v6723_v17, %v556_v3  ;;  %v194_v3 = vld [vmem:[%s9072_s1 + $0x188] sm:$0xff]  ;;  %v193_v4 = vld [vmem:[%s9072_s1 + $0x180] sm:$0xff] }
 0x13b   :  { %v5297_v6 = vsel %vm751_vm3, 1.0, %v9075_v22  ;;  %v5298_v11 = vsel %vm752_vm4, 1.0, %v9075_v22 }
 0x13c   :  { %6145 = vmatmul.mubr.msk.f32.gmra.mrb[90].mxu0 %vm1819_vm0, %v5296_v5 }
 0x13d   :  { %v562_v9 = vpop.permute.xlu1 %561  ;;  %6147 = vmatprep.mubr.msk.f32.mxu0 %vm1819_vm0, %v5297_v6  ;;  %v559_v10 = vpop.permute.xlu0 %558 }
 0x13e   :  { %vm753_vm5 = vcmp.eq.s32.totalorder %v6723_v17, %v559_v10  ;;  %1137 = vperm.xlu1 %6472, %v176_v7   ;;  %1134 = vperm.xlu0 %6471, %v175_v8   ;;  %vm754_vm6 = vcmp.eq.s32.totalorder %v6723_v17, %v562_v9 }
 0x13f   :  { %v5299_v12 = vsel %vm753_vm5, 1.0, %v9075_v22  ;;  %v5300_v19 = vsel %vm754_vm6, 1.0, %v9075_v22 }
 0x140   :  { %6148 = vmatmul.mubr.msk.f32.gmra.mrb[92].mxu0 %vm1819_vm0, %v5298_v11  ;;  %v196_v11 = vld [vmem:[%s9072_s1 + $0x198] sm:$0xff] }
 0x141   :  { %v568_v16 = vpop.permute.xlu1 %567  ;;  %6150 = vmatprep.mubr.msk.f32.mxu0 %vm1819_vm0, %v5299_v12  ;;  %v565_v18 = vpop.permute.xlu0 %564  ;;  %v195_v12 = vld [vmem:[%s9072_s1 + $0x190] sm:$0xff] }
 0x142   :  { %vm755_vm7 = vcmp.eq.s32.totalorder %v6723_v17, %v565_v18  ;;  %1143 = vperm.xlu1 %6472, %v178_v13   ;;  %1140 = vperm.xlu0 %6471, %v177_v15   ;;  %vm756_vm8 = vcmp.eq.s32.totalorder %v6723_v17, %v568_v16 }
 0x143   :  { %v5301_v20 = vsel %vm755_vm7, 1.0, %v9075_v22  ;;  %v5302_v26 = vsel %vm756_vm8, 1.0, %v9075_v22 }
 0x144   :  { %6151 = vmatmul.mubr.msk.f32.gmra.mrb[94].mxu0 %vm1819_vm0, %v5300_v19 }
 0x145   :  { %v574_v24 = vpop.permute.xlu1 %573  ;;  %6153 = vmatprep.mubr.msk.f32.mxu0 %vm1819_vm0, %v5301_v20  ;;  %v571_v25 = vpop.permute.xlu0 %570 }
 0x146   :  { %vm757_vm9 = vcmp.eq.s32.totalorder %v6723_v17, %v571_v25  ;;  %1149 = vperm.xlu1 %6472, %v180_v21   ;;  %1146 = vperm.xlu0 %6471, %v179_v23   ;;  %vm758_vm10 = vcmp.eq.s32.totalorder %v6723_v17, %v574_v24  ;;  %v198_v21 = vld [vmem:[%s9072_s1 + $0x1a8] sm:$0xff]  ;;  %v197_v23 = vld [vmem:[%s9072_s1 + $0x1a0] sm:$0xff] }
 0x147   :  { %v5303_v27 = vsel %vm757_vm9, 1.0, %v9075_v22  ;;  %v5304_v32 = vsel %vm758_vm10, 1.0, %v9075_v22 }
 0x148   :  { %6154 = vmatmul.mubr.msk.f32.gmra.mrb[96].mxu0 %vm1819_vm0, %v5302_v26 }
 0x149   :  { %v580_v30 = vpop.permute.xlu1 %579  ;;  %6156 = vmatprep.mubr.msk.f32.mxu0 %vm1819_vm0, %v5303_v27  ;;  %v577_v31 = vpop.permute.xlu0 %576 }
 0x14a   :  { %vm759_vm11 = vcmp.eq.s32.totalorder %v6723_v17, %v577_v31  ;;  %1155 = vperm.xlu1 %6472, %v182_v28   ;;  %1152 = vperm.xlu0 %6471, %v181_v29   ;;  %vm760_vm12 = vcmp.eq.s32.totalorder %v6723_v17, %v580_v30  ;;  %v200_v30 = vld [vmem:[%s9072_s1 + $0x1b8] sm:$0xff]  ;;  %v199_v31 = vld [vmem:[%s9072_s1 + $0x1b0] sm:$0xff] }
 0x14b   :  { %v5305_v33 = vsel %vm759_vm11, 1.0, %v9075_v22  ;;  %v5306_v38 = vsel %vm760_vm12, 1.0, %v9075_v22 }
 0x14c   :  { %6157 = vmatmul.mubr.msk.f32.gmra.mrb[98].mxu0 %vm1819_vm0, %v5304_v32 }
 0x14d   :  { %v586_v36 = vpop.permute.xlu1 %585  ;;  %6159 = vmatprep.mubr.msk.f32.mxu0 %vm1819_vm0, %v5305_v33  ;;  %v583_v37 = vpop.permute.xlu0 %582 }
 0x14e   :  { %vm761_vm13 = vcmp.eq.s32.totalorder %v6723_v17, %v583_v37  ;;  %1161 = vperm.xlu1 %6472, %v184_v34   ;;  %1158 = vperm.xlu0 %6471, %v183_v35   ;;  %vm762_vm14 = vcmp.eq.s32.totalorder %v6723_v17, %v586_v36 }
 0x14f   :  { %v5307_v39 = vsel %vm761_vm13, 1.0, %v9075_v22  ;;  %v5308_v44 = vsel %vm762_vm14, 1.0, %v9075_v22 }
 0x150   :  { %6160 = vmatmul.mubr.msk.f32.gmra.mrb[100].mxu0 %vm1819_vm0, %v5306_v38  ;;  %v202_v38 = vld [vmem:[%s9072_s1 + $0x1c8] sm:$0xff] }
 0x151   :  { %v592_v42 = vpop.permute.xlu1 %591  ;;  %6162 = vmatprep.mubr.msk.f32.mxu0 %vm1819_vm0, %v5307_v39  ;;  %v589_v43 = vpop.permute.xlu0 %588  ;;  %v201_v39 = vld [vmem:[%s9072_s1 + $0x1c0] sm:$0xff] }
 0x152   :  { %vm763_vm15 = vcmp.eq.s32.totalorder %v6723_v17, %v589_v43  ;;  %1167 = vperm.xlu1 %6472, %v186_v40   ;;  %1164 = vperm.xlu0 %6471, %v185_v41   ;;  %vm764_vm1 = vcmp.eq.s32.totalorder %v6723_v17, %v592_v42 }
 0x153   :  { %v5309_v45 = vsel %vm763_vm15, 1.0, %v9075_v22  ;;  %v5310_v50 = vsel %vm764_vm1, 1.0, %v9075_v22 }
 0x154   :  { %6163 = vmatmul.mubr.msk.f32.gmra.mrb[102].mxu0 %vm1819_vm0, %v5308_v44 }
 0x155   :  { %v598_v48 = vpop.permute.xlu1 %597  ;;  %6165 = vmatprep.mubr.msk.f32.mxu0 %vm1819_vm0, %v5309_v45  ;;  %v595_v49 = vpop.permute.xlu0 %594 }
 0x156   :  { %vm765_vm2 = vcmp.eq.s32.totalorder %v6723_v17, %v595_v49  ;;  %1173 = vperm.xlu1 %6472, %v188_v46   ;;  %1170 = vperm.xlu0 %6471, %v187_v47   ;;  %vm766_vm3 = vcmp.eq.s32.totalorder %v6723_v17, %v598_v48  ;;  %v204_v46 = vld [vmem:[%s9072_s1 + $0x1d8] sm:$0xff]  ;;  %v203_v47 = vld [vmem:[%s9072_s1 + $0x1d0] sm:$0xff] }
 0x157   :  { %v5311_v51 = vsel %vm765_vm2, 1.0, %v9075_v22  ;;  %v5312_v56 = vsel %vm766_vm3, 1.0, %v9075_v22 }
 0x158   :  { %6166 = vmatmul.mubr.msk.f32.gmra.mrb[104].mxu0 %vm1819_vm0, %v5310_v50 }
 0x159   :  { %v604_v54 = vpop.permute.xlu1 %603  ;;  %6168 = vmatprep.mubr.msk.f32.mxu0 %vm1819_vm0, %v5311_v51  ;;  %v601_v55 = vpop.permute.xlu0 %600 }
 0x15a   :  { %vm767_vm4 = vcmp.eq.s32.totalorder %v6723_v17, %v601_v55  ;;  %1179 = vperm.xlu1 %6472, %v190_v52   ;;  %1176 = vperm.xlu0 %6471, %v189_v53   ;;  %vm768_vm5 = vcmp.eq.s32.totalorder %v6723_v17, %v604_v54  ;;  %v206_v54 = vld [vmem:[%s9072_s1 + $0x1e8] sm:$0xff]  ;;  %v205_v55 = vld [vmem:[%s9072_s1 + $0x1e0] sm:$0xff] }
 0x15b   :  { %v5313_v57 = vsel %vm767_vm4, 1.0, %v9075_v22  ;;  %v7410_v58 = vpop.f32.mrb[0].mxu0  ;;  %v5314_v0 = vsel %vm768_vm5, 1.0, %v9075_v22 }
 0x15c   :  { %v7419_v61 = vpop.f32.mrb[1].mxu0  ;;  %6169 = vmatmul.mubr.msk.f32.gmra.mrb[106].mxu0 %vm1819_vm0, %v5312_v56 }
 0x15d   :  { %v610_v62 = vpop.permute.xlu1 %609  ;;  %6171 = vmatprep.mubr.msk.f32.mxu0 %vm1819_vm0, %v5313_v57  ;;  %v607_v63 = vpop.permute.xlu0 %606 }
 0x15e   :  { %vm769_vm6 = vcmp.eq.s32.totalorder %v6723_v17, %v607_v63  ;;  %1185 = vperm.xlu1 %6472, %v192_v59   ;;  %1182 = vperm.xlu0 %6471, %v191_v60   ;;  %vm770_vm7 = vcmp.eq.s32.totalorder %v6723_v17, %v610_v62 }
 0x15f   :  { %v5315_v1 = vsel %vm769_vm6, 1.0, %v9075_v22  ;;  %v7426_v2 = vpop.f32.mrb[2].mxu0  ;;  %v5316_v8 = vsel %vm770_vm7, 1.0, %v9075_v22 }
 0x160   :  { %v7435_v5 = vpop.f32.mrb[3].mxu0  ;;  %6172 = vmatmul.mubr.msk.f32.gmra.mrb[108].mxu0 %vm1819_vm0, %v5314_v0  ;;  %v208_v0 = vld [vmem:[%s9072_s1 + $0x1f8] sm:$0xff] }
 0x161   :  { %v616_v6 = vpop.permute.xlu1 %615  ;;  %6174 = vmatprep.mubr.msk.f32.mxu0 %vm1819_vm0, %v5315_v1  ;;  %v613_v7 = vpop.permute.xlu0 %612  ;;  %v207_v1 = vld [vmem:[%s9072_s1 + $0x1f0] sm:$0xff] }
 0x162   :  { %vm771_vm8 = vcmp.eq.s32.totalorder %v6723_v17, %v613_v7  ;;  %1191 = vperm.xlu1 %6472, %v194_v3   ;;  %1188 = vperm.xlu0 %6471, %v193_v4   ;;  %vm772_vm9 = vcmp.eq.s32.totalorder %v6723_v17, %v616_v6 }
 0x163   :  { %v5317_v9 = vsel %vm771_vm8, 1.0, %v9075_v22  ;;  %v7442_v10 = vpop.f32.mrb[4].mxu0  ;;  %v5318_v18 = vsel %vm772_vm9, 1.0, %v9075_v22 }
 0x164   :  { %v7451_v13 = vpop.f32.mrb[5].mxu0  ;;  %6175 = vmatmul.mubr.msk.f32.gmra.mrb[110].mxu0 %vm1819_vm0, %v5316_v8 }
 0x165   :  { %v622_v15 = vpop.permute.xlu1 %621  ;;  %6177 = vmatprep.mubr.msk.f32.mxu0 %vm1819_vm0, %v5317_v9  ;;  %v619_v16 = vpop.permute.xlu0 %618 }
 0x166   :  { %vm773_vm10 = vcmp.eq.s32.totalorder %v6723_v17, %v619_v16  ;;  %1197 = vperm.xlu1 %6472, %v196_v11   ;;  %1194 = vperm.xlu0 %6471, %v195_v12   ;;  %vm774_vm11 = vcmp.eq.s32.totalorder %v6723_v17, %v622_v15  ;;  %v210_v11 = vld [vmem:[%s9072_s1 + $0x208] sm:$0xff]  ;;  %v209_v12 = vld [vmem:[%s9072_s1 + $0x200] sm:$0xff] }
 0x167   :  { %v5319_v19 = vsel %vm773_vm10, 1.0, %v9075_v22  ;;  %v7458_v20 = vpop.f32.mrb[6].mxu0  ;;  %v5320_v27 = vsel %vm774_vm11, 1.0, %v9075_v22  ;;  %vm2921_vm10 = vcmask 785408  }
 0x168   :  { %v7467_v24 = vpop.f32.mrb[7].mxu0  ;;  %6178 = vmatmul.mubr.msk.f32.gmra.mrb[112].mxu0 %vm1819_vm0, %v5318_v18 }
 0x169   :  { %v628_v25 = vpop.permute.xlu1 %627  ;;  %6180 = vmatprep.mubr.msk.f32.mxu0 %vm1819_vm0, %v5319_v19  ;;  %v625_v26 = vpop.permute.xlu0 %624 }
 0x16a   :  { %vm775_vm12 = vcmp.eq.s32.totalorder %v6723_v17, %v625_v26  ;;  %1203 = vperm.xlu1 %6472, %v198_v21   ;;  %1200 = vperm.xlu0 %6471, %v197_v23   ;;  %vm776_vm13 = vcmp.eq.s32.totalorder %v6723_v17, %v628_v25  ;;  %v212_v25 = vld [vmem:[%s9072_s1 + $0x218] sm:$0xff]  ;;  %v211_v26 = vld [vmem:[%s9072_s1 + $0x210] sm:$0xff] }
 0x16b   :  { %v5321_v28 = vsel %vm775_vm12, 1.0, %v9075_v22  ;;  %v7474_v29 = vpop.f32.mrb[8].mxu0  ;;  %v5322_v35 = vsel %vm776_vm13, 1.0, %v9075_v22 }
 0x16c   :  { %v7483_v32 = vpop.f32.mrb[9].mxu0  ;;  %6181 = vmatmul.mubr.msk.f32.gmra.mrb[114].mxu0 %vm1819_vm0, %v5320_v27 }
 0x16d   :  { %v634_v33 = vpop.permute.xlu1 %633  ;;  %6183 = vmatprep.mubr.msk.f32.mxu0 %vm1819_vm0, %v5321_v28  ;;  %v631_v34 = vpop.permute.xlu0 %630 }
 0x16e   :  { %vm777_vm14 = vcmp.eq.s32.totalorder %v6723_v17, %v631_v34  ;;  %1209 = vperm.xlu1 %6472, %v200_v30   ;;  %1206 = vperm.xlu0 %6471, %v199_v31   ;;  %vm778_vm15 = vcmp.eq.s32.totalorder %v6723_v17, %v634_v33 }
 0x16f   :  { %v5323_v36 = vsel %vm777_vm14, 1.0, %v9075_v22  ;;  %v7490_v37 = vpop.f32.mrb[10].mxu0  ;;  %v5324_v43 = vsel %vm778_vm15, 1.0, %v9075_v22 }
 0x170   :  { %v7499_v40 = vpop.f32.mrb[11].mxu0  ;;  %6184 = vmatmul.mubr.msk.f32.gmra.mrb[116].mxu0 %vm1819_vm0, %v5322_v35 }
 0x171   :  { %v640_v41 = vpop.permute.xlu1 %639  ;;  %6186 = vmatprep.mubr.msk.f32.mxu0 %vm1819_vm0, %v5323_v36  ;;  %v637_v42 = vpop.permute.xlu0 %636  ;;  %v214_v36 = vld [vmem:[%s9072_s1 + $0x228] sm:$0xff] }
 0x172   :  { %vm779_vm1 = vcmp.eq.s32.totalorder %v6723_v17, %v637_v42  ;;  %1215 = vperm.xlu1 %6472, %v202_v38   ;;  %1212 = vperm.xlu0 %6471, %v201_v39   ;;  %vm780_vm2 = vcmp.eq.s32.totalorder %v6723_v17, %v640_v41  ;;  %v213_v38 = vld [vmem:[%s9072_s1 + $0x220] sm:$0xff] }
 0x173   :  { %v5325_v44 = vsel %vm779_vm1, 1.0, %v9075_v22  ;;  %v7506_v45 = vpop.f32.mrb[12].mxu0  ;;  %v5326_v51 = vsel %vm780_vm2, 1.0, %v9075_v22 }
 0x174   :  { %v7515_v48 = vpop.f32.mrb[13].mxu0  ;;  %6187 = vmatmul.mubr.msk.f32.gmra.mrb[118].mxu0 %vm1819_vm0, %v5324_v43 }
 0x175   :  { %v646_v49 = vpop.permute.xlu1 %645  ;;  %6189 = vmatprep.mubr.msk.f32.mxu0 %vm1819_vm0, %v5325_v44  ;;  %v643_v50 = vpop.permute.xlu0 %642 }
 0x176   :  { %vm781_vm3 = vcmp.eq.s32.totalorder %v6723_v17, %v643_v50  ;;  %1221 = vperm.xlu1 %6472, %v204_v46   ;;  %1218 = vperm.xlu0 %6471, %v203_v47   ;;  %vm782_vm4 = vcmp.eq.s32.totalorder %v6723_v17, %v646_v49  ;;  %v216_v47 = vld [vmem:[%s9072_s1 + $0x238] sm:$0xff]  ;;  %v215_v49 = vld [vmem:[%s9072_s1 + $0x230] sm:$0xff] }
 0x177   :  { %v5327_v52 = vsel %vm781_vm3, 1.0, %v9075_v22  ;;  %v7522_v53 = vpop.f32.mrb[14].mxu0  ;;  %v5328_v60 = vsel %vm782_vm4, 1.0, %v9075_v22 }
 0x178   :  { %v7531_v56 = vpop.f32.mrb[15].mxu0  ;;  %6190 = vmatmul.mubr.msk.f32.gmra.mrb[120].mxu0 %vm1819_vm0, %v5326_v51 }
 0x179   :  { %v652_v57 = vpop.permute.xlu1 %651  ;;  %6192 = vmatprep.mubr.msk.f32.mxu0 %vm1819_vm0, %v5327_v52  ;;  %v649_v59 = vpop.permute.xlu0 %648 }
 0x17a   :  { %vm783_vm5 = vcmp.eq.s32.totalorder %v6723_v17, %v649_v59  ;;  %1227 = vperm.xlu1 %6472, %v206_v54   ;;  %1224 = vperm.xlu0 %6471, %v205_v55   ;;  %vm784_vm6 = vcmp.eq.s32.totalorder %v6723_v17, %v652_v57  ;;  %v218_v59 = vld [vmem:[%s9072_s1 + $0x248] sm:$0xff] }
 0x17b   :  { %v5329_v62 = vsel %vm783_vm5, 1.0, %v9075_v22  ;;  %v7538_v63 = vpop.f32.mrb[16].mxu0  ;;  %v5330_v7 = vsel %vm784_vm6, 1.0, %v9075_v22 }
 0x17c   :  { %v7547_v3 = vpop.f32.mrb[17].mxu0  ;;  %6193 = vmatmul.mubr.msk.f32.gmra.mrb[122].mxu0 %vm1819_vm0, %v5328_v60  ;;  %v217_v60 = vld [vmem:[%s9072_s1 + $0x240] sm:$0xff] }
 0x17d   :  { %v658_v4 = vpop.permute.xlu1 %657  ;;  %6195 = vmatprep.mubr.msk.f32.mxu0 %vm1819_vm0, %v5329_v62  ;;  %v655_v6 = vpop.permute.xlu0 %654 }
 0x17e   :  { %vm785_vm7 = vcmp.eq.s32.totalorder %v6723_v17, %v655_v6  ;;  %1233 = vperm.xlu1 %6472, %v208_v0   ;;  %1230 = vperm.xlu0 %6471, %v207_v1   ;;  %vm786_vm8 = vcmp.eq.s32.totalorder %v6723_v17, %v658_v4 }
 0x17f   :  { %v5331_v8 = vsel %vm785_vm7, 1.0, %v9075_v22  ;;  %v7554_v9 = vpop.f32.mrb[18].mxu0  ;;  %v5332_v19 = vsel %vm786_vm8, 1.0, %v9075_v22 }
 0x180   :  { %v7563_v15 = vpop.f32.mrb[19].mxu0  ;;  %6196 = vmatmul.mubr.msk.f32.gmra.mrb[124].mxu0 %vm1819_vm0, %v5330_v7 }
 0x181   :  { %v1048_v16 = vpop.permute.xlu1 %1047  ;;  %6198 = vmatprep.mubr.msk.f32.mxu0 %vm1819_vm0, %v5331_v8  ;;  %v1045_v18 = vpop.permute.xlu0 %1044  ;;  %v220_v8 = vld [vmem:[%s9072_s1 + $0x258] sm:$0xff] }
 0x182   :  { %vm1427_vm9 = vcmp.eq.s32.totalorder %v6723_v17, %v1045_v18  ;;  %1239 = vperm.xlu1 %6472, %v210_v11   ;;  %1236 = vperm.xlu0 %6471, %v209_v12   ;;  %vm1428_vm11 = vcmp.eq.s32.totalorder %v6723_v17, %v1048_v16  ;;  %v219_v11 = vld [vmem:[%s9072_s1 + $0x250] sm:$0xff] }
 0x183   :  { %v5333_v21 = vsel %vm1427_vm9, 1.0, %v9075_v22  ;;  %v7570_v23 = vpop.f32.mrb[20].mxu0  ;;  %v5334_v31 = vsel %vm1428_vm11, 1.0, %v9075_v22 }
 0x184   :  { %v7579_v27 = vpop.f32.mrb[21].mxu0  ;;  %6199 = vmatmul.mubr.msk.f32.gmra.mrb[126].mxu0 %vm1819_vm0, %v5332_v19 }
 0x185   :  { %v1054_v28 = vpop.permute.xlu1 %1053  ;;  %6225 = vmatprep.mubr.msk.f32.mxu0 %vm2921_vm10, %v5333_v21  ;;  %v1051_v30 = vpop.permute.xlu0 %1050 }
 0x186   :  { %vm1430_vm12 = vcmp.eq.s32.totalorder %v6723_v17, %v1054_v28  ;;  %1245 = vperm.xlu1 %6472, %v212_v25   ;;  %1242 = vperm.xlu0 %6471, %v211_v26   ;;  %vm1429_vm13 = vcmp.eq.s32.totalorder %v6723_v17, %v1051_v30  ;;  %v222_v26 = vld [vmem:[%s9072_s1 + $0x268] sm:$0xff]  ;;  %v221_v28 = vld [vmem:[%s9072_s1 + $0x260] sm:$0xff] }
 0x187   :  { %v5336_v33 = vsel %vm1430_vm12, 1.0, %v9075_v22  ;;  %v7587_v34 = vpop.f32.mrb[22].mxu0  ;;  %v5335_v35 = vsel %vm1429_vm13, 1.0, %v9075_v22 }
 0x188   :  { %v7596_v39 = vpop.f32.mrb[23].mxu0  ;;  %6226 = vmatmul.mubr.msk.f32.vlgmr.msra.gmra.mrb[128].mxu0 %vm2921_vm10, %v5334_v31  ;;  %6228 = vmatprep.mubr.msk.f32.mxu1 %vm2921_vm10, %v5335_v35 }
 0x189   :  { %v1060_v41 = vpop.permute.xlu1 %1059  ;;  %6229 = vmatmul.mubr.msk.f32.vlgmr.msra.gmra.mrb[0].mxu1 %vm2921_vm10, %v5336_v33  ;;  %v1057_v42 = vpop.permute.xlu0 %1056 }
 0x18a   :  { %vm1432_vm0 = vcmp.eq.s32.totalorder %v6723_v17, %v1060_v41  ;;  %vm1431_vm14 = vcmp.eq.s32.totalorder %v6723_v17, %v1057_v42  ;;  %1251 = vperm.xlu1 %6472, %v214_v36   ;;  %1248 = vperm.xlu0 %6471, %v213_v38   ;;  %v224_v41 = vld [vmem:[%s9072_s1 + $0x278] sm:$0xff]  ;;  %v223_v42 = vld [vmem:[%s9072_s1 + $0x270] sm:$0xff] }
 0x18b   :  { %v5338_v43 = vsel %vm1432_vm0, 1.0, %v9075_v22  ;;  %v5337_v44 = vsel %vm1431_vm14, 1.0, %v9075_v22  ;;  %v7605_v46 = vpop.f32.mrb[24].mxu0 }
 0x18c   :  { %v7613_v50 = vpop.f32.mrb[25].mxu0  ;;  %6231 = vmatprep.mubr.msk.f32.mxu1 %vm2921_vm10, %v5337_v44 }
 0x18d   :  { %v1066_v51 = vpop.permute.xlu1 %1065  ;;  %6232 = vmatmul.mubr.msk.f32.gmra.mrb[2].mxu1 %vm2921_vm10, %v5338_v43  ;;  %v1063_v52 = vpop.permute.xlu0 %1062 }
 0x18e   :  { %vm1434_vm15 = vcmp.eq.s32.totalorder %v6723_v17, %v1066_v51  ;;  %vm1433_vm1 = vcmp.eq.s32.totalorder %v6723_v17, %v1063_v52  ;;  %1257 = vperm.xlu1 %6472, %v216_v47   ;;  %1254 = vperm.xlu0 %6471, %v215_v49  }
 0x18f   :  { %v5340_v54 = vsel %vm1434_vm15, 1.0, %v9075_v22  ;;  %v5339_v55 = vsel %vm1433_vm1, 1.0, %v9075_v22  ;;  %v7621_v57 = vpop.f32.mrb[26].mxu0 }
 0x190   :  { %v7629_v62 = vpop.f32.mrb[27].mxu0  ;;  %6234 = vmatprep.mubr.msk.f32.mxu1 %vm2921_vm10, %v5339_v55  ;;  %v225_v55 = vld [vmem:[%s9072_s1 + $0x280] sm:$0xff] }
 0x191   :  { %v1072_v0 = vpop.permute.xlu1 %1071  ;;  %6235 = vmatmul.mubr.msk.f32.gmra.mrb[4].mxu1 %vm2921_vm10, %v5340_v54  ;;  %v1069_v1 = vpop.permute.xlu0 %1068  ;;  %v226_v54 = vld [vmem:[%s9072_s1 + $0x288] sm:$0xff] }
 0x192   :  { %vm1436_vm2 = vcmp.eq.s32.totalorder %v6723_v17, %v1072_v0  ;;  %vm1435_vm3 = vcmp.eq.s32.totalorder %v6723_v17, %v1069_v1  ;;  %1263 = vperm.xlu1 %6472, %v218_v59   ;;  %1260 = vperm.xlu0 %6471, %v217_v60  }
 0x193   :  { %v5342_v4 = vsel %vm1436_vm2, 1.0, %v9075_v22  ;;  %v5341_v6 = vsel %vm1435_vm3, 1.0, %v9075_v22  ;;  %v7637_v7 = vpop.f32.mrb[28].mxu0 }
 0x194   :  { %v7645_v12 = vpop.f32.mrb[29].mxu0  ;;  %6237 = vmatprep.mubr.msk.f32.mxu1 %vm2921_vm10, %v5341_v6 }
 0x195   :  { %v1078_v16 = vpop.permute.xlu1 %1077  ;;  %6238 = vmatmul.mubr.msk.f32.gmra.mrb[6].mxu1 %vm2921_vm10, %v5342_v4  ;;  %v1075_v18 = vpop.permute.xlu0 %1074 }
 0x196   :  { %vm1438_vm4 = vcmp.eq.s32.totalorder %v6723_v17, %v1078_v16  ;;  %vm1437_vm5 = vcmp.eq.s32.totalorder %v6723_v17, %v1075_v18  ;;  %1269 = vperm.xlu1 %6472, %v220_v8   ;;  %1266 = vperm.xlu0 %6471, %v219_v11   ;;  %v228_v8 = vld [vmem:[%s9072_s1 + $0x298] sm:$0xff]  ;;  %v227_v11 = vld [vmem:[%s9072_s1 + $0x290] sm:$0xff] }
 0x197   :  { %v5344_v19 = vsel %vm1438_vm4, 1.0, %v9075_v22  ;;  %v5343_v21 = vsel %vm1437_vm5, 1.0, %v9075_v22  ;;  %v7653_v25 = vpop.f32.mrb[30].mxu0 }
 0x198   :  { %v7661_v30 = vpop.f32.mrb[31].mxu0  ;;  %6240 = vmatprep.mubr.msk.f32.mxu1 %vm2921_vm10, %v5343_v21 }
 0x199   :  { %v1084_v31 = vpop.permute.xlu1 %1083  ;;  %6241 = vmatmul.mubr.msk.f32.gmra.mrb[8].mxu1 %vm2921_vm10, %v5344_v19  ;;  %v1081_v33 = vpop.permute.xlu0 %1080 }
 0x19a   :  { %vm1440_vm6 = vcmp.eq.s32.totalorder %v6723_v17, %v1084_v31  ;;  %vm1439_vm7 = vcmp.eq.s32.totalorder %v6723_v17, %v1081_v33  ;;  %1275 = vperm.xlu1 %6472, %v222_v26   ;;  %1272 = vperm.xlu0 %6471, %v221_v28   ;;  %v230_v31 = vld [vmem:[%s9072_s1 + $0x2a8] sm:$0xff]  ;;  %v229_v33 = vld [vmem:[%s9072_s1 + $0x2a0] sm:$0xff] }
 0x19b   :  { %v5346_v35 = vsel %vm1440_vm6, 1.0, %v9075_v22  ;;  %v5345_v36 = vsel %vm1439_vm7, 1.0, %v9075_v22  ;;  %v7669_v38 = vpop.f32.mrb[32].mxu0 }
 0x19c   :  { %v7677_v43 = vpop.f32.mrb[33].mxu0  ;;  %6243 = vmatprep.mubr.msk.f32.mxu1 %vm2921_vm10, %v5345_v36 }
 0x19d   :  { %v1090_v44 = vpop.permute.xlu1 %1089  ;;  %6244 = vmatmul.mubr.msk.f32.gmra.mrb[10].mxu1 %vm2921_vm10, %v5346_v35  ;;  %v1087_v47 = vpop.permute.xlu0 %1086 }
 0x19e   :  { %vm1442_vm8 = vcmp.eq.s32.totalorder %v6723_v17, %v1090_v44  ;;  %vm1441_vm9 = vcmp.eq.s32.totalorder %v6723_v17, %v1087_v47  ;;  %1281 = vperm.xlu1 %6472, %v224_v41   ;;  %1278 = vperm.xlu0 %6471, %v223_v42  }
 0x19f   :  { %v5348_v49 = vsel %vm1442_vm8, 1.0, %v9075_v22  ;;  %v5347_v51 = vsel %vm1441_vm9, 1.0, %v9075_v22  ;;  %v7685_v52 = vpop.f32.mrb[34].mxu0 }
 0x1a0   :  { %v7693_v59 = vpop.f32.mrb[35].mxu0  ;;  %6246 = vmatprep.mubr.msk.f32.mxu1 %vm2921_vm10, %v5347_v51  ;;  %v231_v51 = vld [vmem:[%s9072_s1 + $0x2b0] sm:$0xff] }
 0x1a1   :  { %v1096_v60 = vpop.permute.xlu1 %1095  ;;  %6247 = vmatmul.mubr.msk.f32.gmra.mrb[12].mxu1 %vm2921_vm10, %v5348_v49  ;;  %v1093_v0 = vpop.permute.xlu0 %1092  ;;  %v232_v49 = vld [vmem:[%s9072_s1 + $0x2b8] sm:$0xff] }
 0x1a2   :  { %vm1444_vm11 = vcmp.eq.s32.totalorder %v6723_v17, %v1096_v60  ;;  %vm1443_vm12 = vcmp.eq.s32.totalorder %v6723_v17, %v1093_v0  ;;  %1287 = vperm.xlu1 %6472, %v226_v54   ;;  %1284 = vperm.xlu0 %6471, %v225_v55  }
 0x1a3   :  { %v5350_v1 = vsel %vm1444_vm11, 1.0, %v9075_v22  ;;  %v5349_v4 = vsel %vm1443_vm12, 1.0, %v9075_v22  ;;  %v7701_v6 = vpop.f32.mrb[36].mxu0 }
 0x1a4   :  { %v7709_v16 = vpop.f32.mrb[37].mxu0  ;;  %6249 = vmatprep.mubr.msk.f32.mxu1 %vm2921_vm10, %v5349_v4 }
 0x1a5   :  { %v1102_v18 = vpop.permute.xlu1 %1101  ;;  %6250 = vmatmul.mubr.msk.f32.gmra.mrb[14].mxu1 %vm2921_vm10, %v5350_v1  ;;  %v1099_v19 = vpop.permute.xlu0 %1098 }
 0x1a6   :  { %vm1446_vm13 = vcmp.eq.s32.totalorder %v6723_v17, %v1102_v18  ;;  %vm1445_vm0 = vcmp.eq.s32.totalorder %v6723_v17, %v1099_v19  ;;  %1293 = vperm.xlu1 %6472, %v228_v8   ;;  %1290 = vperm.xlu0 %6471, %v227_v11   ;;  %v234_v8 = vld [vmem:[%s9072_s1 + $0x2c8] sm:$0xff]  ;;  %v233_v11 = vld [vmem:[%s9072_s1 + $0x2c0] sm:$0xff] }
 0x1a7   :  { %v5352_v21 = vsel %vm1446_vm13, 1.0, %v9075_v22  ;;  %v5351_v26 = vsel %vm1445_vm0, 1.0, %v9075_v22  ;;  %v7717_v28 = vpop.f32.mrb[38].mxu0 }
 0x1a8   :  { %v7725_v35 = vpop.f32.mrb[39].mxu0  ;;  %6252 = vmatprep.mubr.msk.f32.mxu1 %vm2921_vm10, %v5351_v26 }
 0x1a9   :  { %v1108_v36 = vpop.permute.xlu1 %1107  ;;  %6253 = vmatmul.mubr.msk.f32.gmra.mrb[16].mxu1 %vm2921_vm10, %v5352_v21  ;;  %v1105_v41 = vpop.permute.xlu0 %1104 }
 0x1aa   :  { %vm1448_vm14 = vcmp.eq.s32.totalorder %v6723_v17, %v1108_v36  ;;  %vm1447_vm15 = vcmp.eq.s32.totalorder %v6723_v17, %v1105_v41  ;;  %1299 = vperm.xlu1 %6472, %v230_v31   ;;  %1296 = vperm.xlu0 %6471, %v229_v33   ;;  %v236_v36 = vld [vmem:[%s9072_s1 + $0x2d8] sm:$0xff]  ;;  %v235_v41 = vld [vmem:[%s9072_s1 + $0x2d0] sm:$0xff] }
 0x1ab   :  { %v5354_v42 = vsel %vm1448_vm14, 1.0, %v9075_v22  ;;  %v5353_v44 = vsel %vm1447_vm15, 1.0, %v9075_v22  ;;  %v7733_v47 = vpop.f32.mrb[40].mxu0 }
 0x1ac   :  { %v7741_v54 = vpop.f32.mrb[41].mxu0  ;;  %6255 = vmatprep.mubr.msk.f32.mxu1 %vm2921_vm10, %v5353_v44 }
 0x1ad   :  { %v1114_v55 = vpop.permute.xlu1 %1113  ;;  %6256 = vmatmul.mubr.msk.f32.gmra.mrb[18].mxu1 %vm2921_vm10, %v5354_v42  ;;  %v1111_v60 = vpop.permute.xlu0 %1110 }
 0x1ae   :  { %vm1450_vm1 = vcmp.eq.s32.totalorder %v6723_v17, %v1114_v55  ;;  %vm1449_vm2 = vcmp.eq.s32.totalorder %v6723_v17, %v1111_v60  ;;  %1305 = vperm.xlu1 %6472, %v232_v49   ;;  %1302 = vperm.xlu0 %6471, %v231_v51  }
 0x1af   :  { %v5356_v0 = vsel %vm1450_vm1, 1.0, %v9075_v22  ;;  %v5355_v1 = vsel %vm1449_vm2, 1.0, %v9075_v22  ;;  %v7749_v4 = vpop.f32.mrb[42].mxu0 }
 0x1b0   :  { %v7757_v18 = vpop.f32.mrb[43].mxu0  ;;  %6258 = vmatprep.mubr.msk.f32.mxu1 %vm2921_vm10, %v5355_v1  ;;  %v237_v1 = vld [vmem:[%s9072_s1 + $0x2e0] sm:$0xff] }
 0x1b1   :  { %v1120_v19 = vpop.permute.xlu1 %1119  ;;  %6259 = vmatmul.mubr.msk.f32.gmra.mrb[20].mxu1 %vm2921_vm10, %v5356_v0  ;;  %v1117_v21 = vpop.permute.xlu0 %1116  ;;  %v238_v0 = vld [vmem:[%s9072_s1 + $0x2e8] sm:$0xff] }
 0x1b2   :  { %vm1452_vm3 = vcmp.eq.s32.totalorder %v6723_v17, %v1120_v19  ;;  %vm1451_vm4 = vcmp.eq.s32.totalorder %v6723_v17, %v1117_v21  ;;  %1311 = vperm.xlu1 %6472, %v234_v8   ;;  %1308 = vperm.xlu0 %6471, %v233_v11  }
 0x1b3   :  { %v5358_v26 = vsel %vm1452_vm3, 1.0, %v9075_v22  ;;  %v5357_v31 = vsel %vm1451_vm4, 1.0, %v9075_v22  ;;  %v7765_v33 = vpop.f32.mrb[44].mxu0 }
 0x1b4   :  { %v7773_v42 = vpop.f32.mrb[45].mxu0  ;;  %6261 = vmatprep.mubr.msk.f32.mxu1 %vm2921_vm10, %v5357_v31 }
 0x1b5   :  { %v1126_v44 = vpop.permute.xlu1 %1125  ;;  %6262 = vmatmul.mubr.msk.f32.gmra.mrb[22].mxu1 %vm2921_vm10, %v5358_v26  ;;  %v1123_v49 = vpop.permute.xlu0 %1122 }
 0x1b6   :  { %vm1454_vm5 = vcmp.eq.s32.totalorder %v6723_v17, %v1126_v44  ;;  %vm1453_vm6 = vcmp.eq.s32.totalorder %v6723_v17, %v1123_v49  ;;  %1317 = vperm.xlu1 %6472, %v236_v36   ;;  %1314 = vperm.xlu0 %6471, %v235_v41   ;;  %v240_v36 = vld [vmem:[%s9072_s1 + $0x2f8] sm:$0xff]  ;;  %v239_v41 = vld [vmem:[%s9072_s1 + $0x2f0] sm:$0xff] }
 0x1b7   :  { %v5360_v51 = vsel %vm1454_vm5, 1.0, %v9075_v22  ;;  %v5359_v55 = vsel %vm1453_vm6, 1.0, %v9075_v22  ;;  %v7781_v60 = vpop.f32.mrb[46].mxu0 }
 0x1b8   :  { %v7789_v8 = vpop.f32.mrb[47].mxu0  ;;  %6264 = vmatprep.mubr.msk.f32.mxu1 %vm2921_vm10, %v5359_v55 }
 0x1b9   :  { %v1132_v11 = vpop.permute.xlu1 %1131  ;;  %6265 = vmatmul.mubr.msk.f32.gmra.mrb[24].mxu1 %vm2921_vm10, %v5360_v51  ;;  %v1129_v19 = vpop.permute.xlu0 %1128 }
 0x1ba   :  { %vm1456_vm7 = vcmp.eq.s32.totalorder %v6723_v17, %v1132_v11  ;;  %vm1455_vm8 = vcmp.eq.s32.totalorder %v6723_v17, %v1129_v19  ;;  %1323 = vperm.xlu1 %6472, %v238_v0   ;;  %1320 = vperm.xlu0 %6471, %v237_v1   ;;  %v242_v11 = vld [vmem:[%s9072_s1 + $0x308] sm:$0xff]  ;;  %v241_v19 = vld [vmem:[%s9072_s1 + $0x300] sm:$0xff] }
 0x1bb   :  { %v5362_v21 = vsel %vm1456_vm7, 1.0, %v9075_v22  ;;  %v5361_v26 = vsel %vm1455_vm8, 1.0, %v9075_v22  ;;  %v7797_v31 = vpop.f32.mrb[48].mxu0 }
 0x1bc   :  { %v7805_v44 = vpop.f32.mrb[49].mxu0  ;;  %6267 = vmatprep.mubr.msk.f32.mxu1 %vm2921_vm10, %v5361_v26 }
 0x1bd   :  { %v1138_v49 = vpop.permute.xlu1 %1137  ;;  %6268 = vmatmul.mubr.msk.f32.gmra.mrb[26].mxu1 %vm2921_vm10, %v5362_v21  ;;  %v1135_v51 = vpop.permute.xlu0 %1134 }
 0x1be   :  { %vm1458_vm9 = vcmp.eq.s32.totalorder %v6723_v17, %v1138_v49  ;;  %vm1457_vm11 = vcmp.eq.s32.totalorder %v6723_v17, %v1135_v51  ;;  %1329 = vperm.xlu1 %6472, %v240_v36   ;;  %1326 = vperm.xlu0 %6471, %v239_v41  }
 0x1bf   :  { %v5364_v55 = vsel %vm1458_vm9, 1.0, %v9075_v22  ;;  %v5363_v0 = vsel %vm1457_vm11, 1.0, %v9075_v22  ;;  %v7813_v1 = vpop.f32.mrb[50].mxu0 }
 0x1c0   :  { %9078 = vst [vmem:[#allocation2_spill] sm:$0xff] %v7813_v1  ;;  %v7821_v21 = vpop.f32.mrb[51].mxu0  ;;  %6270 = vmatprep.mubr.msk.f32.mxu1 %vm2921_vm10, %v5363_v0  ;;  %v244_v0 = vld [vmem:[%s9072_s1 + $0x318] sm:$0xff] }
 0x1c1   :  { %9079 = vst [vmem:[#allocation3_spill] sm:$0xff] %v7821_v21  ;;  %v1144_v26 = vpop.permute.xlu1 %1143  ;;  %6271 = vmatmul.mubr.msk.f32.gmra.mrb[28].mxu1 %vm2921_vm10, %v5364_v55  ;;  %v1141_v36 = vpop.permute.xlu0 %1140  ;;  %v243_v55 = vld [vmem:[%s9072_s1 + $0x310] sm:$0xff] }
 0x1c2   :  { %vm1460_vm12 = vcmp.eq.s32.totalorder %v6723_v17, %v1144_v26  ;;  %vm1459_vm13 = vcmp.eq.s32.totalorder %v6723_v17, %v1141_v36  ;;  %1335 = vperm.xlu1 %6472, %v242_v11   ;;  %1332 = vperm.xlu0 %6471, %v241_v19  }
 0x1c3   :  { %v5366_v41 = vsel %vm1460_vm12, 1.0, %v9075_v22  ;;  %v5365_v49 = vsel %vm1459_vm13, 1.0, %v9075_v22  ;;  %v7829_v51 = vpop.f32.mrb[52].mxu0 }
 0x1c4   :  { %9080 = vst [vmem:[#allocation4_spill] sm:$0xff] %v7829_v51  ;;  %v7837_v14 = vpop.f32.mrb[53].mxu0  ;;  %6273 = vmatprep.mubr.msk.f32.mxu1 %vm2921_vm10, %v5365_v49  ;;  %v246_v49 = vld [vmem:[%s9072_s1 + $0x328] sm:$0xff] }
 0x1c5   :  { %9081 = vst [vmem:[#allocation5_spill] sm:$0xff] %v7837_v14  ;;  %v1150_v11 = vpop.permute.xlu1 %1149  ;;  %6274 = vmatmul.mubr.msk.f32.gmra.mrb[30].mxu1 %vm2921_vm10, %v5366_v41  ;;  %v1147_v19 = vpop.permute.xlu0 %1146  ;;  %v245_v41 = vld [vmem:[%s9072_s1 + $0x320] sm:$0xff] }
 0x1c6   :  { %vm1462_vm0 = vcmp.eq.s32.totalorder %v6723_v17, %v1150_v11  ;;  %vm1461_vm14 = vcmp.eq.s32.totalorder %v6723_v17, %v1147_v19  ;;  %1341 = vperm.xlu1 %6472, %v244_v0   ;;  %1338 = vperm.xlu0 %6471, %v243_v55  }
 0x1c7   :  { %v5368_v26 = vsel %vm1462_vm0, 1.0, %v9075_v22  ;;  %v5367_v36 = vsel %vm1461_vm14, 1.0, %v9075_v22  ;;  %v7845_v51 = vpop.f32.mrb[54].mxu0 }
 0x1c8   :  { %9082 = vst [vmem:[#allocation6_spill] sm:$0xff] %v7845_v51  ;;  %v7853_v14 = vpop.f32.mrb[55].mxu0  ;;  %6276 = vmatprep.mubr.msk.f32.mxu1 %vm2921_vm10, %v5367_v36  ;;  %v248_v36 = vld [vmem:[%s9072_s1 + $0x338] sm:$0xff] }
 0x1c9   :  { %9083 = vst [vmem:[#allocation7_spill] sm:$0xff] %v7853_v14  ;;  %v1156_v0 = vpop.permute.xlu1 %1155  ;;  %6277 = vmatmul.mubr.msk.f32.gmra.mrb[32].mxu1 %vm2921_vm10, %v5368_v26  ;;  %v1153_v55 = vpop.permute.xlu0 %1152  ;;  %v247_v26 = vld [vmem:[%s9072_s1 + $0x330] sm:$0xff] }
 0x1ca   :  { %vm1464_vm15 = vcmp.eq.s32.totalorder %v6723_v17, %v1156_v0  ;;  %vm1463_vm1 = vcmp.eq.s32.totalorder %v6723_v17, %v1153_v55  ;;  %1347 = vperm.xlu1 %6472, %v246_v49   ;;  %1344 = vperm.xlu0 %6471, %v245_v41  }
 0x1cb   :  { %v5370_v11 = vsel %vm1464_vm15, 1.0, %v9075_v22  ;;  %v5369_v19 = vsel %vm1463_vm1, 1.0, %v9075_v22  ;;  %v7861_v51 = vpop.f32.mrb[56].mxu0 }
 0x1cc   :  { %9084 = vst [vmem:[#allocation8_spill] sm:$0xff] %v7861_v51  ;;  %v7869_v14 = vpop.f32.mrb[57].mxu0  ;;  %6279 = vmatprep.mubr.msk.f32.mxu1 %vm2921_vm10, %v5369_v19  ;;  %v250_v19 = vld [vmem:[%s9072_s1 + $0x348] sm:$0xff] }
 0x1cd   :  { %9085 = vst [vmem:[#allocation9_spill] sm:$0xff] %v7869_v14  ;;  %v1162_v49 = vpop.permute.xlu1 %1161  ;;  %6280 = vmatmul.mubr.msk.f32.gmra.mrb[34].mxu1 %vm2921_vm10, %v5370_v11  ;;  %v1159_v41 = vpop.permute.xlu0 %1158  ;;  %v249_v11 = vld [vmem:[%s9072_s1 + $0x340] sm:$0xff] }
 0x1ce   :  { %vm1466_vm2 = vcmp.eq.s32.totalorder %v6723_v17, %v1162_v49  ;;  %vm1465_vm3 = vcmp.eq.s32.totalorder %v6723_v17, %v1159_v41  ;;  %1353 = vperm.xlu1 %6472, %v248_v36   ;;  %1350 = vperm.xlu0 %6471, %v247_v26  }
 0x1cf   :  { %v5372_v0 = vsel %vm1466_vm2, 1.0, %v9075_v22  ;;  %v5371_v55 = vsel %vm1465_vm3, 1.0, %v9075_v22  ;;  %v7877_v51 = vpop.f32.mrb[58].mxu0 }
 0x1d0   :  { %9086 = vst [vmem:[#allocation10_spill] sm:$0xff] %v7877_v51  ;;  %v7885_v14 = vpop.f32.mrb[59].mxu0  ;;  %6282 = vmatprep.mubr.msk.f32.mxu1 %vm2921_vm10, %v5371_v55  ;;  %v252_v55 = vld [vmem:[%s9072_s1 + $0x358] sm:$0xff] }
 0x1d1   :  { %9087 = vst [vmem:[#allocation11_spill] sm:$0xff] %v7885_v14  ;;  %v1168_v36 = vpop.permute.xlu1 %1167  ;;  %6283 = vmatmul.mubr.msk.f32.gmra.mrb[36].mxu1 %vm2921_vm10, %v5372_v0  ;;  %v1165_v26 = vpop.permute.xlu0 %1164  ;;  %v251_v0 = vld [vmem:[%s9072_s1 + $0x350] sm:$0xff] }
 0x1d2   :  { %vm1468_vm4 = vcmp.eq.s32.totalorder %v6723_v17, %v1168_v36  ;;  %vm1467_vm5 = vcmp.eq.s32.totalorder %v6723_v17, %v1165_v26  ;;  %1359 = vperm.xlu1 %6472, %v250_v19   ;;  %1356 = vperm.xlu0 %6471, %v249_v11  }
 0x1d3   :  { %v5374_v49 = vsel %vm1468_vm4, 1.0, %v9075_v22  ;;  %v5373_v41 = vsel %vm1467_vm5, 1.0, %v9075_v22  ;;  %v7893_v51 = vpop.f32.mrb[60].mxu0 }
 0x1d4   :  { %9088 = vst [vmem:[#allocation12_spill] sm:$0xff] %v7893_v51  ;;  %v7901_v14 = vpop.f32.mrb[61].mxu0  ;;  %6285 = vmatprep.mubr.msk.f32.mxu1 %vm2921_vm10, %v5373_v41  ;;  %v254_v41 = vld [vmem:[%s9072_s1 + $0x368] sm:$0xff] }
 0x1d5   :  { %9089 = vst [vmem:[#allocation13_spill] sm:$0xff] %v7901_v14  ;;  %v1174_v19 = vpop.permute.xlu1 %1173  ;;  %6286 = vmatmul.mubr.msk.f32.gmra.mrb[38].mxu1 %vm2921_vm10, %v5374_v49  ;;  %v1171_v11 = vpop.permute.xlu0 %1170  ;;  %v253_v49 = vld [vmem:[%s9072_s1 + $0x360] sm:$0xff] }
 0x1d6   :  { %vm1470_vm6 = vcmp.eq.s32.totalorder %v6723_v17, %v1174_v19  ;;  %vm1469_vm7 = vcmp.eq.s32.totalorder %v6723_v17, %v1171_v11  ;;  %1365 = vperm.xlu1 %6472, %v252_v55   ;;  %1362 = vperm.xlu0 %6471, %v251_v0  }
 0x1d7   :  { %v5376_v36 = vsel %vm1470_vm6, 1.0, %v9075_v22  ;;  %v5375_v26 = vsel %vm1469_vm7, 1.0, %v9075_v22  ;;  %v7909_v51 = vpop.f32.mrb[62].mxu0 }
 0x1d8   :  { %9090 = vst [vmem:[#allocation14_spill] sm:$0xff] %v7909_v51  ;;  %v7917_v14 = vpop.f32.mrb[63].mxu0  ;;  %6288 = vmatprep.mubr.msk.f32.mxu1 %vm2921_vm10, %v5375_v26  ;;  %v256_v26 = vld [vmem:[%s9072_s1 + $0x378] sm:$0xff] }
 0x1d9   :  { %9091 = vst [vmem:[#allocation15_spill] sm:$0xff] %v7917_v14  ;;  %v1180_v55 = vpop.permute.xlu1 %1179  ;;  %6289 = vmatmul.mubr.msk.f32.gmra.mrb[40].mxu1 %vm2921_vm10, %v5376_v36  ;;  %v1177_v0 = vpop.permute.xlu0 %1176  ;;  %v255_v36 = vld [vmem:[%s9072_s1 + $0x370] sm:$0xff] }
 0x1da   :  { %vm1472_vm8 = vcmp.eq.s32.totalorder %v6723_v17, %v1180_v55  ;;  %vm1471_vm9 = vcmp.eq.s32.totalorder %v6723_v17, %v1177_v0  ;;  %1371 = vperm.xlu1 %6472, %v254_v41   ;;  %1368 = vperm.xlu0 %6471, %v253_v49  }
 0x1db   :  { %v5378_v19 = vsel %vm1472_vm8, 1.0, %v9075_v22  ;;  %v5377_v11 = vsel %vm1471_vm9, 1.0, %v9075_v22  ;;  %v7925_v51 = vpop.f32.mrb[64].mxu0 }
 0x1dc   :  { %9092 = vst [vmem:[#allocation16_spill] sm:$0xff] %v7925_v51  ;;  %v7933_v14 = vpop.f32.mrb[65].mxu0  ;;  %6291 = vmatprep.mubr.msk.f32.mxu1 %vm2921_vm10, %v5377_v11  ;;  %v258_v11 = vld [vmem:[%s9072_s1 + $0x388] sm:$0xff] }
 0x1dd   :  { %9093 = vst [vmem:[#allocation17_spill] sm:$0xff] %v7933_v14  ;;  %v1186_v41 = vpop.permute.xlu1 %1185  ;;  %6292 = vmatmul.mubr.msk.f32.gmra.mrb[42].mxu1 %vm2921_vm10, %v5378_v19  ;;  %v1183_v49 = vpop.permute.xlu0 %1182  ;;  %v257_v19 = vld [vmem:[%s9072_s1 + $0x380] sm:$0xff] }
 0x1de   :  { %vm1474_vm11 = vcmp.eq.s32.totalorder %v6723_v17, %v1186_v41  ;;  %vm1473_vm12 = vcmp.eq.s32.totalorder %v6723_v17, %v1183_v49  ;;  %1377 = vperm.xlu1 %6472, %v256_v26   ;;  %1374 = vperm.xlu0 %6471, %v255_v36  }
 0x1df   :  { %v5380_v55 = vsel %vm1474_vm11, 1.0, %v9075_v22  ;;  %v5379_v0 = vsel %vm1473_vm12, 1.0, %v9075_v22  ;;  %v7941_v51 = vpop.f32.mrb[66].mxu0 }
 0x1e0   :  { %9094 = vst [vmem:[#allocation18_spill] sm:$0xff] %v7941_v51  ;;  %v7949_v14 = vpop.f32.mrb[67].mxu0  ;;  %6294 = vmatprep.mubr.msk.f32.mxu1 %vm2921_vm10, %v5379_v0  ;;  %v260_v0 = vld [vmem:[%s9072_s1 + $0x398] sm:$0xff] }
 0x1e1   :  { %9095 = vst [vmem:[#allocation19_spill] sm:$0xff] %v7949_v14  ;;  %v1192_v26 = vpop.permute.xlu1 %1191  ;;  %6295 = vmatmul.mubr.msk.f32.gmra.mrb[44].mxu1 %vm2921_vm10, %v5380_v55  ;;  %v1189_v36 = vpop.permute.xlu0 %1188  ;;  %v259_v55 = vld [vmem:[%s9072_s1 + $0x390] sm:$0xff] }
 0x1e2   :  { %vm1476_vm13 = vcmp.eq.s32.totalorder %v6723_v17, %v1192_v26  ;;  %vm1475_vm0 = vcmp.eq.s32.totalorder %v6723_v17, %v1189_v36  ;;  %1383 = vperm.xlu1 %6472, %v258_v11   ;;  %1380 = vperm.xlu0 %6471, %v257_v19  }
 0x1e3   :  { %v5382_v41 = vsel %vm1476_vm13, 1.0, %v9075_v22  ;;  %v5381_v49 = vsel %vm1475_vm0, 1.0, %v9075_v22  ;;  %v7957_v51 = vpop.f32.mrb[68].mxu0 }
 0x1e4   :  { %9096 = vst [vmem:[#allocation20_spill] sm:$0xff] %v7957_v51  ;;  %v7965_v14 = vpop.f32.mrb[69].mxu0  ;;  %6297 = vmatprep.mubr.msk.f32.mxu1 %vm2921_vm10, %v5381_v49  ;;  %v262_v49 = vld [vmem:[%s9072_s1 + $0x3a8] sm:$0xff] }
 0x1e5   :  { %9097 = vst [vmem:[#allocation21_spill] sm:$0xff] %v7965_v14  ;;  %v1198_v11 = vpop.permute.xlu1 %1197  ;;  %6298 = vmatmul.mubr.msk.f32.gmra.mrb[46].mxu1 %vm2921_vm10, %v5382_v41  ;;  %v1195_v19 = vpop.permute.xlu0 %1194  ;;  %v261_v41 = vld [vmem:[%s9072_s1 + $0x3a0] sm:$0xff] }
 0x1e6   :  { %vm1478_vm14 = vcmp.eq.s32.totalorder %v6723_v17, %v1198_v11  ;;  %vm1477_vm15 = vcmp.eq.s32.totalorder %v6723_v17, %v1195_v19  ;;  %1389 = vperm.xlu1 %6472, %v260_v0   ;;  %1386 = vperm.xlu0 %6471, %v259_v55  }
 0x1e7   :  { %v5384_v26 = vsel %vm1478_vm14, 1.0, %v9075_v22  ;;  %v5383_v36 = vsel %vm1477_vm15, 1.0, %v9075_v22  ;;  %v7973_v51 = vpop.f32.mrb[70].mxu0 }
 0x1e8   :  { %9098 = vst [vmem:[#allocation22_spill] sm:$0xff] %v7973_v51  ;;  %v7981_v14 = vpop.f32.mrb[71].mxu0  ;;  %6300 = vmatprep.mubr.msk.f32.mxu1 %vm2921_vm10, %v5383_v36  ;;  %v264_v36 = vld [vmem:[%s9072_s1 + $0x3b8] sm:$0xff] }
 0x1e9   :  { %9099 = vst [vmem:[#allocation23_spill] sm:$0xff] %v7981_v14  ;;  %v1204_v0 = vpop.permute.xlu1 %1203  ;;  %6301 = vmatmul.mubr.msk.f32.gmra.mrb[48].mxu1 %vm2921_vm10, %v5384_v26  ;;  %v1201_v55 = vpop.permute.xlu0 %1200  ;;  %v263_v26 = vld [vmem:[%s9072_s1 + $0x3b0] sm:$0xff] }
 0x1ea   :  { %vm1480_vm1 = vcmp.eq.s32.totalorder %v6723_v17, %v1204_v0  ;;  %vm1479_vm2 = vcmp.eq.s32.totalorder %v6723_v17, %v1201_v55  ;;  %1395 = vperm.xlu1 %6472, %v262_v49   ;;  %1392 = vperm.xlu0 %6471, %v261_v41  }
 0x1eb   :  { %v5386_v11 = vsel %vm1480_vm1, 1.0, %v9075_v22  ;;  %v5385_v19 = vsel %vm1479_vm2, 1.0, %v9075_v22  ;;  %v7989_v51 = vpop.f32.mrb[72].mxu0 }
 0x1ec   :  { %9100 = vst [vmem:[#allocation24_spill] sm:$0xff] %v7989_v51  ;;  %v7997_v14 = vpop.f32.mrb[73].mxu0  ;;  %6303 = vmatprep.mubr.msk.f32.mxu1 %vm2921_vm10, %v5385_v19  ;;  %v266_v19 = vld [vmem:[%s9072_s1 + $0x3c8] sm:$0xff] }
 0x1ed   :  { %9101 = vst [vmem:[#allocation25_spill] sm:$0xff] %v7997_v14  ;;  %v1210_v49 = vpop.permute.xlu1 %1209  ;;  %6304 = vmatmul.mubr.msk.f32.gmra.mrb[50].mxu1 %vm2921_vm10, %v5386_v11  ;;  %v1207_v41 = vpop.permute.xlu0 %1206  ;;  %v265_v11 = vld [vmem:[%s9072_s1 + $0x3c0] sm:$0xff] }
 0x1ee   :  { %vm1482_vm3 = vcmp.eq.s32.totalorder %v6723_v17, %v1210_v49  ;;  %vm1481_vm4 = vcmp.eq.s32.totalorder %v6723_v17, %v1207_v41  ;;  %1401 = vperm.xlu1 %6472, %v264_v36   ;;  %1398 = vperm.xlu0 %6471, %v263_v26  }
 0x1ef   :  { %v5388_v0 = vsel %vm1482_vm3, 1.0, %v9075_v22  ;;  %v5387_v55 = vsel %vm1481_vm4, 1.0, %v9075_v22  ;;  %v8005_v51 = vpop.f32.mrb[74].mxu0 }
 0x1f0   :  { %9102 = vst [vmem:[#allocation26_spill] sm:$0xff] %v8005_v51  ;;  %v8013_v14 = vpop.f32.mrb[75].mxu0  ;;  %6306 = vmatprep.mubr.msk.f32.mxu1 %vm2921_vm10, %v5387_v55  ;;  %v268_v55 = vld [vmem:[%s9072_s1 + $0x3d8] sm:$0xff] }
 0x1f1   :  { %9103 = vst [vmem:[#allocation27_spill] sm:$0xff] %v8013_v14  ;;  %v1216_v36 = vpop.permute.xlu1 %1215  ;;  %6307 = vmatmul.mubr.msk.f32.gmra.mrb[52].mxu1 %vm2921_vm10, %v5388_v0  ;;  %v1213_v26 = vpop.permute.xlu0 %1212  ;;  %v267_v0 = vld [vmem:[%s9072_s1 + $0x3d0] sm:$0xff] }
 0x1f2   :  { %vm1484_vm5 = vcmp.eq.s32.totalorder %v6723_v17, %v1216_v36  ;;  %vm1483_vm6 = vcmp.eq.s32.totalorder %v6723_v17, %v1213_v26  ;;  %1407 = vperm.xlu1 %6472, %v266_v19   ;;  %1404 = vperm.xlu0 %6471, %v265_v11  }
 0x1f3   :  { %v5390_v49 = vsel %vm1484_vm5, 1.0, %v9075_v22  ;;  %v5389_v41 = vsel %vm1483_vm6, 1.0, %v9075_v22  ;;  %v8021_v51 = vpop.f32.mrb[76].mxu0 }
 0x1f4   :  { %9104 = vst [vmem:[#allocation28_spill] sm:$0xff] %v8021_v51  ;;  %v8029_v14 = vpop.f32.mrb[77].mxu0  ;;  %6309 = vmatprep.mubr.msk.f32.mxu1 %vm2921_vm10, %v5389_v41  ;;  %v270_v41 = vld [vmem:[%s9072_s1 + $0x3e8] sm:$0xff] }
 0x1f5   :  { %9105 = vst [vmem:[#allocation29_spill] sm:$0xff] %v8029_v14  ;;  %v1222_v19 = vpop.permute.xlu1 %1221  ;;  %6310 = vmatmul.mubr.msk.f32.gmra.mrb[54].mxu1 %vm2921_vm10, %v5390_v49  ;;  %v1219_v11 = vpop.permute.xlu0 %1218  ;;  %v269_v49 = vld [vmem:[%s9072_s1 + $0x3e0] sm:$0xff] }
 0x1f6   :  { %vm1486_vm7 = vcmp.eq.s32.totalorder %v6723_v17, %v1222_v19  ;;  %vm1485_vm8 = vcmp.eq.s32.totalorder %v6723_v17, %v1219_v11  ;;  %1413 = vperm.xlu1 %6472, %v268_v55   ;;  %1410 = vperm.xlu0 %6471, %v267_v0  }
 0x1f7   :  { %v5392_v36 = vsel %vm1486_vm7, 1.0, %v9075_v22  ;;  %v5391_v26 = vsel %vm1485_vm8, 1.0, %v9075_v22  ;;  %v8037_v51 = vpop.f32.mrb[78].mxu0 }
 0x1f8   :  { %9106 = vst [vmem:[#allocation30_spill] sm:$0xff] %v8037_v51  ;;  %v8045_v14 = vpop.f32.mrb[79].mxu0  ;;  %6312 = vmatprep.mubr.msk.f32.mxu1 %vm2921_vm10, %v5391_v26  ;;  %v272_v26 = vld [vmem:[%s9072_s1 + $0x3f8] sm:$0xff] }
 0x1f9   :  { %9107 = vst [vmem:[#allocation31_spill] sm:$0xff] %v8045_v14  ;;  %v1228_v55 = vpop.permute.xlu1 %1227  ;;  %6313 = vmatmul.mubr.msk.f32.gmra.mrb[56].mxu1 %vm2921_vm10, %v5392_v36  ;;  %v1225_v0 = vpop.permute.xlu0 %1224  ;;  %v271_v36 = vld [vmem:[%s9072_s1 + $0x3f0] sm:$0xff] }
 0x1fa   :  { %vm1488_vm9 = vcmp.eq.s32.totalorder %v6723_v17, %v1228_v55  ;;  %vm1487_vm11 = vcmp.eq.s32.totalorder %v6723_v17, %v1225_v0  ;;  %1419 = vperm.xlu1 %6472, %v270_v41   ;;  %1416 = vperm.xlu0 %6471, %v269_v49  }
 0x1fb   :  { %v5394_v19 = vsel %vm1488_vm9, 1.0, %v9075_v22  ;;  %v5393_v11 = vsel %vm1487_vm11, 1.0, %v9075_v22  ;;  %v8053_v51 = vpop.f32.mrb[80].mxu0 }
 0x1fc   :  { %9108 = vst [vmem:[#allocation32_spill] sm:$0xff] %v8053_v51  ;;  %v8061_v14 = vpop.f32.mrb[81].mxu0  ;;  %6315 = vmatprep.mubr.msk.f32.mxu1 %vm2921_vm10, %v5393_v11 }
 0x1fd   :  { %9109 = vst [vmem:[#allocation33_spill] sm:$0xff] %v8061_v14  ;;  %v1234_v41 = vpop.permute.xlu1 %1233  ;;  %6316 = vmatmul.mubr.msk.f32.gmra.mrb[58].mxu1 %vm2921_vm10, %v5394_v19  ;;  %v1231_v49 = vpop.permute.xlu0 %1230 }
 0x1fe   :  { %vm1490_vm12 = vcmp.eq.s32.totalorder %v6723_v17, %v1234_v41  ;;  %vm1489_vm13 = vcmp.eq.s32.totalorder %v6723_v17, %v1231_v49  ;;  %1425 = vperm.xlu1 %6472, %v272_v26   ;;  %1422 = vperm.xlu0 %6471, %v271_v36  }
 0x1ff   :  { %v5396_v55 = vsel %vm1490_vm12, 1.0, %v9075_v22  ;;  %v5395_v0 = vsel %vm1489_vm13, 1.0, %v9075_v22  ;;  %v8069_v51 = vpop.f32.mrb[82].mxu0 }
 0x200   :  { %9110 = vst [vmem:[#allocation34_spill] sm:$0xff] %v8069_v51  ;;  %v8071_v21 = vpop.f32.mrb[83].mxu0  ;;  %6318 = vmatprep.mubr.msk.f32.mxu1 %vm2921_vm10, %v5395_v0 }
 0x201   :  { %9111 = vst [vmem:[#allocation35_spill] sm:$0xff] %v8071_v21  ;;  %v1240_v11 = vpop.permute.xlu1 %1239  ;;  %6319 = vmatmul.mubr.msk.f32.gmra.mrb[60].mxu1 %vm2921_vm10, %v5396_v55  ;;  %v1237_v19 = vpop.permute.xlu0 %1236 }
 0x202   :  { %vm1492_vm0 = vcmp.eq.s32.totalorder %v6723_v17, %v1240_v11  ;;  %vm1491_vm14 = vcmp.eq.s32.totalorder %v6723_v17, %v1237_v19 }
 0x203   :  { %v5398_v26 = vsel %vm1492_vm0, 1.0, %v9075_v22  ;;  %v5397_v36 = vsel %vm1491_vm14, 1.0, %v9075_v22  ;;  %v8079_v41 = vpop.f32.mrb[84].mxu0 }
 0x204   :  { %9112 = vst [vmem:[#allocation36_spill] sm:$0xff] %v8079_v41  ;;  %v8081_v49 = vpop.f32.mrb[85].mxu0  ;;  %6321 = vmatprep.mubr.msk.f32.mxu1 %vm2921_vm10, %v5397_v36 }
 0x205   :  { %9113 = vst [vmem:[#allocation37_spill] sm:$0xff] %v8081_v49  ;;  %v1246_v21 = vpop.permute.xlu1 %1245  ;;  %6322 = vmatmul.mubr.msk.f32.gmra.mrb[62].mxu1 %vm2921_vm10, %v5398_v26  ;;  %v1243_v0 = vpop.permute.xlu0 %1242 }
 0x206   :  { %vm1494_vm15 = vcmp.eq.s32.totalorder %v6723_v17, %v1246_v21  ;;  %vm1493_vm1 = vcmp.eq.s32.totalorder %v6723_v17, %v1243_v0 }
 0x207   :  { %v5400_v55 = vsel %vm1494_vm15, 1.0, %v9075_v22  ;;  %v5399_v11 = vsel %vm1493_vm1, 1.0, %v9075_v22  ;;  %v8089_v19 = vpop.f32.mrb[86].mxu0 }
 0x208   :  { %9114 = vst [vmem:[#allocation38_spill] sm:$0xff] %v8089_v19  ;;  %v8091_v51 = vpop.f32.mrb[87].mxu0  ;;  %6324 = vmatprep.mubr.msk.f32.mxu1 %vm2921_vm10, %v5399_v11 }
 0x209   :  { %9115 = vst [vmem:[#allocation39_spill] sm:$0xff] %v8091_v51  ;;  %v1252_v49 = vpop.permute.xlu1 %1251  ;;  %6325 = vmatmul.mubr.msk.f32.gmra.mrb[64].mxu1 %vm2921_vm10, %v5400_v55  ;;  %v1249_v36 = vpop.permute.xlu0 %1248 }
 0x20a   :  { %vm1496_vm2 = vcmp.eq.s32.totalorder %v6723_v17, %v1252_v49  ;;  %vm1495_vm3 = vcmp.eq.s32.totalorder %v6723_v17, %v1249_v36 }
 0x20b   :  { %v5402_v21 = vsel %vm1496_vm2, 1.0, %v9075_v22  ;;  %v5401_v26 = vsel %vm1495_vm3, 1.0, %v9075_v22  ;;  %v8099_v0 = vpop.f32.mrb[88].mxu0 }
 0x20c   :  { %9116 = vst [vmem:[#allocation40_spill] sm:$0xff] %v8099_v0  ;;  %v8101_v41 = vpop.f32.mrb[89].mxu0  ;;  %6327 = vmatprep.mubr.msk.f32.mxu1 %vm2921_vm10, %v5401_v26 }
 0x20d   :  { %9117 = vst [vmem:[#allocation41_spill] sm:$0xff] %v8101_v41  ;;  %v1258_v51 = vpop.permute.xlu1 %1257  ;;  %6328 = vmatmul.mubr.msk.f32.gmra.mrb[66].mxu1 %vm2921_vm10, %v5402_v21  ;;  %v1255_v11 = vpop.permute.xlu0 %1254 }
 0x20e   :  { %vm1498_vm4 = vcmp.eq.s32.totalorder %v6723_v17, %v1258_v51  ;;  %vm1497_vm5 = vcmp.eq.s32.totalorder %v6723_v17, %v1255_v11 }
 0x20f   :  { %v5404_v49 = vsel %vm1498_vm4, 1.0, %v9075_v22  ;;  %v5403_v55 = vsel %vm1497_vm5, 1.0, %v9075_v22  ;;  %v8109_v36 = vpop.f32.mrb[90].mxu0 }
 0x210   :  { %9118 = vst [vmem:[#allocation42_spill] sm:$0xff] %v8109_v36  ;;  %v8111_v19 = vpop.f32.mrb[91].mxu0  ;;  %6330 = vmatprep.mubr.msk.f32.mxu1 %vm2921_vm10, %v5403_v55 }
 0x211   :  { %9119 = vst [vmem:[#allocation43_spill] sm:$0xff] %v8111_v19  ;;  %v1264_v41 = vpop.permute.xlu1 %1263  ;;  %6331 = vmatmul.mubr.msk.f32.gmra.mrb[68].mxu1 %vm2921_vm10, %v5404_v49  ;;  %v1261_v26 = vpop.permute.xlu0 %1260 }
 0x212   :  { %vm1500_vm6 = vcmp.eq.s32.totalorder %v6723_v17, %v1264_v41  ;;  %vm1499_vm7 = vcmp.eq.s32.totalorder %v6723_v17, %v1261_v26 }
 0x213   :  { %v5406_v51 = vsel %vm1500_vm6, 1.0, %v9075_v22  ;;  %v5405_v21 = vsel %vm1499_vm7, 1.0, %v9075_v22  ;;  %v8119_v11 = vpop.f32.mrb[92].mxu0 }
 0x214   :  { %9120 = vst [vmem:[#allocation44_spill] sm:$0xff] %v8119_v11  ;;  %v8121_v0 = vpop.f32.mrb[93].mxu0  ;;  %6333 = vmatprep.mubr.msk.f32.mxu1 %vm2921_vm10, %v5405_v21 }
 0x215   :  { %9121 = vst [vmem:[#allocation45_spill] sm:$0xff] %v8121_v0  ;;  %v1270_v19 = vpop.permute.xlu1 %1269  ;;  %6334 = vmatmul.mubr.msk.f32.gmra.mrb[70].mxu1 %vm2921_vm10, %v5406_v51  ;;  %v1267_v55 = vpop.permute.xlu0 %1266 }
 0x216   :  { %vm1502_vm8 = vcmp.eq.s32.totalorder %v6723_v17, %v1270_v19  ;;  %vm1501_vm9 = vcmp.eq.s32.totalorder %v6723_v17, %v1267_v55 }
 0x217   :  { %v5408_v41 = vsel %vm1502_vm8, 1.0, %v9075_v22  ;;  %v5407_v49 = vsel %vm1501_vm9, 1.0, %v9075_v22  ;;  %v8129_v26 = vpop.f32.mrb[94].mxu0 }
 0x218   :  { %9122 = vst [vmem:[#allocation46_spill] sm:$0xff] %v8129_v26  ;;  %v8131_v36 = vpop.f32.mrb[95].mxu0  ;;  %6336 = vmatprep.mubr.msk.f32.mxu1 %vm2921_vm10, %v5407_v49 }
 0x219   :  { %9123 = vst [vmem:[#allocation47_spill] sm:$0xff] %v8131_v36  ;;  %v1276_v0 = vpop.permute.xlu1 %1275  ;;  %6337 = vmatmul.mubr.msk.f32.gmra.mrb[72].mxu1 %vm2921_vm10, %v5408_v41  ;;  %v1273_v21 = vpop.permute.xlu0 %1272 }
 0x21a   :  { %vm1504_vm11 = vcmp.eq.s32.totalorder %v6723_v17, %v1276_v0  ;;  %vm1503_vm12 = vcmp.eq.s32.totalorder %v6723_v17, %v1273_v21 }
 0x21b   :  { %v5410_v19 = vsel %vm1504_vm11, 1.0, %v9075_v22  ;;  %v5409_v51 = vsel %vm1503_vm12, 1.0, %v9075_v22  ;;  %v8139_v55 = vpop.f32.mrb[96].mxu0 }
 0x21c   :  { %9124 = vst [vmem:[#allocation48_spill] sm:$0xff] %v8139_v55  ;;  %v8141_v11 = vpop.f32.mrb[97].mxu0  ;;  %6339 = vmatprep.mubr.msk.f32.mxu1 %vm2921_vm10, %v5409_v51 }
 0x21d   :  { %9125 = vst [vmem:[#allocation49_spill] sm:$0xff] %v8141_v11  ;;  %v1282_v36 = vpop.permute.xlu1 %1281  ;;  %6340 = vmatmul.mubr.msk.f32.gmra.mrb[74].mxu1 %vm2921_vm10, %v5410_v19  ;;  %v1279_v49 = vpop.permute.xlu0 %1278 }
 0x21e   :  { %vm1506_vm13 = vcmp.eq.s32.totalorder %v6723_v17, %v1282_v36  ;;  %vm1505_vm0 = vcmp.eq.s32.totalorder %v6723_v17, %v1279_v49 }
 0x21f   :  { %v5412_v0 = vsel %vm1506_vm13, 1.0, %v9075_v22  ;;  %v5411_v41 = vsel %vm1505_vm0, 1.0, %v9075_v22  ;;  %v8149_v21 = vpop.f32.mrb[98].mxu0 }
 0x220   :  { %9126 = vst [vmem:[#allocation50_spill] sm:$0xff] %v8149_v21  ;;  %v8151_v26 = vpop.f32.mrb[99].mxu0  ;;  %6342 = vmatprep.mubr.msk.f32.mxu1 %vm2921_vm10, %v5411_v41 }
 0x221   :  { %9127 = vst [vmem:[#allocation51_spill] sm:$0xff] %v8151_v26  ;;  %v1288_v11 = vpop.permute.xlu1 %1287  ;;  %6343 = vmatmul.mubr.msk.f32.gmra.mrb[76].mxu1 %vm2921_vm10, %v5412_v0  ;;  %v1285_v51 = vpop.permute.xlu0 %1284 }
 0x222   :  { %vm1508_vm14 = vcmp.eq.s32.totalorder %v6723_v17, %v1288_v11  ;;  %vm1507_vm15 = vcmp.eq.s32.totalorder %v6723_v17, %v1285_v51 }
 0x223   :  { %v5414_v36 = vsel %vm1508_vm14, 1.0, %v9075_v22  ;;  %v5413_v19 = vsel %vm1507_vm15, 1.0, %v9075_v22  ;;  %v8159_v49 = vpop.f32.mrb[100].mxu0 }
 0x224   :  { %9128 = vst [vmem:[#allocation52_spill] sm:$0xff] %v8159_v49  ;;  %v8161_v55 = vpop.f32.mrb[101].mxu0  ;;  %6345 = vmatprep.mubr.msk.f32.mxu1 %vm2921_vm10, %v5413_v19 }
 0x225   :  { %9129 = vst [vmem:[#allocation53_spill] sm:$0xff] %v8161_v55  ;;  %v1294_v26 = vpop.permute.xlu1 %1293  ;;  %6346 = vmatmul.mubr.msk.f32.gmra.mrb[78].mxu1 %vm2921_vm10, %v5414_v36  ;;  %v1291_v41 = vpop.permute.xlu0 %1290 }
 0x226   :  { %vm1510_vm1 = vcmp.eq.s32.totalorder %v6723_v17, %v1294_v26  ;;  %vm1509_vm2 = vcmp.eq.s32.totalorder %v6723_v17, %v1291_v41 }
 0x227   :  { %v5416_v11 = vsel %vm1510_vm1, 1.0, %v9075_v22  ;;  %v5415_v0 = vsel %vm1509_vm2, 1.0, %v9075_v22  ;;  %v8169_v51 = vpop.f32.mrb[102].mxu0 }
 0x228   :  { %9130 = vst [vmem:[#allocation54_spill] sm:$0xff] %v8169_v51  ;;  %v8171_v21 = vpop.f32.mrb[103].mxu0  ;;  %6348 = vmatprep.mubr.msk.f32.mxu1 %vm2921_vm10, %v5415_v0 }
 0x229   :  { %9131 = vst [vmem:[#allocation55_spill] sm:$0xff] %v8171_v21  ;;  %v1300_v55 = vpop.permute.xlu1 %1299  ;;  %6349 = vmatmul.mubr.msk.f32.gmra.mrb[80].mxu1 %vm2921_vm10, %v5416_v11  ;;  %v1297_v19 = vpop.permute.xlu0 %1296 }
 0x22a   :  { %vm1512_vm3 = vcmp.eq.s32.totalorder %v6723_v17, %v1300_v55  ;;  %vm1511_vm4 = vcmp.eq.s32.totalorder %v6723_v17, %v1297_v19 }
 0x22b   :  { %v5418_v26 = vsel %vm1512_vm3, 1.0, %v9075_v22  ;;  %v5417_v36 = vsel %vm1511_vm4, 1.0, %v9075_v22  ;;  %v8179_v41 = vpop.f32.mrb[104].mxu0 }
 0x22c   :  { %9132 = vst [vmem:[#allocation56_spill] sm:$0xff] %v8179_v41  ;;  %v8181_v49 = vpop.f32.mrb[105].mxu0  ;;  %6351 = vmatprep.mubr.msk.f32.mxu1 %vm2921_vm10, %v5417_v36 }
 0x22d   :  { %9133 = vst [vmem:[#allocation57_spill] sm:$0xff] %v8181_v49  ;;  %v1306_v21 = vpop.permute.xlu1 %1305  ;;  %6352 = vmatmul.mubr.msk.f32.gmra.mrb[82].mxu1 %vm2921_vm10, %v5418_v26  ;;  %v1303_v0 = vpop.permute.xlu0 %1302 }
 0x22e   :  { %vm1514_vm5 = vcmp.eq.s32.totalorder %v6723_v17, %v1306_v21  ;;  %vm1513_vm6 = vcmp.eq.s32.totalorder %v6723_v17, %v1303_v0 }
 0x22f   :  { %v5420_v55 = vsel %vm1514_vm5, 1.0, %v9075_v22  ;;  %v5419_v11 = vsel %vm1513_vm6, 1.0, %v9075_v22  ;;  %v8189_v19 = vpop.f32.mrb[106].mxu0 }
 0x230   :  { %9134 = vst [vmem:[#allocation58_spill] sm:$0xff] %v8189_v19  ;;  %v8191_v51 = vpop.f32.mrb[107].mxu0  ;;  %6354 = vmatprep.mubr.msk.f32.mxu1 %vm2921_vm10, %v5419_v11 }
 0x231   :  { %9135 = vst [vmem:[#allocation59_spill] sm:$0xff] %v8191_v51  ;;  %v1312_v49 = vpop.permute.xlu1 %1311  ;;  %6355 = vmatmul.mubr.msk.f32.gmra.mrb[84].mxu1 %vm2921_vm10, %v5420_v55  ;;  %v1309_v36 = vpop.permute.xlu0 %1308 }
 0x232   :  { %vm1516_vm7 = vcmp.eq.s32.totalorder %v6723_v17, %v1312_v49  ;;  %vm1515_vm8 = vcmp.eq.s32.totalorder %v6723_v17, %v1309_v36 }
 0x233   :  { %v5422_v21 = vsel %vm1516_vm7, 1.0, %v9075_v22  ;;  %v5421_v26 = vsel %vm1515_vm8, 1.0, %v9075_v22  ;;  %v8199_v0 = vpop.f32.mrb[108].mxu0 }
 0x234   :  { %9136 = vst [vmem:[#allocation60_spill] sm:$0xff] %v8199_v0  ;;  %v8201_v41 = vpop.f32.mrb[109].mxu0  ;;  %6357 = vmatprep.mubr.msk.f32.mxu1 %vm2921_vm10, %v5421_v26 }
 0x235   :  { %9137 = vst [vmem:[#allocation61_spill] sm:$0xff] %v8201_v41  ;;  %v1318_v51 = vpop.permute.xlu1 %1317  ;;  %6358 = vmatmul.mubr.msk.f32.gmra.mrb[86].mxu1 %vm2921_vm10, %v5422_v21  ;;  %v1315_v11 = vpop.permute.xlu0 %1314 }
 0x236   :  { %vm1518_vm9 = vcmp.eq.s32.totalorder %v6723_v17, %v1318_v51  ;;  %vm1517_vm11 = vcmp.eq.s32.totalorder %v6723_v17, %v1315_v11 }
 0x237   :  { %v5424_v49 = vsel %vm1518_vm9, 1.0, %v9075_v22  ;;  %v5423_v55 = vsel %vm1517_vm11, 1.0, %v9075_v22  ;;  %v8209_v36 = vpop.f32.mrb[110].mxu0 }
 0x238   :  { %9138 = vst [vmem:[#allocation62_spill] sm:$0xff] %v8209_v36  ;;  %v8211_v19 = vpop.f32.mrb[111].mxu0  ;;  %6360 = vmatprep.mubr.msk.f32.mxu1 %vm2921_vm10, %v5423_v55 }
 0x239   :  { %9139 = vst [vmem:[#allocation63_spill] sm:$0xff] %v8211_v19  ;;  %v1324_v41 = vpop.permute.xlu1 %1323  ;;  %6361 = vmatmul.mubr.msk.f32.gmra.mrb[88].mxu1 %vm2921_vm10, %v5424_v49  ;;  %v1321_v26 = vpop.permute.xlu0 %1320 }
 0x23a   :  { %vm1520_vm12 = vcmp.eq.s32.totalorder %v6723_v17, %v1324_v41  ;;  %vm1519_vm13 = vcmp.eq.s32.totalorder %v6723_v17, %v1321_v26 }
 0x23b   :  { %v5426_v51 = vsel %vm1520_vm12, 1.0, %v9075_v22  ;;  %v5425_v21 = vsel %vm1519_vm13, 1.0, %v9075_v22  ;;  %v8219_v11 = vpop.f32.mrb[112].mxu0 }
 0x23c   :  { %9140 = vst [vmem:[#allocation64_spill] sm:$0xff] %v8219_v11  ;;  %v8221_v0 = vpop.f32.mrb[113].mxu0  ;;  %6363 = vmatprep.mubr.msk.f32.mxu1 %vm2921_vm10, %v5425_v21 }
 0x23d   :  { %9141 = vst [vmem:[#allocation65_spill] sm:$0xff] %v8221_v0  ;;  %v1330_v19 = vpop.permute.xlu1 %1329  ;;  %6364 = vmatmul.mubr.msk.f32.gmra.mrb[90].mxu1 %vm2921_vm10, %v5426_v51  ;;  %v1327_v55 = vpop.permute.xlu0 %1326 }
 0x23e   :  { %vm1522_vm0 = vcmp.eq.s32.totalorder %v6723_v17, %v1330_v19  ;;  %vm1521_vm14 = vcmp.eq.s32.totalorder %v6723_v17, %v1327_v55 }
 0x23f   :  { %v5428_v41 = vsel %vm1522_vm0, 1.0, %v9075_v22  ;;  %v5427_v49 = vsel %vm1521_vm14, 1.0, %v9075_v22  ;;  %v8229_v26 = vpop.f32.mrb[114].mxu0 }
 0x240   :  { %9142 = vst [vmem:[#allocation66_spill] sm:$0xff] %v8229_v26  ;;  %v8231_v36 = vpop.f32.mrb[115].mxu0  ;;  %6366 = vmatprep.mubr.msk.f32.mxu1 %vm2921_vm10, %v5427_v49 }
 0x241   :  { %9143 = vst [vmem:[#allocation67_spill] sm:$0xff] %v8231_v36  ;;  %v1336_v0 = vpop.permute.xlu1 %1335  ;;  %6367 = vmatmul.mubr.msk.f32.gmra.mrb[92].mxu1 %vm2921_vm10, %v5428_v41  ;;  %v1333_v21 = vpop.permute.xlu0 %1332 }
 0x242   :  { %vm1524_vm15 = vcmp.eq.s32.totalorder %v6723_v17, %v1336_v0  ;;  %vm1523_vm1 = vcmp.eq.s32.totalorder %v6723_v17, %v1333_v21 }
 0x243   :  { %v5430_v19 = vsel %vm1524_vm15, 1.0, %v9075_v22  ;;  %v5429_v51 = vsel %vm1523_vm1, 1.0, %v9075_v22  ;;  %v8239_v55 = vpop.f32.mrb[116].mxu0 }
 0x244   :  { %9144 = vst [vmem:[#allocation68_spill] sm:$0xff] %v8239_v55  ;;  %v8241_v11 = vpop.f32.mrb[117].mxu0  ;;  %6369 = vmatprep.mubr.msk.f32.mxu1 %vm2921_vm10, %v5429_v51 }
 0x245   :  { %9145 = vst [vmem:[#allocation69_spill] sm:$0xff] %v8241_v11  ;;  %v1342_v36 = vpop.permute.xlu1 %1341  ;;  %6370 = vmatmul.mubr.msk.f32.gmra.mrb[94].mxu1 %vm2921_vm10, %v5430_v19  ;;  %v1339_v49 = vpop.permute.xlu0 %1338 }
 0x246   :  { %vm1526_vm2 = vcmp.eq.s32.totalorder %v6723_v17, %v1342_v36  ;;  %vm1525_vm3 = vcmp.eq.s32.totalorder %v6723_v17, %v1339_v49 }
 0x247   :  { %v5432_v0 = vsel %vm1526_vm2, 1.0, %v9075_v22  ;;  %v5431_v41 = vsel %vm1525_vm3, 1.0, %v9075_v22  ;;  %v8249_v21 = vpop.f32.mrb[118].mxu0 }
 0x248   :  { %9146 = vst [vmem:[#allocation70_spill] sm:$0xff] %v8249_v21  ;;  %v8251_v26 = vpop.f32.mrb[119].mxu0  ;;  %6372 = vmatprep.mubr.msk.f32.mxu1 %vm2921_vm10, %v5431_v41 }
 0x249   :  { %9147 = vst [vmem:[#allocation71_spill] sm:$0xff] %v8251_v26  ;;  %v1348_v11 = vpop.permute.xlu1 %1347  ;;  %6373 = vmatmul.mubr.msk.f32.gmra.mrb[96].mxu1 %vm2921_vm10, %v5432_v0  ;;  %v1345_v51 = vpop.permute.xlu0 %1344 }
 0x24a   :  { %vm1528_vm4 = vcmp.eq.s32.totalorder %v6723_v17, %v1348_v11  ;;  %vm1527_vm5 = vcmp.eq.s32.totalorder %v6723_v17, %v1345_v51 }
 0x24b   :  { %v5434_v36 = vsel %vm1528_vm4, 1.0, %v9075_v22  ;;  %v5433_v19 = vsel %vm1527_vm5, 1.0, %v9075_v22  ;;  %v8259_v49 = vpop.f32.mrb[120].mxu0 }
 0x24c   :  { %9148 = vst [vmem:[#allocation72_spill] sm:$0xff] %v8259_v49  ;;  %v8261_v55 = vpop.f32.mrb[121].mxu0  ;;  %6375 = vmatprep.mubr.msk.f32.mxu1 %vm2921_vm10, %v5433_v19 }
 0x24d   :  { %9149 = vst [vmem:[#allocation73_spill] sm:$0xff] %v8261_v55  ;;  %v1354_v26 = vpop.permute.xlu1 %1353  ;;  %6376 = vmatmul.mubr.msk.f32.gmra.mrb[98].mxu1 %vm2921_vm10, %v5434_v36  ;;  %v1351_v41 = vpop.permute.xlu0 %1350 }
 0x24e   :  { %vm1530_vm6 = vcmp.eq.s32.totalorder %v6723_v17, %v1354_v26  ;;  %vm1529_vm7 = vcmp.eq.s32.totalorder %v6723_v17, %v1351_v41 }
 0x24f   :  { %v5436_v11 = vsel %vm1530_vm6, 1.0, %v9075_v22  ;;  %v5435_v0 = vsel %vm1529_vm7, 1.0, %v9075_v22  ;;  %v8269_v51 = vpop.f32.mrb[122].mxu0 }
 0x250   :  { %9150 = vst [vmem:[#allocation74_spill] sm:$0xff] %v8269_v51  ;;  %v8271_v21 = vpop.f32.mrb[123].mxu0  ;;  %6378 = vmatprep.mubr.msk.f32.mxu1 %vm2921_vm10, %v5435_v0 }
 0x251   :  { %9151 = vst [vmem:[#allocation75_spill] sm:$0xff] %v8271_v21  ;;  %v1360_v55 = vpop.permute.xlu1 %1359  ;;  %6379 = vmatmul.mubr.msk.f32.gmra.mrb[100].mxu1 %vm2921_vm10, %v5436_v11  ;;  %v1357_v19 = vpop.permute.xlu0 %1356 }
 0x252   :  { %vm1532_vm8 = vcmp.eq.s32.totalorder %v6723_v17, %v1360_v55  ;;  %vm1531_vm9 = vcmp.eq.s32.totalorder %v6723_v17, %v1357_v19 }
 0x253   :  { %v5438_v26 = vsel %vm1532_vm8, 1.0, %v9075_v22  ;;  %v5437_v36 = vsel %vm1531_vm9, 1.0, %v9075_v22  ;;  %v8279_v41 = vpop.f32.mrb[124].mxu0 }
 0x254   :  { %9152 = vst [vmem:[#allocation76_spill] sm:$0xff] %v8279_v41  ;;  %v8281_v49 = vpop.f32.mrb[125].mxu0  ;;  %6381 = vmatprep.mubr.msk.f32.mxu1 %vm2921_vm10, %v5437_v36 }
 0x255   :  { %9153 = vst [vmem:[#allocation77_spill] sm:$0xff] %v8281_v49  ;;  %v1366_v21 = vpop.permute.xlu1 %1365  ;;  %6382 = vmatmul.mubr.msk.f32.gmra.mrb[102].mxu1 %vm2921_vm10, %v5438_v26  ;;  %v1363_v0 = vpop.permute.xlu0 %1362 }
 0x256   :  { %vm1534_vm11 = vcmp.eq.s32.totalorder %v6723_v17, %v1366_v21  ;;  %vm1533_vm12 = vcmp.eq.s32.totalorder %v6723_v17, %v1363_v0 }
 0x257   :  { %v5440_v55 = vsel %vm1534_vm11, 1.0, %v9075_v22  ;;  %v5439_v11 = vsel %vm1533_vm12, 1.0, %v9075_v22  ;;  %v8289_v19 = vpop.f32.mrb[126].mxu0 }
 0x258   :  { %9154 = vst [vmem:[#allocation78_spill] sm:$0xff] %v8289_v19  ;;  %v8291_v51 = vpop.f32.mrb[127].mxu0  ;;  %6384 = vmatprep.mubr.msk.f32.mxu1 %vm2921_vm10, %v5439_v11 }
 0x259   :  { %9155 = vst [vmem:[#allocation79_spill] sm:$0xff] %v8291_v51  ;;  %v1372_v49 = vpop.permute.xlu1 %1371  ;;  %6385 = vmatmul.mubr.msk.f32.gmra.mrb[104].mxu1 %vm2921_vm10, %v5440_v55  ;;  %v1369_v36 = vpop.permute.xlu0 %1368 }
 0x25a   :  { %vm1536_vm13 = vcmp.eq.s32.totalorder %v6723_v17, %v1372_v49  ;;  %vm1535_vm0 = vcmp.eq.s32.totalorder %v6723_v17, %v1369_v36 }
 0x25b   :  { %v5442_v21 = vsel %vm1536_vm13, 1.0, %v9075_v22  ;;  %v5441_v26 = vsel %vm1535_vm0, 1.0, %v9075_v22  ;;  %v6227_v0 = vpop.f32.mrb[128].mxu0 }
 0x25c   :  { %v8300_v41 = vmul.f32 %v6227_v0, %v7410_v58  ;;  %v3372_v19 = vpop.f32.mrb[129].mxu0  ;;  %v6230_v51 = vpop.f32.mrb[0].mxu1  ;;  %6387 = vmatprep.mubr.msk.f32.mxu1 %vm2921_vm10, %v5441_v26  ;;  %v9156_v58 = vmov 0.0  }
 0x25d   :  { %v8304_v11 = vmul.f32 %v3372_v19, %v7419_v61  ;;  %v4014_v55 = vmul.f32 %v6230_v51, %v7426_v2  ;;  %v1378_v49 = vpop.permute.xlu1 %1377  ;;  %v3382_v14 = vpop.f32.mrb[1].mxu1  ;;  %6388 = vmatmul.mubr.msk.f32.gmra.mrb[106].mxu1 %vm2921_vm10, %v5442_v21 }
 0x25e   :  { %vm1538_vm14 = vcmp.eq.s32.totalorder %v6723_v17, %v1378_v49  ;;  %v4013_v36 = vmul.f32 %v3382_v14, %v7435_v5  ;;  %v1375_v22 = vpop.permute.xlu0 %1374 }
 0x25f   :  { %v5444_v0 = vsel %vm1538_vm14, 1.0, %v9156_v58  ;;  %vm1537_vm15 = vcmp.eq.s32.totalorder %v6723_v17, %v1375_v22 }
 0x260   :  { %v5443_v26 = vsel %vm1537_vm15, 1.0, %v9156_v58  ;;  %v6233_v1 = vpop.f32.mrb[2].mxu1  ;;  %4143 = vadd.xlane.f32.xlu0 %v4013_v36 }
 0x261   :  { %v4016_v61 = vmul.f32 %v6233_v1, %v7442_v10  ;;  %6390 = vmatprep.mubr.msk.f32.mxu1 %vm2921_vm10, %v5443_v26  ;;  %v1384_v2 = vpop.permute.xlu1 %1383  ;;  %v3392_v51 = vpop.f32.mrb[3].mxu1 }
 0x262   :  { %vm1540_vm1 = vcmp.eq.s32.totalorder %v6723_v17, %v1384_v2  ;;  %v4015_v19 = vmul.f32 %v3392_v51, %v7451_v13  ;;  %6391 = vmatmul.mubr.msk.f32.gmra.mrb[108].mxu1 %vm2921_vm10, %v5444_v0  ;;  %v1381_v14 = vpop.permute.xlu0 %1380 }
 0x263   :  { %v5446_v5 = vsel %vm1540_vm1, 1.0, %v9156_v58  ;;  %vm1539_vm2 = vcmp.eq.s32.totalorder %v6723_v17, %v1381_v14 }
 0x264   :  { %v5445_v22 = vsel %vm1539_vm2, 1.0, %v9156_v58  ;;  %4147 = vadd.xlane.f32.xlu1 %v4015_v19  ;;  %v6236_v21 = vpop.f32.mrb[4].mxu1  ;;  %4145 = vadd.xlane.f32.xlu0 %v4014_v55  ;;  %vm4539_vm2 = vcmask 195712  }
 0x265   :  { %v4018_v10 = vmul.f32 %v6236_v21, %v7458_v20  ;;  %6393 = vmatprep.mubr.msk.f32.mxu1 %vm2921_vm10, %v5445_v22  ;;  %v1390_v1 = vpop.permute.xlu1 %1389  ;;  %v3402_v49 = vpop.f32.mrb[5].mxu1 }
 0x266   :  { %vm1542_vm3 = vcmp.eq.s32.totalorder %v6723_v17, %v1390_v1  ;;  %v4017_v13 = vmul.f32 %v3402_v49, %v7467_v24  ;;  %6394 = vmatmul.mubr.msk.f32.gmra.mrb[110].mxu1 %vm2921_vm10, %v5446_v5  ;;  %v1387_v36 = vpop.permute.xlu0 %1386 }
 0x267   :  { %v5448_v0 = vsel %vm1542_vm3, 1.0, %v9156_v58  ;;  %vm1541_vm4 = vcmp.eq.s32.totalorder %v6723_v17, %v1387_v36  ;;  %vm4546_vm3 = vcmask 261312  }
 0x268   :  { %v5447_v26 = vsel %vm1541_vm4, 1.0, %v9156_v58  ;;  %4151 = vadd.xlane.f32.xlu1 %v4017_v13  ;;  %v6239_v55 = vpop.f32.mrb[6].mxu1  ;;  %4149 = vadd.xlane.f32.xlu0 %v4016_v61  ;;  %vm4553_vm4 = vcmask 326912  }
 0x269   :  { %v4020_v20 = vmul.f32 %v6239_v55, %v7474_v29  ;;  %6396 = vmatprep.mubr.msk.f32.mxu1 %vm2921_vm10, %v5447_v26  ;;  %v1396_v2 = vpop.permute.xlu1 %1395  ;;  %v3412_v51 = vpop.f32.mrb[7].mxu1 }
 0x26a   :  { %vm1544_vm5 = vcmp.eq.s32.totalorder %v6723_v17, %v1396_v2  ;;  %v4019_v24 = vmul.f32 %v3412_v51, %v7483_v32  ;;  %6397 = vmatmul.mubr.msk.f32.gmra.mrb[112].mxu1 %vm2921_vm10, %v5448_v0  ;;  %v1393_v19 = vpop.permute.xlu0 %1392 }
 0x26b   :  { %v5450_v14 = vsel %vm1544_vm5, 1.0, %v9156_v58  ;;  %vm1543_vm6 = vcmp.eq.s32.totalorder %v6723_v17, %v1393_v19  ;;  %vm4560_vm5 = vcmask 392512  }
 0x26c   :  { %v5449_v5 = vsel %vm1543_vm6, 1.0, %v9156_v58  ;;  %4155 = vadd.xlane.f32.xlu1 %v4019_v24  ;;  %v6242_v61 = vpop.f32.mrb[8].mxu1  ;;  %4153 = vadd.xlane.f32.xlu0 %v4018_v10  ;;  %vm4567_vm6 = vcmask 458112  }
 0x26d   :  { %v4022_v29 = vmul.f32 %v6242_v61, %v7490_v37  ;;  %6399 = vmatprep.mubr.msk.f32.mxu1 %vm2921_vm10, %v5449_v5  ;;  %v1402_v22 = vpop.permute.xlu1 %1401  ;;  %v3422_v21 = vpop.f32.mrb[9].mxu1 }
 0x26e   :  { %vm1546_vm7 = vcmp.eq.s32.totalorder %v6723_v17, %v1402_v22  ;;  %v4021_v32 = vmul.f32 %v3422_v21, %v7499_v40  ;;  %6400 = vmatmul.mubr.msk.f32.gmra.mrb[114].mxu1 %vm2921_vm10, %v5450_v14  ;;  %v1399_v1 = vpop.permute.xlu0 %1398 }
 0x26f   :  { %v5452_v49 = vsel %vm1546_vm7, 1.0, %v9156_v58  ;;  %vm1545_vm8 = vcmp.eq.s32.totalorder %v6723_v17, %v1399_v1  ;;  %vm4574_vm7 = vcmask 523712  }
 0x270   :  { %v5451_v13 = vsel %vm1545_vm8, 1.0, %v9156_v58  ;;  %4159 = vadd.xlane.f32.xlu1 %v4021_v32  ;;  %v6245_v10 = vpop.f32.mrb[10].mxu1  ;;  %4157 = vadd.xlane.f32.xlu0 %v4020_v20  ;;  %vm4581_vm8 = vcmask 589312  }
 0x271   :  { %v4024_v37 = vmul.f32 %v6245_v10, %v7506_v45  ;;  %6402 = vmatprep.mubr.msk.f32.mxu1 %vm2921_vm10, %v5451_v13  ;;  %v1408_v36 = vpop.permute.xlu1 %1407  ;;  %v3432_v0 = vpop.f32.mrb[11].mxu1 }
 0x272   :  { %vm1548_vm9 = vcmp.eq.s32.totalorder %v6723_v17, %v1408_v36  ;;  %v4023_v40 = vmul.f32 %v3432_v0, %v7515_v48  ;;  %6403 = vmatmul.mubr.msk.f32.gmra.mrb[116].mxu1 %vm2921_vm10, %v5452_v49  ;;  %v1405_v26 = vpop.permute.xlu0 %1404 }
 0x273   :  { %v5454_v55 = vsel %vm1548_vm9, 1.0, %v9156_v58  ;;  %vm1547_vm11 = vcmp.eq.s32.totalorder %v6723_v17, %v1405_v26  ;;  %vm4588_vm9 = vcmask 654912  }
 0x274   :  { %v5453_v2 = vsel %vm1547_vm11, 1.0, %v9156_v58  ;;  %4163 = vadd.xlane.f32.xlu1 %v4023_v40  ;;  %v6248_v20 = vpop.f32.mrb[12].mxu1  ;;  %4161 = vadd.xlane.f32.xlu0 %v4022_v29  ;;  %vm4595_vm11 = vcmask 720512  }
 0x275   :  { %v4026_v45 = vmul.f32 %v6248_v20, %v7522_v53  ;;  %6405 = vmatprep.mubr.msk.f32.mxu1 %vm2921_vm10, %v5453_v2  ;;  %v1414_v51 = vpop.permute.xlu1 %1413  ;;  %v3442_v24 = vpop.f32.mrb[13].mxu1 }
 0x276   :  { %vm1550_vm12 = vcmp.eq.s32.totalorder %v6723_v17, %v1414_v51  ;;  %v4025_v48 = vmul.f32 %v3442_v24, %v7531_v56  ;;  %6406 = vmatmul.mubr.msk.f32.gmra.mrb[118].mxu1 %vm2921_vm10, %v5454_v55  ;;  %v1411_v19 = vpop.permute.xlu0 %1410 }
 0x277   :  { %v5456_v14 = vsel %vm1550_vm12, 1.0, %v9156_v58  ;;  %vm1549_vm13 = vcmp.eq.s32.totalorder %v6723_v17, %v1411_v19  ;;  %vm4602_vm12 = vcmask 786112  }
 0x278   :  { %v5455_v5 = vsel %vm1549_vm13, 1.0, %v9156_v58  ;;  %4167 = vadd.xlane.f32.xlu1 %v4025_v48  ;;  %v6251_v61 = vpop.f32.mrb[14].mxu1  ;;  %4165 = vadd.xlane.f32.xlu0 %v4024_v37  ;;  %vm4609_vm13 = vcmask 851712  }
 0x279   :  { %v4028_v53 = vmul.f32 %v6251_v61, %v7538_v63  ;;  %6408 = vmatprep.mubr.msk.f32.mxu1 %vm2921_vm10, %v5455_v5  ;;  %v1420_v29 = vpop.permute.xlu1 %1419  ;;  %v3452_v22 = vpop.f32.mrb[15].mxu1 }
 0x27a   :  { %vm1552_vm0 = vcmp.eq.s32.totalorder %v6723_v17, %v1420_v29  ;;  %v4027_v56 = vmul.f32 %v3452_v22, %v7547_v3  ;;  %6409 = vmatmul.mubr.msk.f32.gmra.mrb[120].mxu1 %vm2921_vm10, %v5456_v14  ;;  %v1417_v21 = vpop.permute.xlu0 %1416 }
 0x27b   :  { %v5458_v32 = vsel %vm1552_vm0, 1.0, %v9156_v58  ;;  %vm1551_vm14 = vcmp.eq.s32.totalorder %v6723_v17, %v1417_v21  ;;  %vm9077_vm0 = vcmask 917312  }
 0x27c   :  { %v5457_v1 = vsel %vm1551_vm14, 1.0, %v9156_v58  ;;  %4171 = vadd.xlane.f32.xlu1 %v4027_v56  ;;  %v6254_v49 = vpop.f32.mrb[16].mxu1  ;;  %4169 = vadd.xlane.f32.xlu0 %v4026_v45  ;;  %vm4623_vm14 = vcmask 982912  }
 0x27d   :  { %v4030_v63 = vmul.f32 %v6254_v49, %v7554_v9  ;;  %6411 = vmatprep.mubr.msk.f32.mxu1 %vm2921_vm10, %v5457_v1  ;;  %v1426_v13 = vpop.permute.xlu1 %1425  ;;  %v3462_v10 = vpop.f32.mrb[17].mxu1 }
 0x27e   :  { %vm1554_vm15 = vcmp.eq.s32.totalorder %v6723_v17, %v1426_v13  ;;  %v4029_v3 = vmul.f32 %v3462_v10, %v7563_v15  ;;  %6412 = vmatmul.mubr.msk.f32.gmra.mrb[122].mxu1 %vm2921_vm10, %v5458_v32  ;;  %v1423_v37 = vpop.permute.xlu0 %1422 }
 0x27f   :  { %v5460_v36 = vsel %vm1554_vm15, 1.0, %v9156_v58  ;;  %vm1553_vm1 = vcmp.eq.s32.totalorder %v6723_v17, %v1423_v37  ;;  %vm4630_vm15 = vcmask 1048512  }
 0x280   :  { %v5459_v0 = vsel %vm1553_vm1, 1.0, %v9156_v58  ;;  %4175 = vadd.xlane.f32.xlu1 %v4029_v3  ;;  %v6257_v40 = vpop.f32.mrb[18].mxu1  ;;  %4173 = vadd.xlane.f32.xlu0 %v4028_v53  ;;  %vm5185_vm1 = vcmask 1041409  }
 0x281   :  { %v4032_v9 = vmul.f32 %v6257_v40, %v7570_v23  ;;  %6414 = vmatprep.mubr.msk.f32.mxu1 %vm2921_vm10, %v5459_v0  ;;  %v3472_v26 = vpop.f32.mrb[19].mxu1 }
 0x282   :  { %v4031_v55 = vmul.f32 %v3472_v26, %v7579_v27  ;;  %6415 = vmatmul.mubr.msk.f32.gmra.mrb[124].mxu1 %vm2921_vm10, %v5460_v36  ;;  %vm4532_vm10 = vcmask 130112  }
 0x284   :  { %4179 = vadd.xlane.f32.xlu1 %v4031_v55  ;;  %v6260_v15 = vpop.f32.mrb[20].mxu1  ;;  %4177 = vadd.xlane.f32.xlu0 %v4030_v63 }
 0x285   :  { %v4034_v2 = vmul.f32 %v6260_v15, %v7587_v34  ;;  %v3482_v20 = vpop.f32.mrb[21].mxu1 }
 0x286   :  { %v4033_v58 = vmul.f32 %v3482_v20, %v7596_v39 }
 0x288   :  { %4183 = vadd.xlane.f32.xlu1 %v4033_v58  ;;  %v6263_v45 = vpop.f32.mrb[22].mxu1  ;;  %4181 = vadd.xlane.f32.xlu0 %v4032_v9 }
 0x289   :  { %v4036_v23 = vmul.f32 %v6263_v45, %v7605_v46  ;;  %v3492_v51 = vpop.f32.mrb[23].mxu1 }
 0x28a   :  { %v4035_v24 = vmul.f32 %v3492_v51, %v7613_v50 }
 0x28c   :  { %4187 = vadd.xlane.f32.xlu1 %v4035_v24  ;;  %v6266_v27 = vpop.f32.mrb[24].mxu1  ;;  %4185 = vadd.xlane.f32.xlu0 %v4034_v2  ;;  %v9158_v2 = vld [vmem:[#allocation3_spill] sm:$0xff] }
 0x28d   :  { %v4038_v48 = vmul.f32 %v6266_v27, %v7621_v57  ;;  %v3502_v19 = vpop.f32.mrb[25].mxu1 }
 0x28e   :  { %v4037_v14 = vmul.f32 %v3502_v19, %v7629_v62 }
 0x290   :  { %4191 = vadd.xlane.f32.xlu1 %v4037_v14  ;;  %v6269_v34 = vpop.f32.mrb[26].mxu1  ;;  %4189 = vadd.xlane.f32.xlu0 %v4036_v23  ;;  %v9160_v23 = vld [vmem:[#allocation5_spill] sm:$0xff] }
 0x291   :  { %v4040_v39 = vmul.f32 %v6269_v34, %v7637_v7  ;;  %v3512_v5 = vpop.f32.mrb[27].mxu1  ;;  %v9163_v34 = vld [vmem:[#allocation8_spill] sm:$0xff] }
 0x292   :  { %v4039_v61 = vmul.f32 %v3512_v5, %v7645_v12 }
 0x294   :  { %4195 = vadd.xlane.f32.xlu1 %v4039_v61  ;;  %v6272_v46 = vpop.f32.mrb[28].mxu1  ;;  %4193 = vadd.xlane.f32.xlu0 %v4038_v48  ;;  %v9162_v48 = vld [vmem:[#allocation7_spill] sm:$0xff]  ;;  %v9164_v61 = vld [vmem:[#allocation9_spill] sm:$0xff] }
 0x295   :  { %v4042_v50 = vmul.f32 %v6272_v46, %v7653_v25  ;;  %v3522_v53 = vpop.f32.mrb[29].mxu1 }
 0x296   :  { %v4041_v29 = vmul.f32 %v3522_v53, %v7661_v30  ;;  %v9165_v53 = vld [vmem:[#allocation10_spill] sm:$0xff] }
 0x298   :  { %4199 = vadd.xlane.f32.xlu1 %v4041_v29  ;;  %v6275_v57 = vpop.f32.mrb[30].mxu1  ;;  %4197 = vadd.xlane.f32.xlu0 %v4040_v39 }
 0x299   :  { %v4044_v62 = vmul.f32 %v6275_v57, %v7669_v38  ;;  %v3532_v22 = vpop.f32.mrb[31].mxu1 }
 0x29a   :  { %v4043_v56 = vmul.f32 %v3532_v22, %v7677_v43 }
 0x29c   :  { %4141 = vadd.xlane.f32.xlu1 %v8300_v41  ;;  %v6278_v7 = vpop.f32.mrb[32].mxu1  ;;  %4201 = vadd.xlane.f32.xlu0 %v4042_v50 }
 0x29d   :  { %v4046_v12 = vmul.f32 %v6278_v7, %v7685_v52  ;;  %v3542_v21 = vpop.f32.mrb[33].mxu1  ;;  %v9167_v7 = vld [vmem:[#allocation12_spill] sm:$0xff] }
 0x29e   :  { %v4045_v25 = vmul.f32 %v3542_v21, %v7693_v59 }
 0x2a0   :  { %4203 = vadd.xlane.f32.xlu1 %v4043_v56  ;;  %v6281_v32 = vpop.f32.mrb[34].mxu1  ;;  %4139 = vadd.xlane.f32.xlu0 %v8304_v11 }
 0x2a1   :  { %v4048_v30 = vmul.f32 %v6281_v32, %v7701_v6  ;;  %v3552_v1 = vpop.f32.mrb[35].mxu1 }
 0x2a2   :  { %v4047_v38 = vmul.f32 %v3552_v1, %v7709_v16  ;;  %v9169_v1 = vld [vmem:[#allocation14_spill] sm:$0xff] }
 0x2a4   :  { %4207 = vadd.xlane.f32.xlu1 %v4045_v25  ;;  %v6284_v43 = vpop.f32.mrb[36].mxu1  ;;  %4205 = vadd.xlane.f32.xlu0 %v4044_v62  ;;  %v9166_v62 = vld [vmem:[#allocation11_spill] sm:$0xff]  ;;  %v9168_v25 = vld [vmem:[#allocation13_spill] sm:$0xff] }
 0x2a5   :  { %v4050_v41 = vmul.f32 %v6284_v43, %v7717_v28  ;;  %v3562_v49 = vpop.f32.mrb[37].mxu1 }
 0x2a6   :  { %v4049_v52 = vmul.f32 %v3562_v49, %v7725_v35 }
 0x2a8   :  { %4211 = vadd.xlane.f32.xlu1 %v4047_v38  ;;  %v6287_v63 = vpop.f32.mrb[38].mxu1  ;;  %4209 = vadd.xlane.f32.xlu0 %v4046_v12 }
 0x2a9   :  { %v4052_v59 = vmul.f32 %v6287_v63, %v7733_v47  ;;  %v3572_v13 = vpop.f32.mrb[39].mxu1  ;;  %v9171_v63 = vld [vmem:[#allocation16_spill] sm:$0xff] }
 0x2aa   :  { %v4051_v11 = vmul.f32 %v3572_v13, %v7741_v54 }
 0x2ac   :  { %4215 = vadd.xlane.f32.xlu1 %v4049_v52  ;;  %v6290_v6 = vpop.f32.mrb[40].mxu1  ;;  %4213 = vadd.xlane.f32.xlu0 %v4048_v30 }
 0x2ad   :  { %v4054_v16 = vmul.f32 %v6290_v6, %v7749_v4  ;;  %v3582_v10 = vpop.f32.mrb[41].mxu1 }
 0x2ae   :  { %v4053_v3 = vmul.f32 %v3582_v10, %v7757_v18  ;;  %v9173_v10 = vld [vmem:[#allocation18_spill] sm:$0xff] }
 0x2b0   :  { %4219 = vadd.xlane.f32.xlu1 %v4051_v11  ;;  %v6293_v28 = vpop.f32.mrb[42].mxu1  ;;  %4217 = vadd.xlane.f32.xlu0 %v4050_v41  ;;  %v9170_v41 = vld [vmem:[#allocation15_spill] sm:$0xff]  ;;  %v9172_v11 = vld [vmem:[#allocation17_spill] sm:$0xff] }
 0x2b1   :  { %v4056_v35 = vmul.f32 %v6293_v28, %v7765_v33  ;;  %v3592_v37 = vpop.f32.mrb[43].mxu1 }
 0x2b2   :  { %v4055_v36 = vmul.f32 %v3592_v37, %v7773_v42  ;;  %v9157_v42 = vld [vmem:[#allocation2_spill] sm:$0xff] }
 0x2b4   :  { %4223 = vadd.xlane.f32.xlu1 %v4053_v3  ;;  %v6296_v47 = vpop.f32.mrb[44].mxu1  ;;  %4221 = vadd.xlane.f32.xlu0 %v4052_v59 }
 0x2b5   :  { %v4058_v54 = vmul.f32 %v6296_v47, %v7781_v60  ;;  %v3602_v0 = vpop.f32.mrb[45].mxu1  ;;  %v9175_v47 = vld [vmem:[#allocation20_spill] sm:$0xff] }
 0x2b6   :  { %v4057_v40 = vmul.f32 %v3602_v0, %v7789_v8  ;;  %v9159_v8 = vld [vmem:[#allocation4_spill] sm:$0xff] }
 0x2b8   :  { %4227 = vadd.xlane.f32.xlu1 %v4055_v36  ;;  %v6299_v4 = vpop.f32.mrb[46].mxu1  ;;  %4225 = vadd.xlane.f32.xlu0 %v4054_v16 }
 0x2b9   :  { %v4060_v18 = vmul.f32 %v6299_v4, %v7797_v31  ;;  %v3612_v9 = vpop.f32.mrb[47].mxu1 }
 0x2ba   :  { %v4059_v26 = vmul.f32 %v3612_v9, %v7805_v44  ;;  %v9161_v44 = vld [vmem:[#allocation6_spill] sm:$0xff] }
 0x2bb   :  { %v9177_v9 = vld [vmem:[#allocation22_spill] sm:$0xff] }
 0x2bc   :  { %4231 = vadd.xlane.f32.xlu1 %v4057_v40  ;;  %v6302_v33 = vpop.f32.mrb[48].mxu1  ;;  %4229 = vadd.xlane.f32.xlu0 %v4056_v35  ;;  %v9174_v35 = vld [vmem:[#allocation19_spill] sm:$0xff]  ;;  %v9176_v40 = vld [vmem:[#allocation21_spill] sm:$0xff] }
 0x2bd   :  { %v4062_v55 = vmul.f32 %v6302_v33, %v9157_v42  ;;  %v3622_v15 = vpop.f32.mrb[49].mxu1  ;;  %v9178_v42 = vld [vmem:[#allocation23_spill] sm:$0xff] }
 0x2be   :  { %v4061_v20 = vmul.f32 %v3622_v15, %v9158_v2  ;;  %v9179_v2 = vld [vmem:[#allocation24_spill] sm:$0xff] }
 0x2c0   :  { %4235 = vadd.xlane.f32.xlu1 %v4059_v26  ;;  %v6305_v60 = vpop.f32.mrb[50].mxu1  ;;  %4233 = vadd.xlane.f32.xlu0 %v4058_v54 }
 0x2c1   :  { %v4064_v58 = vmul.f32 %v6305_v60, %v9159_v8  ;;  %v3632_v45 = vpop.f32.mrb[51].mxu1  ;;  %v9180_v8 = vld [vmem:[#allocation25_spill] sm:$0xff] }
 0x2c2   :  { %v4063_v51 = vmul.f32 %v3632_v45, %v9160_v23  ;;  %v9181_v23 = vld [vmem:[#allocation26_spill] sm:$0xff] }
 0x2c4   :  { %4239 = vadd.xlane.f32.xlu1 %v4061_v20  ;;  %v6308_v31 = vpop.f32.mrb[52].mxu1  ;;  %4237 = vadd.xlane.f32.xlu0 %v4060_v18 }
 0x2c5   :  { %v4066_v24 = vmul.f32 %v6308_v31, %v9161_v44  ;;  %v3642_v27 = vpop.f32.mrb[53].mxu1 }
 0x2c6   :  { %v4065_v19 = vmul.f32 %v3642_v27, %v9162_v48 }
 0x2c8   :  { %4243 = vadd.xlane.f32.xlu1 %v4063_v51  ;;  %v6311_v14 = vpop.f32.mrb[54].mxu1  ;;  %4241 = vadd.xlane.f32.xlu0 %v4062_v55 }
 0x2c9   :  { %v4068_v39 = vmul.f32 %v6311_v14, %v9163_v34  ;;  %v3652_v5 = vpop.f32.mrb[55].mxu1 }
 0x2ca   :  { %v4067_v46 = vmul.f32 %v3652_v5, %v9164_v61  ;;  %v9184_v5 = vld [vmem:[#allocation29_spill] sm:$0xff] }
 0x2cc   :  { %4247 = vadd.xlane.f32.xlu1 %v4065_v19  ;;  %v6314_v50 = vpop.f32.mrb[56].mxu1  ;;  %4245 = vadd.xlane.f32.xlu0 %v4064_v58  ;;  %v9183_v19 = vld [vmem:[#allocation28_spill] sm:$0xff] }
 0x2cd   :  { %v4070_v29 = vmul.f32 %v6314_v50, %v9165_v53  ;;  %v3662_v57 = vpop.f32.mrb[57].mxu1  ;;  %v9185_v53 = vld [vmem:[#allocation30_spill] sm:$0xff] }
 0x2ce   :  { %v4069_v22 = vmul.f32 %v3662_v57, %v9166_v62 }
 0x2d0   :  { %4251 = vadd.xlane.f32.xlu1 %v4067_v46  ;;  %v6317_v56 = vpop.f32.mrb[58].mxu1  ;;  %4249 = vadd.xlane.f32.xlu0 %v4066_v24  ;;  %v9182_v24 = vld [vmem:[#allocation27_spill] sm:$0xff] }
 0x2d1   :  { %v4072_v12 = vmul.f32 %v6317_v56, %v9167_v7  ;;  %v3672_v21 = vpop.f32.mrb[59].mxu1 }
 0x2d2   :  { %v4071_v32 = vmul.f32 %v3672_v21, %v9168_v25  ;;  %v9187_v21 = vld [vmem:[#allocation32_spill] sm:$0xff] }
 0x2d4   :  { %4255 = vadd.xlane.f32.xlu1 %v4069_v22  ;;  %v6320_v30 = vpop.f32.mrb[60].mxu1  ;;  %4253 = vadd.xlane.f32.xlu0 %v4068_v39  ;;  %v9186_v22 = vld [vmem:[#allocation31_spill] sm:$0xff] }
 0x2d5   :  { %v4074_v38 = vmul.f32 %v6320_v30, %v9169_v1  ;;  %v3682_v43 = vpop.f32.mrb[61].mxu1  ;;  %v9188_v1 = vld [vmem:[#allocation33_spill] sm:$0xff] }
 0x2d6   :  { %v4073_v49 = vmul.f32 %v3682_v43, %v9170_v41 }
 0x2d8   :  { %4259 = vadd.xlane.f32.xlu1 %v4071_v32  ;;  %v6323_v52 = vpop.f32.mrb[62].mxu1  ;;  %4257 = vadd.xlane.f32.xlu0 %v4070_v29 }
 0x2d9   :  { %v4076_v59 = vmul.f32 %v6323_v52, %v9171_v63  ;;  %v3692_v13 = vpop.f32.mrb[63].mxu1 }
 0x2da   :  { %v4075_v6 = vmul.f32 %v3692_v13, %v9172_v11  ;;  %v9190_v13 = vld [vmem:[#allocation35_spill] sm:$0xff] }
 0x2dc   :  { %4263 = vadd.xlane.f32.xlu1 %v4073_v49  ;;  %v6326_v16 = vpop.f32.mrb[64].mxu1  ;;  %4261 = vadd.xlane.f32.xlu0 %v4072_v12  ;;  %v9189_v49 = vld [vmem:[#allocation34_spill] sm:$0xff] }
 0x2dd   :  { %v4078_v3 = vmul.f32 %v6326_v16, %v9173_v10  ;;  %v3702_v28 = vpop.f32.mrb[65].mxu1  ;;  %v9191_v10 = vld [vmem:[#allocation36_spill] sm:$0xff] }
 0x2de   :  { %v4077_v37 = vmul.f32 %v3702_v28, %v9174_v35 }
 0x2e0   :  { %4267 = vadd.xlane.f32.xlu1 %v4075_v6  ;;  %v6329_v36 = vpop.f32.mrb[66].mxu1  ;;  %4265 = vadd.xlane.f32.xlu0 %v4074_v38 }
 0x2e1   :  { %v4080_v54 = vmul.f32 %v6329_v36, %v9175_v47  ;;  %v3712_v0 = vpop.f32.mrb[67].mxu1 }
 0x2e2   :  { %v4079_v4 = vmul.f32 %v3712_v0, %v9176_v40  ;;  %v9193_v0 = vld [vmem:[#allocation38_spill] sm:$0xff] }
 0x2e4   :  { %4271 = vadd.xlane.f32.xlu1 %v4077_v37  ;;  %v6332_v18 = vpop.f32.mrb[68].mxu1  ;;  %4269 = vadd.xlane.f32.xlu0 %v4076_v59  ;;  %v9192_v37 = vld [vmem:[#allocation37_spill] sm:$0xff] }
 0x2e5   :  { %v4082_v26 = vmul.f32 %v6332_v18, %v9177_v9  ;;  %v3722_v33 = vpop.f32.mrb[69].mxu1  ;;  %v9195_v9 = vld [vmem:[#allocation39_spill] sm:$0xff] }
 0x2e6   :  { %v4081_v55 = vmul.f32 %v3722_v33, %v9178_v42 }
 0x2e8   :  { %4275 = vadd.xlane.f32.xlu1 %v4079_v4  ;;  %v6335_v15 = vpop.f32.mrb[70].mxu1  ;;  %4273 = vadd.xlane.f32.xlu0 %v4078_v3 }
 0x2e9   :  { %v4084_v20 = vmul.f32 %v6335_v15, %v9179_v2  ;;  %v3732_v60 = vpop.f32.mrb[71].mxu1 }
 0x2ea   :  { %v4083_v58 = vmul.f32 %v3732_v60, %v9180_v8  ;;  %v9199_v60 = vld [vmem:[#allocation41_spill] sm:$0xff] }
 0x2ec   :  { %4279 = vadd.xlane.f32.xlu1 %v4081_v55  ;;  %v6338_v45 = vpop.f32.mrb[72].mxu1  ;;  %4277 = vadd.xlane.f32.xlu0 %v4080_v54  ;;  %v9197_v55 = vld [vmem:[#allocation40_spill] sm:$0xff] }
 0x2ed   :  { %v4086_v51 = vmul.f32 %v6338_v45, %v9181_v23  ;;  %v3742_v31 = vpop.f32.mrb[73].mxu1  ;;  %v8436_v44 = vpop.xlane.xlu0 %4143  ;;  %v9201_v23 = vld [vmem:[#allocation42_spill] sm:$0xff] }
 0x2ee   :  { %v4085_v27 = vmul.f32 %v3742_v31, %v9182_v24 }
 0x2f0   :  { %4283 = vadd.xlane.f32.xlu1 %v4083_v58  ;;  %v6341_v48 = vpop.f32.mrb[74].mxu1  ;;  %4281 = vadd.xlane.f32.xlu0 %v4082_v26 }
 0x2f1   :  { %v4088_v14 = vmul.f32 %v6341_v48, %v9183_v19  ;;  %v8440_v34 = vpop.xlane.xlu1 %4147  ;;  %v3752_v39 = vpop.f32.mrb[75].mxu1 }
 0x2f2   :  { %v4087_v61 = vmul.f32 %v3752_v39, %v9184_v5  ;;  %v8443_v46 = vpop.xlane.xlu0 %4145  ;;  %v9205_v39 = vld [vmem:[#allocation44_spill] sm:$0xff] }
 0x2f4   :  { %4287 = vadd.xlane.f32.xlu1 %v4085_v27  ;;  %v6344_v50 = vpop.f32.mrb[76].mxu1  ;;  %4285 = vadd.xlane.f32.xlu0 %v4084_v20  ;;  %v9203_v27 = vld [vmem:[#allocation43_spill] sm:$0xff] }
 0x2f5   :  { %v4090_v29 = vmul.f32 %v6344_v50, %v9185_v53  ;;  %v8446_v57 = vpop.xlane.xlu1 %4151  ;;  %v3762_v62 = vpop.f32.mrb[77].mxu1  ;;  %v9207_v53 = vld [vmem:[#allocation45_spill] sm:$0xff] }
 0x2f6   :  { %v4089_v56 = vmul.f32 %v3762_v62, %v9186_v22  ;;  %v8449_v7 = vpop.xlane.xlu0 %4149 }
 0x2f8   :  { %4291 = vadd.xlane.f32.xlu1 %v4087_v61  ;;  %v6347_v12 = vpop.f32.mrb[78].mxu1  ;;  %4289 = vadd.xlane.f32.xlu0 %v4086_v51 }
 0x2f9   :  { %v4092_v25 = vmul.f32 %v6347_v12, %v9187_v21  ;;  %v8452_v32 = vpop.xlane.xlu1 %4155  ;;  %v3772_v30 = vpop.f32.mrb[79].mxu1 }
 0x2fa   :  { %v4091_v38 = vmul.f32 %v3772_v30, %v9188_v1  ;;  %v8455_v43 = vpop.xlane.xlu0 %4153  ;;  %v9211_v30 = vld [vmem:[#allocation47_spill] sm:$0xff] }
 0x2fc   :  { %4295 = vadd.xlane.f32.xlu1 %v4089_v56  ;;  %v6350_v41 = vpop.f32.mrb[80].mxu1  ;;  %4293 = vadd.xlane.f32.xlu0 %v4088_v14  ;;  %v9209_v56 = vld [vmem:[#allocation46_spill] sm:$0xff] }
 0x2fd   :  { %v4094_v52 = vmul.f32 %v6350_v41, %v9189_v49  ;;  %v8458_v63 = vpop.xlane.xlu1 %4159  ;;  %v3782_v59 = vpop.f32.mrb[81].mxu1  ;;  %v9213_v49 = vld [vmem:[#allocation48_spill] sm:$0xff] }
 0x2fe   :  { %v4093_v11 = vmul.f32 %v3782_v59, %v9190_v13  ;;  %v8461_v6 = vpop.xlane.xlu0 %4157 }
 0x300   :  { %4299 = vadd.xlane.f32.xlu1 %v4091_v38  ;;  %v6353_v16 = vpop.f32.mrb[82].mxu1  ;;  %4297 = vadd.xlane.f32.xlu0 %v4090_v29 }
 0x301   :  { %v8464_v3 = vmul.f32 %v6353_v16, %v9191_v10  ;;  %v8466_v28 = vpop.xlane.xlu1 %4163  ;;  %v3792_v35 = vpop.f32.mrb[83].mxu1  ;;  %v9214_v16 = vld [vmem:[#allocation49_spill] sm:$0xff] }
 0x302   :  { %v8469_v36 = vmul.f32 %v3792_v35, %v9192_v37  ;;  %v8471_v47 = vpop.xlane.xlu0 %4161 }
 0x304   :  { %4303 = vadd.xlane.f32.xlu1 %v4093_v11  ;;  %v6356_v54 = vpop.f32.mrb[84].mxu1  ;;  %4301 = vadd.xlane.f32.xlu0 %v4092_v25 }
 0x305   :  { %v8474_v40 = vmul.f32 %v6356_v54, %v9193_v0  ;;  %v8476_v4 = vpop.xlane.xlu1 %4167  ;;  %v3802_v18 = vpop.f32.mrb[85].mxu1  ;;  %v9215_v54 = vld [vmem:[#allocation50_spill] sm:$0xff] }
 0x306   :  { %v8479_v26 = vmul.f32 %v3802_v18, %v9195_v9  ;;  %v8481_v33 = vpop.xlane.xlu0 %4165 }
 0x307   :  { %9194 = vst [vmem:[#allocation2_spill] sm:$0xff] %v8474_v40 }
 0x308   :  { %9196 = vst [vmem:[#allocation3_spill] sm:$0xff] %v8479_v26  ;;  %v6359_v42 = vpop.f32.mrb[86].mxu1  ;;  %v9234_v26 = vld [vmem:[#allocation61_spill] sm:$0xff] }
 0x309   :  { %v8484_v15 = vmul.f32 %v6359_v42, %v9197_v55  ;;  %v8486_v2 = vpop.xlane.xlu1 %4171  ;;  %v3812_v20 = vpop.f32.mrb[87].mxu1  ;;  %v9216_v42 = vld [vmem:[#allocation51_spill] sm:$0xff] }
 0x30a   :  { %v8489_v8 = vmul.f32 %v3812_v20, %v9199_v60  ;;  %v8491_v58 = vpop.xlane.xlu0 %4169 }
 0x30b   :  { %9198 = vst [vmem:[#allocation4_spill] sm:$0xff] %v8484_v15 }
 0x30c   :  { %9200 = vst [vmem:[#allocation5_spill] sm:$0xff] %v8489_v8  ;;  %v6362_v45 = vpop.f32.mrb[88].mxu1 }
 0x30d   :  { %v8494_v51 = vmul.f32 %v6362_v45, %v9201_v23  ;;  %v8496_v31 = vpop.xlane.xlu1 %4175  ;;  %v3822_v24 = vpop.f32.mrb[89].mxu1  ;;  %v9217_v45 = vld [vmem:[#allocation52_spill] sm:$0xff] }
 0x30e   :  { %v8499_v48 = vmul.f32 %v3822_v24, %v9203_v27  ;;  %v8501_v19 = vpop.xlane.xlu0 %4173 }
 0x30f   :  { %9202 = vst [vmem:[#allocation6_spill] sm:$0xff] %v8494_v51 }
 0x310   :  { %9204 = vst [vmem:[#allocation7_spill] sm:$0xff] %v8499_v48  ;;  %v6365_v14 = vpop.f32.mrb[90].mxu1 }
 0x311   :  { %v8504_v5 = vmul.f32 %v6365_v14, %v9205_v39  ;;  %v8506_v61 = vpop.xlane.xlu1 %4179  ;;  %v3832_v50 = vpop.f32.mrb[91].mxu1  ;;  %v9219_v14 = vld [vmem:[#allocation53_spill] sm:$0xff] }
 0x312   :  { %v8509_v29 = vmul.f32 %v3832_v50, %v9207_v53  ;;  %v8511_v62 = vpop.xlane.xlu0 %4177 }
 0x313   :  { %9206 = vst [vmem:[#allocation8_spill] sm:$0xff] %v8504_v5  ;;  %v9227_v5 = vld [vmem:[#allocation57_spill] sm:$0xff] }
 0x314   :  { %9208 = vst [vmem:[#allocation9_spill] sm:$0xff] %v8509_v29  ;;  %v6368_v22 = vpop.f32.mrb[92].mxu1 }
 0x315   :  { %v8514_v12 = vmul.f32 %v6368_v22, %v9209_v56  ;;  %v8516_v21 = vpop.xlane.xlu1 %4183  ;;  %v3842_v25 = vpop.f32.mrb[93].mxu1  ;;  %v9220_v22 = vlaneseq }
 0x316   :  { %v8519_v1 = vmul.f32 %v3842_v25, %v9211_v30  ;;  %v8521_v38 = vpop.xlane.xlu0 %4181  ;;  %v9221_v25 = vld [vmem:[#allocation54_spill] sm:$0xff] }
 0x317   :  { %9210 = vst [vmem:[#allocation10_spill] sm:$0xff] %v8514_v12  ;;  %v8548_v56 = vshrl.u32 %v9220_v22, 7 }
 0x318   :  { %9212 = vst [vmem:[#allocation11_spill] sm:$0xff] %v8519_v1  ;;  %v6371_v41 = vpop.f32.mrb[94].mxu1 }
 0x319   :  { %v4108_v59 = vmul.f32 %v6371_v41, %v9213_v49  ;;  %v8524_v13 = vpop.xlane.xlu1 %4187  ;;  %v3852_v11 = vpop.f32.mrb[95].mxu1  ;;  %v4534_v49 = vadd.s32 4294967280, %v6723_v17 }
 0x31a   :  { %v4107_v10 = vmul.f32 %v3852_v11, %v9214_v16  ;;  %v8527_v35 = vpop.xlane.xlu0 %4185  ;;  %v4541_v11 = vadd.s32 4294967272, %v6723_v17  ;;  %v9223_v16 = vld [vmem:[#allocation55_spill] sm:$0xff] }
 0x31b   :  { %4333 = vadd.xlane.f32.xlu1 %v4108_v59  ;;  %v4548_v59 = vadd.s32 4294967264, %v6723_v17 }
 0x31c   :  { %v6374_v37 = vpop.f32.mrb[96].mxu1  ;;  %4331 = vadd.xlane.f32.xlu0 %v4107_v10  ;;  %v8580_v1 = vsub.s32 %v4541_v11, %v8548_v56 }
 0x31d   :  { %v8530_v0 = vmul.f32 %v6374_v37, %v9215_v54  ;;  %v8532_v18 = vpop.xlane.xlu1 %4191  ;;  %v3862_v9 = vpop.f32.mrb[97].mxu1  ;;  %v4562_v54 = vadd.s32 4294967248, %v6723_v17  ;;  %v8577_v12 = vsub.s32 %v4548_v59, %v8548_v56 }
 0x31e   :  { %v4109_v55 = vmul.f32 %v3862_v9, %v9216_v42  ;;  %v8535_v20 = vpop.xlane.xlu0 %4189  ;;  %v4555_v9 = vadd.s32 4294967256, %v6723_v17  ;;  %v4576_v42 = vadd.s32 4294967232, %v6723_v17 }
 0x31f   :  { %v8588_v48 = vsub.s32 %v4562_v54, %v8548_v56 }
 0x320   :  { %4335 = vadd.xlane.f32.xlu1 %v4109_v55  ;;  %v6377_v60 = vpop.f32.mrb[98].mxu1  ;;  %4305 = vadd.xlane.f32.xlu0 %v4094_v52  ;;  %v4569_v55 = vadd.s32 4294967240, %v6723_v17 }
 0x321   :  { %v8538_v23 = vmul.f32 %v6377_v60, %v9217_v45  ;;  %v8540_v24 = vpop.xlane.xlu1 %4195  ;;  %v3872_v27 = vpop.f32.mrb[99].mxu1  ;;  %v4590_v60 = vadd.s32 4294967216, %v6723_v17  ;;  %v4583_v45 = vadd.s32 4294967224, %v6723_v17 }
 0x322   :  { %v8543_v39 = vmul.f32 %v3872_v27, %v9219_v14  ;;  %v8545_v50 = vpop.xlane.xlu0 %4193  ;;  %v4527_v27 = vadd.s32 4294967288, %v6723_v17  ;;  %v8597_v59 = vsub.s32 %v4569_v55, %v8548_v56 }
 0x323   :  { %9218 = vst [vmem:[#allocation12_spill] sm:$0xff] %v8538_v23  ;;  %v8600_v11 = vsub.s32 %v4590_v60, %v8548_v56 }
 0x324   :  { %v6380_v53 = vpop.f32.mrb[100].mxu1  ;;  %v8607_v54 = vsub.s32 %v4527_v27, %v8548_v56 }
 0x325   :  { %v8551_v30 = vmul.f32 %v6380_v53, %v9221_v25  ;;  %v8553_v41 = vpop.xlane.xlu1 %4199  ;;  %v3882_v52 = vpop.f32.mrb[101].mxu1  ;;  %v9225_v53 = vld [vmem:[#allocation56_spill] sm:$0xff] }
 0x326   :  { %v8559_v10 = vmul.f32 %v3882_v52, %v9223_v16  ;;  %v8561_v37 = vpop.xlane.xlu0 %4197  ;;  %v8574_v16 = vsub.s32 %v4534_v49, %v8548_v56  ;;  %v8594_v49 = vsub.s32 %v4576_v42, %v8548_v56  ;;  %v9229_v42 = vld [vmem:[#allocation58_spill] sm:$0xff] }
 0x327   :  { %9222 = vst [vmem:[#allocation13_spill] sm:$0xff] %v8551_v30 }
 0x328   :  { %9224 = vst [vmem:[#allocation14_spill] sm:$0xff] %v8559_v10  ;;  %v6383_v14 = vpop.f32.mrb[102].mxu1  ;;  %v4538_v30 = vrot.slane %v8436_v44, %v8574_v16 }
 0x329   :  { %v8571_v22 = vmul.f32 %v6383_v14, %v9225_v53  ;;  %v4142_v25 = vpop.xlane.xlu1 %4141  ;;  %v3892_v52 = vpop.f32.mrb[103].mxu1  ;;  %v8591_v14 = vsub.s32 %v4555_v9, %v8548_v56  ;;  %v4604_v53 = vadd.s32 4294967200, %v6723_v17  ;;  %v8611_v9 = vsub.s32 %v6723_v17, %v8548_v56 }
 0x32a   :  { %v8583_v29 = vmul.f32 %v3892_v52, %v9227_v5  ;;  %v8585_v51 = vpop.xlane.xlu0 %4201  ;;  %v8603_v5 = vsub.s32 %v4583_v45, %v8548_v56  ;;  %v9231_v45 = vld [vmem:[#allocation59_spill] sm:$0xff]  ;;  %v4531_v15 = vrot.slane %v4142_v25, %v8607_v54 }
 0x32b   :  { %9226 = vst [vmem:[#allocation15_spill] sm:$0xff] %v8571_v22  ;;  %v4559_v25 = vrot.slane %v8449_v7, %v8591_v14  ;;  %v4644_v7 = vrot.slane %v8496_v31, %v8574_v16  ;;  %v4654_v31 = vrot.slane %v8506_v61, %v8577_v12 }
 0x32c   :  { %9228 = vst [vmem:[#allocation16_spill] sm:$0xff] %v8583_v29  ;;  %v6386_v52 = vpop.f32.mrb[104].mxu1 }
 0x32d   :  { %v8614_v55 = vmul.f32 %v6386_v52, %v9229_v42  ;;  %v4204_v60 = vpop.xlane.xlu1 %4203  ;;  %v3902_v22 = vpop.f32.mrb[105].mxu1  ;;  %v4552_v52 = vrot.slane %v8440_v34, %v8577_v12  ;;  %v4545_v42 = vrot.slane %v8443_v46, %v8580_v1  ;;  %v4635_v46 = vrot.slane %v8486_v2, %v8611_v9 }
 0x32e   :  { %v8617_v29 = vmul.f32 %v3902_v22, %v9231_v45  ;;  %v4140_v27 = vpop.xlane.xlu0 %4139  ;;  %v4639_v22 = vrot.slane %v8501_v19, %v8607_v54  ;;  %v4580_v2 = vrot.slane %v8452_v32, %v8594_v49 }
 0x32f   :  { %9230 = vst [vmem:[#allocation17_spill] sm:$0xff] %v8614_v55  ;;  %v4526_v8 = vrot.slane %v4140_v27, %v8611_v9  ;;  %v4566_v55 = vrot.slane %v8446_v57, %v8588_v48 }
 0x330   :  { %9232 = vst [vmem:[#allocation18_spill] sm:$0xff] %v8617_v29  ;;  %v6389_v45 = vpop.f32.mrb[106].mxu1  ;;  %v9233_v29 = vld [vmem:[#allocation60_spill] sm:$0xff] }
 0x331   :  { %v4533_v27 = vsel %vm4532_vm10, %v4531_v15, %v4526_v8  ;;  %v8635_v44 = vmul.f32 %v6389_v45, %v9233_v29  ;;  %v4208_v10 = vpop.xlane.xlu1 %4207  ;;  %v3912_v34 = vpop.f32.mrb[107].mxu1  ;;  %v4714_v15 = vrot.slane %v4204_v60, %v8611_v9  ;;  %v4573_v45 = vrot.slane %v8455_v43, %v8597_v59 }
 0x332   :  { %v4540_v40 = vsel %vm4539_vm2, %v4538_v30, %v4533_v27  ;;  %v4723_v19 = vrot.slane %v4208_v10, %v8574_v16  ;;  %v8642_v23 = vmul.f32 %v3912_v34, %v9234_v26  ;;  %v4206_v57 = vpop.xlane.xlu0 %4205  ;;  %v4640_v30 = vsel %vm4532_vm10, %v4639_v22, %v4635_v46  ;;  %v9235_v22 = vld [vmem:[#allocation62_spill] sm:$0xff] }
 0x333   :  { %v4547_v8 = vsel %vm4546_vm3, %v4545_v42, %v4540_v40  ;;  %v4718_v29 = vrot.slane %v4206_v57, %v8607_v54  ;;  %v4649_v10 = vrot.slane %v8511_v62, %v8580_v1  ;;  %v4645_v57 = vsel %vm4539_vm2, %v4644_v7, %v4640_v30 }
 0x334   :  { %v4554_v26 = vsel %vm4553_vm4, %v4552_v52, %v4547_v8 }
 0x335   :  { %v4561_v40 = vsel %vm4560_vm5, %v4559_v25, %v4554_v26  ;;  %v4719_v60 = vsel %vm4532_vm10, %v4718_v29, %v4714_v15  ;;  %v6392_v42 = vpop.f32.mrb[108].mxu1  ;;  %v4212_v27 = vpop.xlane.xlu1 %4211  ;;  %v9236_v25 = vld [vmem:[#allocation63_spill] sm:$0xff]  ;;  %v4650_v29 = vsel %vm4546_vm3, %v4649_v10, %v4645_v57  ;;  %v4659_v26 = vrot.slane %v8521_v38, %v8591_v14 }
 0x336   :  { %v4568_v32 = vsel %vm4567_vm6, %v4566_v55, %v4561_v40  ;;  %v8663_v34 = vmul.f32 %v6392_v42, %v9235_v22  ;;  %v4733_v62 = vrot.slane %v4212_v27, %v8577_v12  ;;  %v3922_v52 = vpop.f32.mrb[109].mxu1  ;;  %v4724_v46 = vsel %vm4539_vm2, %v4723_v19, %v4719_v60  ;;  %v4210_v43 = vpop.xlane.xlu0 %4209  ;;  %v9237_v42 = vld [vmem:[#allocation64_spill] sm:$0xff] }
 0x337   :  { %v4575_v61 = vsel %vm4574_vm7, %v4573_v45, %v4568_v32  ;;  %v8670_v8 = vmul.f32 %v3922_v52, %v9236_v25  ;;  %v4728_v15 = vrot.slane %v4210_v43, %v8580_v1  ;;  %v4597_v55 = vadd.s32 4294967208, %v6723_v17  ;;  %v9238_v52 = vld [vmem:[#allocation65_spill] sm:$0xff] }
 0x338   :  { %v8678_v19 = vsub.s32 %v4604_v53, %v8548_v56  ;;  %v4582_v7 = vsel %vm4581_vm8, %v4580_v2, %v4575_v61  ;;  %v4587_v60 = vrot.slane %v8461_v6, %v8603_v5  ;;  %v4664_v53 = vrot.slane %v8516_v21, %v8588_v48 }
 0x339   :  { %v4729_v30 = vsel %vm4546_vm3, %v4728_v15, %v4724_v46  ;;  %v6395_v45 = vpop.f32.mrb[110].mxu1  ;;  %v4216_v40 = vpop.xlane.xlu1 %4215  ;;  %v4655_v2 = vsel %vm4553_vm4, %v4654_v31, %v4650_v29  ;;  %v8693_v57 = vsub.s32 %v4597_v55, %v8548_v56  ;;  %v4669_v61 = vrot.slane %v8527_v35, %v8597_v59 }
 0x33a   :  { %v4124_v27 = vmul.f32 %v6395_v45, %v9237_v42  ;;  %v4743_v10 = vrot.slane %v4216_v40, %v8588_v48  ;;  %v3932_v32 = vpop.f32.mrb[111].mxu1  ;;  %v4734_v38 = vsel %vm4553_vm4, %v4733_v62, %v4729_v30  ;;  %v4214_v22 = vpop.xlane.xlu0 %4213  ;;  %v4660_v6 = vsel %vm4560_vm5, %v4659_v26, %v4655_v2  ;;  %v9239_v26 = vld [vmem:[#allocation66_spill] sm:$0xff] }
 0x33b   :  { %v4123_v46 = vmul.f32 %v3932_v32, %v9238_v52  ;;  %v4738_v43 = vrot.slane %v4214_v22, %v8591_v14  ;;  %v4589_v62 = vsel %vm4588_vm9, %v4587_v60, %v4582_v7  ;;  %v4594_v21 = vrot.slane %v8458_v63, %v8600_v11  ;;  %v9240_v60 = vld [vmem:[#allocation67_spill] sm:$0xff] }
 0x33c   :  { %4365 = vadd.xlane.f32.xlu1 %v4124_v27  ;;  %v4611_v31 = vadd.s32 4294967192, %v6723_v17  ;;  %v4674_v29 = vrot.slane %v8524_v13, %v8594_v49  ;;  %v4665_v63 = vsel %vm4567_vm6, %v4664_v53, %v4660_v6  ;;  %v4618_v13 = vadd.s32 4294967184, %v6723_v17 }
 0x33d   :  { %v4739_v25 = vsel %vm4560_vm5, %v4738_v43, %v4734_v38  ;;  %v6398_v15 = vpop.f32.mrb[112].mxu1  ;;  %4363 = vadd.xlane.f32.xlu0 %v4123_v46  ;;  %v4220_v55 = vpop.xlane.xlu1 %4219  ;;  %v4596_v32 = vsel %vm4595_vm11, %v4594_v21, %v4589_v62  ;;  %v4601_v38 = vrot.slane %v8471_v47, %v8693_v57  ;;  %v4670_v22 = vsel %vm4574_vm7, %v4669_v61, %v4665_v63  ;;  %v9241_v43 = vld [vmem:[#allocation68_spill] sm:$0xff]  ;;  %v9243_v63 = vld [vmem:[#allocation70_spill] sm:$0xff] }
 0x33e   :  { %v4126_v30 = vmul.f32 %v6398_v15, %v9239_v26  ;;  %v4753_v35 = vrot.slane %v4220_v55, %v8594_v49  ;;  %v3942_v7 = vpop.f32.mrb[113].mxu1  ;;  %v4744_v45 = vsel %vm4567_vm6, %v4743_v10, %v4739_v25  ;;  %v4218_v40 = vpop.xlane.xlu0 %4217  ;;  %v4679_v2 = vrot.slane %v8535_v20, %v8603_v5  ;;  %v9242_v25 = vld [vmem:[#allocation69_spill] sm:$0xff] }
 0x33f   :  { %v4125_v42 = vmul.f32 %v3942_v7, %v9240_v60  ;;  %v4748_v27 = vrot.slane %v4218_v40, %v8597_v59  ;;  %v4608_v10 = vrot.slane %v8466_v28, %v8678_v19  ;;  %v8722_v53 = vsub.s32 %v4611_v31, %v8548_v56 }
 0x340   :  { %4337 = vadd.xlane.f32.xlu1 %v8530_v0  ;;  %v4603_v28 = vsel %vm4602_vm12, %v4601_v38, %v4596_v32  ;;  %v4684_v21 = vrot.slane %v8532_v18, %v8600_v11  ;;  %v4675_v31 = vsel %vm4581_vm8, %v4674_v29, %v4670_v22  ;;  %v4625_v55 = vadd.s32 4294967176, %v6723_v17 }
 0x341   :  { %v4749_v52 = vsel %vm4574_vm7, %v4748_v27, %v4744_v45  ;;  %v6401_v46 = vpop.f32.mrb[114].mxu1  ;;  %4307 = vadd.xlane.f32.xlu0 %v8469_v36  ;;  %v4224_v47 = vpop.xlane.xlu1 %4223  ;;  %v4680_v26 = vsel %vm4588_vm9, %v4679_v2, %v4675_v31  ;;  %v8745_v7 = vsub.s32 %v4618_v13, %v8548_v56  ;;  %v4610_v40 = vsel %vm4609_vm13, %v4608_v10, %v4603_v28  ;;  %v9244_v13 = vld [vmem:[#allocation71_spill] sm:$0xff] }
 0x342   :  { %v8727_v6 = vmul.f32 %v6401_v46, %v9241_v43  ;;  %v4763_v20 = vrot.slane %v4224_v47, %v8600_v11  ;;  %v3952_v61 = vpop.f32.mrb[115].mxu1  ;;  %v4754_v0 = vsel %vm4581_vm8, %v4753_v35, %v4749_v52  ;;  %v4222_v62 = vpop.xlane.xlu0 %4221  ;;  %v4689_v35 = vrot.slane %v8545_v50, %v8693_v57 }
 0x343   :  { %v8736_v15 = vmul.f32 %v3952_v61, %v9242_v25  ;;  %v4758_v36 = vrot.slane %v4222_v62, %v8603_v5  ;;  %v4615_v17 = vrot.slane %v8481_v33, %v8722_v53  ;;  %v4694_v38 = vrot.slane %v8540_v24, %v8678_v19  ;;  %v9245_v61 = vld [vmem:[#allocation72_spill] sm:$0xff] }
 0x344   :  { %4309 = vadd.xlane.f32.xlu1 %v8464_v3  ;;  %v8764_v33 = vsub.s32 %v4625_v55, %v8548_v56  ;;  %v4699_v52 = vrot.slane %v8561_v37, %v8722_v53  ;;  %v4622_v24 = vrot.slane %v8476_v4, %v8745_v7  ;;  %v4704_v56 = vrot.slane %v8553_v41, %v8745_v7 }
 0x345   :  { %v4759_v18 = vsel %vm4588_vm9, %v4758_v36, %v4754_v0  ;;  %v6404_v29 = vpop.f32.mrb[116].mxu1  ;;  %4367 = vadd.xlane.f32.xlu0 %v4125_v42  ;;  %v4228_v45 = vpop.xlane.xlu1 %4227  ;;  %v4685_v42 = vsel %vm4595_vm11, %v4684_v21, %v4680_v26  ;;  %v4617_v46 = vsel %vm9077_vm0, %v4615_v17, %v4610_v40  ;;  %v9246_v21 = vld [vmem:[#allocation73_spill] sm:$0xff]  ;;  %v9247_v26 = vld [vmem:[#allocation12_spill] sm:$0xff]  ;;  %v9249_v40 = vld [vmem:[#allocation74_spill] sm:$0xff] }
 0x346   :  { %v8752_v60 = vmul.f32 %v6404_v29, %v9243_v63  ;;  %v4773_v50 = vrot.slane %v4228_v45, %v8678_v19  ;;  %v3962_v3 = vpop.f32.mrb[117].mxu1  ;;  %v4764_v27 = vsel %vm4595_vm11, %v4763_v20, %v4759_v18  ;;  %v4226_v32 = vpop.xlane.xlu0 %4225  ;;  %v4690_v10 = vsel %vm4602_vm12, %v4689_v35, %v4685_v42  ;;  %v9248_v29 = vld [vmem:[#allocation3_spill] sm:$0xff] }
 0x347   :  { %v8760_v22 = vmul.f32 %v3962_v3, %v9244_v13  ;;  %v4768_v2 = vrot.slane %v4226_v32, %v8693_v57  ;;  %v4695_v4 = vsel %vm4609_vm13, %v4694_v38, %v4690_v10  ;;  %v4624_v25 = vsel %vm4623_vm14, %v4622_v24, %v4617_v46  ;;  %v9251_v13 = vld [vmem:[#allocation2_spill] sm:$0xff] }
 0x348   :  { %4369 = vadd.xlane.f32.xlu1 %v4126_v30  ;;  %v4629_v41 = vrot.slane %v8491_v58, %v8764_v33  ;;  %v4700_v36 = vsel %vm9077_vm0, %v4699_v52, %v4695_v4  ;;  %v4709_v55 = vrot.slane %v8585_v51, %v8764_v33 }
 0x349   :  { %v4769_v47 = vsel %vm4602_vm12, %v4768_v2, %v4764_v27  ;;  %v6407_v43 = vpop.f32.mrb[118].mxu1  ;;  %4339 = vadd.xlane.f32.xlu0 %v8543_v39  ;;  %v4232_v20 = vpop.xlane.xlu1 %4231  ;;  %v4705_v51 = vsel %vm4623_vm14, %v4704_v56, %v4700_v36  ;;  %v9250_v27 = vld [vmem:[#allocation75_spill] sm:$0xff] }
 0x34a   :  { %v8777_v0 = vmul.f32 %v6407_v43, %v9245_v61  ;;  %v4783_v37 = vrot.slane %v4232_v20, %v8745_v7  ;;  %v3972_v30 = vpop.f32.mrb[119].mxu1  ;;  %v4774_v62 = vsel %vm4609_vm13, %v4773_v50, %v4769_v47  ;;  %v4230_v28 = vpop.xlane.xlu0 %4229  ;;  %v4631_v58 = vsel %vm4630_vm15, %v4629_v41, %v4624_v25  ;;  %v9252_v47 = vld [vmem:[#allocation76_spill] sm:$0xff]  ;;  %v9255_v25 = vld [vmem:[#allocation78_spill] sm:$0xff] }
 0x34b   :  { %v8783_v31 = vmul.f32 %v3972_v30, %v9246_v21  ;;  %v4778_v39 = vrot.slane %v4230_v28, %v8722_v53  ;;  %v4710_v42 = vsel %vm4630_vm15, %v4709_v55, %v4705_v51  ;;  %v9253_v30 = vld [vmem:[#allocation77_spill] sm:$0xff]  ;;  %v9254_v21 = vld [vmem:[#allocation14_spill] sm:$0xff] }
 0x34c   :  { %4341 = vadd.xlane.f32.xlu1 %v9247_v26  ;;  %v5186_v2 = vsel %vm5185_vm1, %v4710_v42, %v4631_v58  ;;  %vm5189_vm1 = vcmask 1043459  }
 0x34d   :  { %v4779_v35 = vsel %vm9077_vm0, %v4778_v39, %v4774_v62  ;;  %v6410_v18 = vpop.f32.mrb[120].mxu1  ;;  %4311 = vadd.xlane.f32.xlu0 %v9248_v29  ;;  %v4236_v45 = vpop.xlane.xlu1 %4235  ;;  %vm5187_vm0 = vcmask 1042434  }
 0x34e   :  { %v8796_v17 = vmul.f32 %v6410_v18, %v9249_v40  ;;  %v3982_v63 = vpop.f32.mrb[121].mxu1  ;;  %v4784_v50 = vsel %vm4623_vm14, %v4783_v37, %v4779_v35  ;;  %v4234_v3 = vpop.xlane.xlu0 %4233  ;;  %v4793_v37 = vrot.slane %v4236_v45, %v8611_v9  ;;  %v9256_v18 = vld [vmem:[#allocation79_spill] sm:$0xff]  ;;  %v9257_v45 = vld [vmem:[#allocation13_spill] sm:$0xff] }
 0x34f   :  { %v8802_v32 = vmul.f32 %v3982_v63, %v9250_v27  ;;  %v4788_v38 = vrot.slane %v4234_v3, %v8764_v33  ;;  %v9258_v63 = vld [vmem:[#allocation5_spill] sm:$0xff] }
 0x350   :  { %4313 = vadd.xlane.f32.xlu1 %v9251_v13 }
 0x351   :  { %v4789_v10 = vsel %vm4630_vm15, %v4788_v38, %v4784_v50  ;;  %v6413_v52 = vpop.f32.mrb[122].mxu1  ;;  %4371 = vadd.xlane.f32.xlu0 %v8736_v15  ;;  %v4240_v46 = vpop.xlane.xlu1 %4239  ;;  %v9259_v38 = vld [vmem:[#allocation4_spill] sm:$0xff] }
 0x352   :  { %v8809_v24 = vsel %vm5187_vm0, %v4789_v10, %v5186_v2  ;;  %v8812_v43 = vmul.f32 %v6413_v52, %v9252_v47  ;;  %v4802_v20 = vrot.slane %v4240_v46, %v8574_v16  ;;  %v3992_v56 = vpop.f32.mrb[123].mxu1  ;;  %v4238_v61 = vpop.xlane.xlu0 %4237  ;;  %vm9264_vm0 = vcmask 917312  }
 0x353   :  { %v8817_v62 = vmul.f32 %v3992_v56, %v9253_v30  ;;  %v4797_v28 = vrot.slane %v4238_v61, %v8607_v54 }
 0x354   :  { %4373 = vadd.xlane.f32.xlu1 %v8727_v6 }
 0x355   :  { %v4798_v15 = vsel %vm4532_vm10, %v4797_v28, %v4793_v37  ;;  %v6416_v4 = vpop.f32.mrb[124].mxu1  ;;  %4343 = vadd.xlane.f32.xlu0 %v9254_v21  ;;  %v4244_v39 = vpop.xlane.xlu1 %4243  ;;  %v9261_v28 = vld [vmem:[#allocation15_spill] sm:$0xff] }
 0x356   :  { %v8824_v41 = vmul.f32 %v6416_v4, %v9255_v25  ;;  %v4812_v36 = vrot.slane %v4244_v39, %v8577_v12  ;;  %v4002_v55 = vpop.f32.mrb[125].mxu1  ;;  %v4803_v26 = vsel %vm4539_vm2, %v4802_v20, %v4798_v15  ;;  %v4242_v35 = vpop.xlane.xlu0 %4241  ;;  %v9260_v20 = vld [vmem:[#allocation16_spill] sm:$0xff]  ;;  %v9262_v4 = vld [vmem:[#allocation7_spill] sm:$0xff] }
 0x357   :  { %v8829_v29 = vmul.f32 %v4002_v55, %v9256_v18  ;;  %v4807_v6 = vrot.slane %v4242_v35, %v8580_v1  ;;  %v9263_v55 = vld [vmem:[#allocation6_spill] sm:$0xff] }
 0x358   :  { %4345 = vadd.xlane.f32.xlu1 %v9257_v45 }
 0x359   :  { %v4808_v40 = vsel %vm4546_vm3, %v4807_v6, %v4803_v26  ;;  %4315 = vadd.xlane.f32.xlu0 %v9258_v63  ;;  %v4248_v58 = vpop.xlane.xlu1 %4247 }
 0x35a   :  { %v4822_v50 = vrot.slane %v4248_v58, %v8588_v48  ;;  %v4813_v3 = vsel %vm4553_vm4, %v4812_v36, %v4808_v40  ;;  %v4246_v51 = vpop.xlane.xlu0 %4245  ;;  %v9265_v58 = vld [vmem:[#allocation18_spill] sm:$0xff] }
 0x35b   :  { %v4817_v27 = vrot.slane %v4246_v51, %v8591_v14 }
 0x35c   :  { %4317 = vadd.xlane.f32.xlu1 %v9259_v38 }
 0x35d   :  { %v4818_v42 = vsel %vm4560_vm5, %v4817_v27, %v4813_v3  ;;  %4375 = vadd.xlane.f32.xlu0 %v8760_v22  ;;  %v4252_v13 = vpop.xlane.xlu1 %4251  ;;  %v9266_v27 = vld [vmem:[#allocation17_spill] sm:$0xff] }
 0x35e   :  { %v4832_v2 = vrot.slane %v4252_v13, %v8594_v49  ;;  %v4823_v10 = vsel %vm4567_vm6, %v4822_v50, %v4818_v42  ;;  %v4250_v52 = vpop.xlane.xlu0 %4249  ;;  %v9267_v42 = vld [vmem:[#allocation9_spill] sm:$0xff] }
 0x35f   :  { %v4827_v46 = vrot.slane %v4250_v52, %v8597_v59 }
 0x360   :  { %4377 = vadd.xlane.f32.xlu1 %v8752_v60 }
 0x361   :  { %v4828_v47 = vsel %vm4574_vm7, %v4827_v46, %v4823_v10  ;;  %4347 = vadd.xlane.f32.xlu0 %v9260_v20  ;;  %v4256_v56 = vpop.xlane.xlu1 %4255 }
 0x362   :  { %v4842_v61 = vrot.slane %v4256_v56, %v8600_v11  ;;  %v4833_v37 = vsel %vm4581_vm8, %v4832_v2, %v4828_v47  ;;  %v4254_v22 = vpop.xlane.xlu0 %4253  ;;  %v9268_v47 = vld [vmem:[#allocation8_spill] sm:$0xff] }
 0x363   :  { %v4837_v30 = vrot.slane %v4254_v22, %v8603_v5 }
 0x364   :  { %4349 = vadd.xlane.f32.xlu1 %v9261_v28 }
 0x365   :  { %v4838_v15 = vsel %vm4588_vm9, %v4837_v30, %v4833_v37  ;;  %4319 = vadd.xlane.f32.xlu0 %v9262_v4  ;;  %v4260_v21 = vpop.xlane.xlu1 %4259 }
 0x366   :  { %v4852_v60 = vrot.slane %v4260_v21, %v8678_v19  ;;  %v4843_v39 = vsel %vm4595_vm11, %v4842_v61, %v4838_v15  ;;  %v4258_v25 = vpop.xlane.xlu0 %4257 }
 0x367   :  { %v4847_v36 = vrot.slane %v4258_v25, %v8693_v57 }
 0x368   :  { %4321 = vadd.xlane.f32.xlu1 %v9263_v55 }
 0x369   :  { %v4848_v26 = vsel %vm4602_vm12, %v4847_v36, %v4843_v39  ;;  %4379 = vadd.xlane.f32.xlu0 %v8783_v31  ;;  %v4264_v35 = vpop.xlane.xlu1 %4263  ;;  %v9269_v39 = vld [vmem:[#allocation11_spill] sm:$0xff] }
 0x36a   :  { %v4862_v18 = vrot.slane %v4264_v35, %v8745_v7  ;;  %v4853_v6 = vsel %vm4609_vm13, %v4852_v60, %v4848_v26  ;;  %v4262_v45 = vpop.xlane.xlu0 %4261  ;;  %v9270_v26 = vld [vmem:[#allocation10_spill] sm:$0xff] }
 0x36b   :  { %v4857_v40 = vrot.slane %v4262_v45, %v8722_v53 }
 0x36c   :  { %4381 = vadd.xlane.f32.xlu1 %v8777_v0 }
 0x36d   :  { %v4858_v63 = vsel %vm9264_vm0, %v4857_v40, %v4853_v6  ;;  %4351 = vadd.xlane.f32.xlu0 %v9265_v58  ;;  %v4268_v50 = vpop.xlane.xlu1 %4267 }
 0x36e   :  { %v4863_v3 = vsel %vm4623_vm14, %v4862_v18, %v4858_v63  ;;  %v4266_v51 = vpop.xlane.xlu0 %4265  ;;  %v4872_v52 = vrot.slane %v4268_v50, %v8611_v9 }
 0x36f   :  { %v4867_v31 = vrot.slane %v4266_v51, %v8764_v33 }
 0x370   :  { %4353 = vadd.xlane.f32.xlu1 %v9266_v27 }
 0x371   :  { %v4868_v38 = vsel %vm4630_vm15, %v4867_v31, %v4863_v3  ;;  %4323 = vadd.xlane.f32.xlu0 %v9267_v42  ;;  %v4272_v13 = vpop.xlane.xlu1 %4271 }
 0x372   :  { %v8871_v0 = vsel %vm5189_vm1, %v4868_v38, %v8809_v24  ;;  %v4881_v2 = vrot.slane %v4272_v13, %v8574_v16  ;;  %v4270_v10 = vpop.xlane.xlu0 %4269  ;;  %vm5191_vm1 = vcmask 1044484  }
 0x373   :  { %v4876_v46 = vrot.slane %v4270_v10, %v8607_v54 }
 0x374   :  { %4325 = vadd.xlane.f32.xlu1 %v9268_v47 }
 0x375   :  { %v4877_v20 = vsel %vm4532_vm10, %v4876_v46, %v4872_v52  ;;  %4383 = vadd.xlane.f32.xlu0 %v8802_v32  ;;  %v4276_v56 = vpop.xlane.xlu1 %4275 }
 0x376   :  { %v4891_v61 = vrot.slane %v4276_v56, %v8577_v12  ;;  %v4882_v37 = vsel %vm4539_vm2, %v4881_v2, %v4877_v20  ;;  %v4274_v24 = vpop.xlane.xlu0 %4273 }
 0x377   :  { %v4886_v22 = vrot.slane %v4274_v24, %v8580_v1 }
 0x378   :  { %4385 = vadd.xlane.f32.xlu1 %v8796_v17 }
 0x379   :  { %v4887_v30 = vsel %vm4546_vm3, %v4886_v22, %v4882_v37  ;;  %4355 = vadd.xlane.f32.xlu0 %v8642_v23  ;;  %v4280_v28 = vpop.xlane.xlu1 %4279 }
 0x37a   :  { %v4901_v15 = vrot.slane %v4280_v28, %v8588_v48  ;;  %v4892_v4 = vsel %vm4553_vm4, %v4891_v61, %v4887_v30  ;;  %v4278_v32 = vpop.xlane.xlu0 %4277 }
 0x37b   :  { %v4896_v21 = vrot.slane %v4278_v32, %v8591_v14 }
 0x37c   :  { %4357 = vadd.xlane.f32.xlu1 %v8635_v44 }
 0x37d   :  { %v4897_v60 = vsel %vm4560_vm5, %v4896_v21, %v4892_v4  ;;  %4327 = vadd.xlane.f32.xlu0 %v9269_v39  ;;  %v4284_v25 = vpop.xlane.xlu1 %4283 }
 0x37e   :  { %v4911_v17 = vrot.slane %v4284_v25, %v8594_v49  ;;  %v4902_v36 = vsel %vm4567_vm6, %v4901_v15, %v4897_v60  ;;  %v4282_v23 = vpop.xlane.xlu0 %4281 }
 0x37f   :  { %v4906_v55 = vrot.slane %v4282_v23, %v8597_v59 }
 0x380   :  { %4329 = vadd.xlane.f32.xlu1 %v9270_v26 }
 0x381   :  { %v4907_v35 = vsel %vm4574_vm7, %v4906_v55, %v4902_v36  ;;  %4387 = vadd.xlane.f32.xlu0 %v8817_v62  ;;  %v4288_v18 = vpop.xlane.xlu1 %4287 }
 0x382   :  { %v4921_v44 = vrot.slane %v4288_v18, %v8600_v11  ;;  %v4912_v6 = vsel %vm4581_vm8, %v4911_v17, %v4907_v35  ;;  %v4286_v45 = vpop.xlane.xlu0 %4285 }
 0x383   :  { %v4916_v40 = vrot.slane %v4286_v45, %v8603_v5 }
 0x384   :  { %4389 = vadd.xlane.f32.xlu1 %v8812_v43 }
 0x385   :  { %v4917_v63 = vsel %vm4588_vm9, %v4916_v40, %v4912_v6  ;;  %4359 = vadd.xlane.f32.xlu0 %v8670_v8  ;;  %v4292_v58 = vpop.xlane.xlu1 %4291 }
 0x386   :  { %v4931_v50 = vrot.slane %v4292_v58, %v8678_v19  ;;  %v4922_v3 = vsel %vm4595_vm11, %v4921_v44, %v4917_v63  ;;  %v4290_v62 = vpop.xlane.xlu0 %4289 }
 0x387   :  { %v4926_v51 = vrot.slane %v4290_v62, %v8693_v57 }
 0x388   :  { %4391 = vadd.xlane.f32.xlu1 %v8829_v29 }
 0x389   :  { %v4927_v31 = vsel %vm4602_vm12, %v4926_v51, %v4922_v3  ;;  %4361 = vadd.xlane.f32.xlu0 %v8663_v34  ;;  %v4296_v27 = vpop.xlane.xlu1 %4295 }
 0x38a   :  { %v4941_v43 = vrot.slane %v4296_v27, %v8745_v7  ;;  %v4932_v38 = vsel %vm4609_vm13, %v4931_v50, %v4927_v31  ;;  %v4294_v8 = vpop.xlane.xlu0 %4293 }
 0x38b   :  { %v4936_v42 = vrot.slane %v4294_v8, %v8722_v53 }
 0x38d   :  { %v4937_v13 = vsel %vm9264_vm0, %v4936_v42, %v4932_v38  ;;  %4393 = vadd.xlane.f32.xlu0 %v8824_v41  ;;  %v4300_v2 = vpop.xlane.xlu1 %4299  ;;  %vm5193_vm0 = vcmask 1045509  }
 0x38e   :  { %v4942_v10 = vsel %vm4623_vm14, %v4941_v43, %v4937_v13  ;;  %v4298_v29 = vpop.xlane.xlu0 %4297  ;;  %v4951_v61 = vrot.slane %v4300_v2, %v8611_v9 }
 0x38f   :  { %v4946_v52 = vrot.slane %v4298_v29, %v8764_v33 }
 0x391   :  { %v4947_v34 = vsel %vm4630_vm15, %v4946_v52, %v4942_v10  ;;  %v4304_v46 = vpop.xlane.xlu1 %4303 }
 0x392   :  { %v8918_v47 = vsel %vm5191_vm1, %v4947_v34, %v8871_v0  ;;  %v4960_v20 = vrot.slane %v4304_v46, %v8574_v16  ;;  %v4302_v56 = vpop.xlane.xlu0 %4301 }
 0x393   :  { %v4955_v41 = vrot.slane %v4302_v56, %v8607_v54 }
 0x395   :  { %v4956_v37 = vsel %vm4532_vm10, %v4955_v41, %v4951_v61 }
 0x396   :  { %v4961_v24 = vsel %vm4539_vm2, %v4960_v20, %v4956_v37 }
 0x3a8   :  { %v4334_v22 = vpop.xlane.xlu1 %4333 }
 0x3a9   :  { %v5034_v30 = vrot.slane %v4334_v22, %v8607_v54  ;;  %v4332_v28 = vpop.xlane.xlu0 %4331 }
 0x3aa   :  { %v5030_v15 = vrot.slane %v4332_v28, %v8611_v9 }
 0x3ac   :  { %v5035_v0 = vsel %vm4532_vm10, %v5034_v30, %v5030_v15 }
 0x3ad   :  { %v4336_v4 = vpop.xlane.xlu1 %4335  ;;  %v4306_v32 = vpop.xlane.xlu0 %4305 }
 0x3ae   :  { %v5039_v21 = vrot.slane %v4336_v4, %v8574_v16  ;;  %v4965_v60 = vrot.slane %v4306_v32, %v8580_v1 }
 0x3b0   :  { %v8931_v39 = vsel %vm4539_vm2, %v5039_v21, %v5035_v0  ;;  %v4966_v25 = vsel %vm4546_vm3, %v4965_v60, %v4961_v24 }
 0x3c9   :  { %v4366_v17 = vpop.xlane.xlu1 %4365 }
 0x3ca   :  { %v4364_v36 = vpop.xlane.xlu0 %4363  ;;  %v5113_v0 = vrot.slane %v4366_v17, %v8607_v54 }
 0x3cb   :  { %v5109_v4 = vrot.slane %v4364_v36, %v8611_v9 }
 0x3cd   :  { %v4338_v23 = vpop.xlane.xlu1 %4337 }
 0x3ce   :  { %v4308_v55 = vpop.xlane.xlu0 %4307  ;;  %v5044_v60 = vrot.slane %v4338_v23, %v8580_v1 }
 0x3cf   :  { %v4970_v34 = vrot.slane %v4308_v55, %v8577_v12 }
 0x3d1   :  { %v4310_v26 = vpop.xlane.xlu1 %4309  ;;  %v4971_v37 = vsel %vm4553_vm4, %v4970_v34, %v4966_v25 }
 0x3d2   :  { %v4368_v35 = vpop.xlane.xlu0 %4367  ;;  %v4975_v20 = vrot.slane %v4310_v26, %v8591_v14 }
 0x3d3   :  { %v5118_v25 = vrot.slane %v4368_v35, %v8574_v16  ;;  %v5114_v16 = vsel %vm4532_vm10, %v5113_v0, %v5109_v4  ;;  %vm9271_vm10 = vcmask 917312  }
 0x3d4   :  { %v4976_v30 = vsel %vm4560_vm5, %v4975_v20, %v4971_v37 }
 0x3d5   :  { %v4370_v18 = vpop.xlane.xlu1 %4369 }
 0x3d6   :  { %v4340_v44 = vpop.xlane.xlu0 %4339 }
 0x3d9   :  { %v8934_v6 = vpop.xlane.xlu1 %4341 }
 0x3da   :  { %v4312_v45 = vpop.xlane.xlu0 %4311  ;;  %v5054_v35 = vrot.slane %v8934_v6, %v8591_v14 }
 0x3db   :  { %v4980_v61 = vrot.slane %v4312_v45, %v8588_v48  ;;  %v5123_v45 = vrot.slane %v4370_v18, %v8580_v1 }
 0x3dd   :  { %v4314_v40 = vpop.xlane.xlu1 %4313  ;;  %v4981_v32 = vsel %vm4567_vm6, %v4980_v61, %v4976_v30 }
 0x3de   :  { %v8936_v63 = vpop.xlane.xlu0 %4371  ;;  %v4985_v41 = vrot.slane %v4314_v40, %v8597_v59  ;;  %v5049_v40 = vrot.slane %v4340_v44, %v8577_v12  ;;  %v5045_v44 = vsel %vm4546_vm3, %v5044_v60, %v8931_v39 }
 0x3df   :  { %v5128_v39 = vrot.slane %v8936_v63, %v8577_v12 }
 0x3e0   :  { %v4986_v55 = vsel %vm4574_vm7, %v4985_v41, %v4981_v32  ;;  %v5050_v34 = vsel %vm4553_vm4, %v5049_v40, %v5045_v44 }
 0x3e1   :  { %v8938_v58 = vpop.xlane.xlu1 %4373 }
 0x3e2   :  { %v8940_v50 = vpop.xlane.xlu0 %4343  ;;  %v5133_v30 = vrot.slane %v8938_v58, %v8591_v14 }
 0x3e5   :  { %v8942_v3 = vpop.xlane.xlu1 %4345 }
 0x3e6   :  { %v4316_v62 = vpop.xlane.xlu0 %4315  ;;  %v5064_v6 = vrot.slane %v8942_v3, %v8597_v59 }
 0x3e7   :  { %v4990_v24 = vrot.slane %v4316_v62, %v8594_v49 }
 0x3e9   :  { %v4318_v51 = vpop.xlane.xlu1 %4317  ;;  %v4991_v54 = vsel %vm4581_vm8, %v4990_v24, %v4986_v55  ;;  %v5055_v24 = vsel %vm4560_vm5, %v5054_v35, %v5050_v34 }
 0x3ea   :  { %v8944_v31 = vpop.xlane.xlu0 %4375  ;;  %v4995_v28 = vrot.slane %v4318_v51, %v8603_v5  ;;  %v5119_v51 = vsel %vm4539_vm2, %v5118_v25, %v5114_v16  ;;  %vm5195_vm2 = vcmask 1046534  }
 0x3eb   :  { %v5138_v63 = vrot.slane %v8944_v31, %v8588_v48 }
 0x3ec   :  { %v4996_v36 = vsel %vm4588_vm9, %v4995_v28, %v4991_v54 }
 0x3ed   :  { %v8946_v27 = vpop.xlane.xlu1 %4377 }
 0x3ee   :  { %v8948_v43 = vpop.xlane.xlu0 %4347  ;;  %v5143_v14 = vrot.slane %v8946_v27, %v8597_v59 }
 0x3ef   :  { %v5069_v61 = vrot.slane %v8948_v43, %v8594_v49 }
 0x3f1   :  { %v8950_v38 = vpop.xlane.xlu1 %4349 }
 0x3f2   :  { %v4320_v8 = vpop.xlane.xlu0 %4319  ;;  %v5074_v3 = vrot.slane %v8950_v38, %v8603_v5 }
 0x3f3   :  { %v5000_v21 = vrot.slane %v4320_v8, %v8600_v11  ;;  %v5059_v8 = vrot.slane %v8940_v50, %v8588_v48 }
 0x3f5   :  { %v4322_v42 = vpop.xlane.xlu1 %4321  ;;  %v5001_v1 = vsel %vm4595_vm11, %v5000_v21, %v4996_v36  ;;  %v5060_v12 = vsel %vm4567_vm6, %v5059_v8, %v5055_v24 }
 0x3f6   :  { %v8952_v13 = vpop.xlane.xlu0 %4379  ;;  %v5005_v26 = vrot.slane %v4322_v42, %v8693_v57  ;;  %v5065_v4 = vsel %vm4574_vm7, %v5064_v6, %v5060_v12 }
 0x3f7   :  { %v5070_v48 = vsel %vm4581_vm8, %v5069_v61, %v5065_v4  ;;  %v5148_v31 = vrot.slane %v8952_v13, %v8594_v49 }
 0x3f8   :  { %v5006_v42 = vsel %vm4602_vm12, %v5005_v26, %v5001_v1  ;;  %v5075_v27 = vsel %vm4588_vm9, %v5074_v3, %v5070_v48 }
 0x3f9   :  { %v8954_v2 = vpop.xlane.xlu1 %4381 }
 0x3fa   :  { %v8956_v10 = vpop.xlane.xlu0 %4351 }
 0x3fb   :  { %v5079_v43 = vrot.slane %v8956_v10, %v8600_v11 }
 0x3fd   :  { %v8958_v29 = vpop.xlane.xlu1 %4353  ;;  %v5080_v55 = vsel %vm4595_vm11, %v5079_v43, %v5075_v27 }
 0x3fe   :  { %v4324_v52 = vpop.xlane.xlu0 %4323  ;;  %v5084_v58 = vrot.slane %v8958_v29, %v8693_v57  ;;  %v5153_v29 = vrot.slane %v8954_v2, %v8603_v5 }
 0x3ff   :  { %v5010_v9 = vrot.slane %v4324_v52, %v8678_v19  ;;  %v5124_v52 = vsel %vm4546_vm3, %v5123_v45, %v5119_v51  ;;  %vm9272_vm3 = vmmov %vm9271_vm10 }
 0x400   :  { %v5129_v21 = vsel %vm4553_vm4, %v5128_v39, %v5124_v52  ;;  %v5085_v26 = vsel %vm4602_vm12, %v5084_v58, %v5080_v55  ;;  %vm9273_vm4 = vmmov %vm9272_vm3 }
 0x401   :  { %v4326_v46 = vpop.xlane.xlu1 %4325  ;;  %v5134_v59 = vsel %vm4560_vm5, %v5133_v30, %v5129_v21  ;;  %vm5197_vm5 = vcmask 1047559  }
 0x402   :  { %v8962_v56 = vpop.xlane.xlu0 %4383  ;;  %v5015_v62 = vrot.slane %v4326_v46, %v8722_v53  ;;  %v5011_v46 = vsel %vm4609_vm13, %v5010_v9, %v5006_v42  ;;  %v5139_v25 = vsel %vm4567_vm6, %v5138_v63, %v5134_v59 }
 0x403   :  { %v5158_v49 = vrot.slane %v8962_v56, %v8600_v11 }
 0x404   :  { %v5016_v50 = vsel %vm9271_vm10, %v5015_v62, %v5011_v46 }
 0x405   :  { %v8968_v22 = vpop.xlane.xlu1 %4385 }
 0x406   :  { %v8972_v15 = vpop.xlane.xlu0 %4355  ;;  %v5163_v45 = vrot.slane %v8968_v22, %v8693_v57 }
 0x407   :  { %v5089_v10 = vrot.slane %v8972_v15, %v8678_v19  ;;  %v5144_v15 = vsel %vm4574_vm7, %v5143_v14, %v5139_v25 }
 0x408   :  { %v5149_v5 = vsel %vm4581_vm8, %v5148_v31, %v5144_v15 }
 0x409   :  { %v4358_v17 = vpop.xlane.xlu1 %4357  ;;  %v5090_v2 = vsel %vm4609_vm13, %v5089_v10, %v5085_v26  ;;  %v5154_v11 = vsel %vm4588_vm9, %v5153_v29, %v5149_v5 }
 0x40a   :  { %v4328_v23 = vpop.xlane.xlu0 %4327  ;;  %v5159_v62 = vsel %vm4595_vm11, %v5158_v49, %v5154_v11 }
 0x40b   :  { %v5020_v18 = vrot.slane %v4328_v23, %v8745_v7  ;;  %v5164_v23 = vsel %vm4602_vm12, %v5163_v45, %v5159_v62 }
 0x40d   :  { %v4330_v20 = vpop.xlane.xlu1 %4329  ;;  %v5021_v28 = vsel %vm4623_vm14, %v5020_v18, %v5016_v50 }
 0x40e   :  { %v5025_v41 = vrot.slane %v4330_v20, %v8764_v33  ;;  %v4388_v37 = vpop.xlane.xlu0 %4387 }
 0x40f   :  { %v5168_v54 = vrot.slane %v4388_v37, %v8678_v19 }
 0x410   :  { %v5026_v0 = vsel %vm4630_vm15, %v5025_v41, %v5021_v28 }
 0x411   :  { %v5194_v38 = vsel %vm5193_vm0, %v5026_v0, %v8918_v47  ;;  %v4390_v32 = vpop.xlane.xlu1 %4389  ;;  %v5094_v47 = vrot.slane %v4358_v17, %v8722_v53  ;;  %v5169_v16 = vsel %vm4609_vm13, %v5168_v54, %v5164_v23 }
 0x412   :  { %v4360_v60 = vpop.xlane.xlu0 %4359  ;;  %v5173_v17 = vrot.slane %v4390_v32, %v8722_v53 }
 0x413   :  { %v5099_v13 = vrot.slane %v4360_v60, %v8745_v7  ;;  %v5095_v56 = vsel %vm9272_vm3, %v5094_v47, %v5090_v2 }
 0x414   :  { %v5174_v18 = vsel %vm9273_vm4, %v5173_v17, %v5169_v16 }
 0x415   :  { %v4392_v40 = vpop.xlane.xlu1 %4391  ;;  %v5100_v57 = vsel %vm4623_vm14, %v5099_v13, %v5095_v56 }
 0x416   :  { %v4362_v9 = vpop.xlane.xlu0 %4361  ;;  %v5178_v22 = vrot.slane %v4392_v40, %v8745_v7 }
 0x417   :  { %v5104_v36 = vrot.slane %v4362_v9, %v8764_v33 }
 0x418   :  { %v5179_v44 = vsel %vm4623_vm14, %v5178_v22, %v5174_v18 }
 0x419   :  { %v5105_v19 = vsel %vm4630_vm15, %v5104_v36, %v5100_v57 }
 0x41a   :  { %v5196_v35 = vsel %vm5195_vm2, %v5105_v19, %v5194_v38  ;;  %v4394_v1 = vpop.xlane.xlu0 %4393 }
 0x41b   :  { %v5183_v53 = vrot.slane %v4394_v1, %v8764_v33 }
 0x41d   :  { %v5184_v51 = vsel %vm4630_vm15, %v5183_v53, %v5179_v44 }
 0x41e   :  { %v5198_v8 = vsel %vm5197_vm5, %v5184_v51, %v5196_v35 }
 0x41f   :  { %5200 = vst [vmem:[%s9073_s4] sm:$0xff] %v5198_v8 }

</bundles_post_ra>
